<compile_context>
chip_gen: v6e
topology: v6e:2x2x1
jax: 0.10.0
libtpu: 0.0.40
codegen_flags: <defaults>
</compile_context>

<pallas_src>
import math
import jax
import jax.numpy as jnp
from jax import lax
from jax.experimental import pallas as pl
from jax.experimental.pallas import tpu as pltpu

# ---- synthetic "deberta-v3-large-like" config at small shapes ---------------
B = 2          # batch
S = 16         # sequence length
H = 32         # hidden size
NH = 4         # attention heads
DH = H // NH   # head dim
I = 64         # FFN intermediate size
L = 2          # encoder layers
V = 128        # vocab size (stands in for resize_token_embeddings(len(tokenizer)))
NSPAN = 3      # spans per example (start_end_list made rectangular)
NPAD = 128     # logits padded to a lane-dense [B, 128] slab
EPS = 1e-7     # DeBERTa layer_norm_eps

# TODO(synk): DeBERTa-v3 disentangled relative-position attention is not
# reproduced; a standard scaled-dot-product encoder layer is used instead.


def _layernorm(x, g, b):
    mu = jnp.mean(x, axis=-1, keepdims=True)
    var = jnp.mean((x - mu) ** 2, axis=-1, keepdims=True)
    return (x - mu) * lax.rsqrt(var + EPS) * g + b


# =========================== fused encoder kernel ============================

def _encoder_kernel(emb_ref, mask_ref, starts_ref, ends_ref,
                    eg_ref, eb_ref,
                    wqkv_ref, bqkv_ref, wo_ref, bo_ref, l1g_ref, l1b_ref,
                    w1_ref, b1_ref, w2_ref, b2_ref, l2g_ref, l2b_ref,
                    clsw_ref, clsb_ref,
                    out_ref, x_ref):
    l = pl.program_id(0)

    # ---- embedding LayerNorm (first grid step only) --------------------------
    @pl.when(l == 0)
    def _():
        x_ref[...] = _layernorm(emb_ref[...], eg_ref[...], eb_ref[...])

    x = x_ref[...]                                    # [B*S, H] f32, VMEM-resident
    xb = x.astype(jnp.bfloat16)

    # ---- fused QKV projection: one [H, 3H] GEMM, bf16 operands, f32 acc ------
    qkv = jnp.dot(xb, wqkv_ref[0],
                  preferred_element_type=jnp.float32) + bqkv_ref[0]   # [B*S, 3H]

    keep = mask_ref[...] > 0.5                        # [B, S] key-keep mask
    scale = 1.0 / math.sqrt(DH)

    # ---- multi-head attention, heads split in VMEM ---------------------------
    # Output projection decomposed per head: sum_h ctx_h @ Wo[h]  (== concat+GEMM)
    attn = jnp.zeros((B * S, H), jnp.float32)
    for h in range(NH):
        q = qkv[:, h * DH:(h + 1) * DH].reshape(B, S, DH).astype(jnp.bfloat16)
        k = qkv[:, H + h * DH:H + (h + 1) * DH].reshape(B, S, DH).astype(jnp.bfloat16)
        v = qkv[:, 2 * H + h * DH:2 * H + (h + 1) * DH].reshape(B, S, DH).astype(jnp.bfloat16)

        s = jnp.einsum('bqd,bkd->bqk', q, k,
                       preferred_element_type=jnp.float32) * scale     # [B, S, S]
        s = jnp.where(keep[:, None, :], s, -1e9)
        s = s - jnp.max(s, axis=-1, keepdims=True)
        p = jnp.exp(s)
        p = p * pl.reciprocal(jnp.sum(p, axis=-1, keepdims=True), approx=True)

        ctx = jnp.einsum('bqk,bkd->bqd', p.astype(jnp.bfloat16), v,
                         preferred_element_type=jnp.float32)            # [B, S, DH]
        attn = attn + jnp.dot(ctx.reshape(B * S, DH).astype(jnp.bfloat16),
                              wo_ref[0, h],
                              preferred_element_type=jnp.float32)
    attn = attn + bo_ref[0]

    # ---- residual + LayerNorm fused in epilogue ------------------------------
    x = _layernorm(attn + x, l1g_ref[0], l1b_ref[0])

    # ---- FFN (bf16 GEMMs, f32 accumulation, GELU in f32) ---------------------
    h1 = jnp.dot(x.astype(jnp.bfloat16), w1_ref[0],
                 preferred_element_type=jnp.float32) + b1_ref[0]
    # TODO(synk): tanh-approx GELU instead of HF DeBERTa's exact erf-GELU.
    h1 = 0.5 * h1 * (1.0 + jnp.tanh(0.7978845608028654 *
                                    (h1 + 0.044715 * h1 * h1 * h1)))
    ffn = jnp.dot(h1.astype(jnp.bfloat16), w2_ref[0],
                  preferred_element_type=jnp.float32) + b2_ref[0]
    x = _layernorm(ffn + x, l2g_ref[0], l2b_ref[0])
    x_ref[...] = x                                    # carry to next layer

    # ---- classifier + span mean-pool (last grid step only) -------------------
    @pl.when(l == pl.num_programs(0) - 1)
    def _():
        # classifier(mean(h)) == mean(classifier(h)) for an affine layer, so
        # score every token first and mean-pool scalars over each span.
        x3 = x.reshape(B, S, H)
        s_tok = jnp.sum(x3 * clsw_ref[...], axis=-1) + clsb_ref[...]    # [B, S]
        starts = starts_ref[...]
        ends = ends_ref[...]
        col = lax.broadcasted_iota(jnp.int32, (B, NPAD, S), 2)
        span = (col >= starts[:, :, None]) & (col < ends[:, :, None])
        pooled = jnp.sum(jnp.where(span, s_tok[:, None, :], 0.0), axis=-1)
        lens = jnp.maximum(ends - starts, 1).astype(jnp.float32)  # zero-span guard
        out_ref[...] = pooled / lens                               # [B, NPAD]


# ============================ pallas_call wrapper ============================

def _const2(shape):
    return pl.BlockSpec(shape, lambda l: (0, 0))


def _per_layer(shape_tail):
    nd = len(shape_tail)
    return pl.BlockSpec((1,) + shape_tail,
                        lambda l, _nd=nd: (l,) + (0,) * _nd)


def _build_in_specs():
    return [
        _const2((B * S, H)),        # emb (token + pos embeddings, pre-LN)
        _const2((B, S)),            # attention mask
        _const2((B, NPAD)),         # span starts (padded)
        _const2((B, NPAD)),         # span ends   (padded)
        _const2((1, H)),            # emb LN gamma
        _const2((1, H)),            # emb LN beta
        _per_layer((H, 3 * H)),     # wqkv (bf16)
        _per_layer((1, 3 * H)),     # bqkv
        _per_layer((NH, DH, H)),    # wo per-head (bf16)
        _per_layer((1, H)),         # bo
        _per_layer((1, H)),         # ln1 gamma
        _per_layer((1, H)),         # ln1 beta
        _per_layer((H, I)),         # w1 (bf16)
        _per_layer((1, I)),         # b1
        _per_layer((I, H)),         # w2 (bf16)
        _per_layer((1, H)),         # b2
        _per_layer((1, H)),         # ln2 gamma
        _per_layer((1, H)),         # ln2 beta
        _const2((1, H)),            # classifier weight
        _const2((1, 1)),            # classifier bias
    ]


@jax.jit
def forward(params, input_ids, attention_mask, span_starts, span_ends):
    """Returns logits [B, NSPAN]: logits[n][i] == classifier(mean_pool(
    hidden[n, start_end_list[n][i][0]:start_end_list[n][i][1], :]))."""
    # embedding gather + position add (glue); everything else is one fused kernel
    emb = jnp.take(params['emb'], input_ids, axis=0) + params['pos'][None, :, :]
    x0 = emb.reshape(B * S, H)

    starts_p = jnp.zeros((B, NPAD), jnp.int32).at[:, :NSPAN].set(span_starts)
    ends_p = jnp.zeros((B, NPAD), jnp.int32).at[:, :NSPAN].set(span_ends)
    mask = attention_mask.astype(jnp.float32)

    logits_pad = pl.pallas_call(
        _encoder_kernel,
        out_shape=jax.ShapeDtypeStruct((B, NPAD), jnp.float32),
        grid=(L,),
        in_specs=_build_in_specs(),
        out_specs=pl.BlockSpec((B, NPAD), lambda l: (0, 0)),
        scratch_shapes=[pltpu.VMEM((B * S, H), jnp.float32)],
        compiler_params=pltpu.CompilerParams(
            dimension_semantics=("arbitrary",)),   # layers carry x sequentially
    )(x0, mask, starts_p, ends_p,
      params['emb_ln_g'], params['emb_ln_b'],
      params['wqkv'], params['bqkv'], params['wo'], params['bo'],
      params['ln1_g'], params['ln1_b'],
      params['w1'], params['b1'], params['w2'], params['b2'],
      params['ln2_g'], params['ln2_b'],
      params['cls_w'], params['cls_b'])

    return logits_pad[:, :NSPAN]


# ============================= model / params ================================

def init_params(key):
    ks = iter(jax.random.split(key, 32))

    def nrm(shape):
        return 0.02 * jax.random.normal(next(ks), shape, jnp.float32)

    return {
        'emb': nrm((V, H)),
        'pos': nrm((S, H)),
        'emb_ln_g': jnp.ones((1, H), jnp.float32),
        'emb_ln_b': jnp.zeros((1, H), jnp.float32),
        'cls_w': nrm((1, H)),                         # nn.Linear(H, 1).weight
        'cls_b': jnp.zeros((1, 1), jnp.float32),
        # stacked per-layer weights; matmul operands stored in bf16
        'wqkv': nrm((L, H, 3 * H)).astype(jnp.bfloat16),
        'bqkv': jnp.zeros((L, 1, 3 * H), jnp.float32),
        'wo':   nrm((L, NH, DH, H)).astype(jnp.bfloat16),
        'bo':   jnp.zeros((L, 1, H), jnp.float32),
        'ln1_g': jnp.ones((L, 1, H), jnp.float32),
        'ln1_b': jnp.zeros((L, 1, H), jnp.float32),
        'w1':   nrm((L, H, I)).astype(jnp.bfloat16),
        'b1':   jnp.zeros((L, 1, I), jnp.float32),
        'w2':   nrm((L, I, H)).astype(jnp.bfloat16),
        'b2':   jnp.zeros((L, 1, H), jnp.float32),
        'ln2_g': jnp.ones((L, 1, H), jnp.float32),
        'ln2_b': jnp.zeros((L, 1, H), jnp.float32),
    }


# ================================== main =====================================

if __name__ == "__main__":
    root = jax.random.PRNGKey(0)
    kp, ki = jax.random.split(root)
    params = init_params(kp)

    input_ids = jax.random.randint(ki, (B, S), 0, V, dtype=jnp.int32)
    attention_mask = jnp.ones((B, S), jnp.float32).at[1, S - 2:].set(0.0)

    # start_end_list (made rectangular: NSPAN spans per example)
    start_end_list = jnp.array(
        [[[0, 4], [4, 9], [9, 16]],
         [[0, 5], [5, 10], [10, 16]]], dtype=jnp.int32)        # [B, NSPAN, 2]
    span_starts = start_end_list[:, :, 0]
    span_ends = start_end_list[:, :, 1]

    logits = forward(params, input_ids, attention_mask, span_starts, span_ends)
    jax.block_until_ready(logits)
    assert logits.shape == (B, NSPAN)
    assert bool(jnp.all(jnp.isfinite(logits)))
    print("KERNEL_OK")
</pallas_src>

<mosaic_0001>
module attributes {stable_mosaic.version = 11 : i64} {
  func.func @_encoder_kernel(%arg0: i32, %arg1: memref<32x32xf32, #tpu.memory_space<vmem>>, %arg2: memref<2x16xf32, #tpu.memory_space<vmem>>, %arg3: memref<2x128xi32, #tpu.memory_space<vmem>>, %arg4: memref<2x128xi32, #tpu.memory_space<vmem>>, %arg5: memref<1x32xf32, #tpu.memory_space<vmem>>, %arg6: memref<1x32xf32, #tpu.memory_space<vmem>>, %arg7: memref<1x32x96xbf16, #tpu.memory_space<vmem>>, %arg8: memref<1x1x96xf32, #tpu.memory_space<vmem>>, %arg9: memref<1x4x8x32xbf16, #tpu.memory_space<vmem>>, %arg10: memref<1x1x32xf32, #tpu.memory_space<vmem>>, %arg11: memref<1x1x32xf32, #tpu.memory_space<vmem>>, %arg12: memref<1x1x32xf32, #tpu.memory_space<vmem>>, %arg13: memref<1x32x64xbf16, #tpu.memory_space<vmem>>, %arg14: memref<1x1x64xf32, #tpu.memory_space<vmem>>, %arg15: memref<1x64x32xbf16, #tpu.memory_space<vmem>>, %arg16: memref<1x1x32xf32, #tpu.memory_space<vmem>>, %arg17: memref<1x1x32xf32, #tpu.memory_space<vmem>>, %arg18: memref<1x1x32xf32, #tpu.memory_space<vmem>>, %arg19: memref<1x32xf32, #tpu.memory_space<vmem>>, %arg20: memref<1x1xf32, #tpu.memory_space<vmem>>, %arg21: memref<2x128xf32, #tpu.memory_space<vmem>>, %arg22: memref<32x32xf32, #tpu.memory_space<vmem>>) attributes {dimension_semantics = [#tpu.dimension_semantics<arbitrary>], iteration_bounds = array<i64: 2>, scalar_prefetch = 0 : i64, scratch_operands = 1 : i64, tpu.core_type = #tpu.core_type<tc>, window_params = [{pipeline_mode = #tpu.pipeline_mode<synchronous>, transform_indices = @transform_0, window_bounds = array<i64: 32, 32>}, {pipeline_mode = #tpu.pipeline_mode<synchronous>, transform_indices = @transform_1, window_bounds = array<i64: 2, 16>}, {pipeline_mode = #tpu.pipeline_mode<synchronous>, transform_indices = @transform_2, window_bounds = array<i64: 2, 128>}, {pipeline_mode = #tpu.pipeline_mode<synchronous>, transform_indices = @transform_3, window_bounds = array<i64: 2, 128>}, {pipeline_mode = #tpu.pipeline_mode<synchronous>, transform_indices = @transform_4, window_bounds = array<i64: 1, 32>}, {pipeline_mode = #tpu.pipeline_mode<synchronous>, transform_indices = @transform_5, window_bounds = array<i64: 1, 32>}, {transform_indices = @transform_6, window_bounds = array<i64: 1, 32, 96>}, {transform_indices = @transform_7, window_bounds = array<i64: 1, 1, 96>}, {transform_indices = @transform_8, window_bounds = array<i64: 1, 4, 8, 32>}, {transform_indices = @transform_9, window_bounds = array<i64: 1, 1, 32>}, {transform_indices = @transform_10, window_bounds = array<i64: 1, 1, 32>}, {transform_indices = @transform_11, window_bounds = array<i64: 1, 1, 32>}, {transform_indices = @transform_12, window_bounds = array<i64: 1, 32, 64>}, {transform_indices = @transform_13, window_bounds = array<i64: 1, 1, 64>}, {transform_indices = @transform_14, window_bounds = array<i64: 1, 64, 32>}, {transform_indices = @transform_15, window_bounds = array<i64: 1, 1, 32>}, {transform_indices = @transform_16, window_bounds = array<i64: 1, 1, 32>}, {transform_indices = @transform_17, window_bounds = array<i64: 1, 1, 32>}, {pipeline_mode = #tpu.pipeline_mode<synchronous>, transform_indices = @transform_18, window_bounds = array<i64: 1, 32>}, {pipeline_mode = #tpu.pipeline_mode<synchronous>, transform_indices = @transform_19, window_bounds = array<i64: 1, 1>}, {pipeline_mode = #tpu.pipeline_mode<synchronous>, transform_indices = @transform_20, window_bounds = array<i64: 2, 128>}]} {
    %c0_i32 = arith.constant 0 : i32
    %0 = arith.cmpi eq, %arg0, %c0_i32 : i32
    %1 = arith.extui %0 : i1 to i32
    %c0_i32_0 = arith.constant 0 : i32
    %2 = arith.cmpi ne, %1, %c0_i32_0 : i32
    scf.if %2 {
      %c0_99 = arith.constant 0 : index
      %c0_100 = arith.constant 0 : index
      %247 = vector.load %arg1[%c0_99, %c0_100] : memref<32x32xf32, #tpu.memory_space<vmem>>, vector<32x32xf32>
      %c0_101 = arith.constant 0 : index
      %c0_102 = arith.constant 0 : index
      %248 = vector.load %arg5[%c0_101, %c0_102] : memref<1x32xf32, #tpu.memory_space<vmem>>, vector<1x32xf32>
      %c0_103 = arith.constant 0 : index
      %c0_104 = arith.constant 0 : index
      %249 = vector.load %arg6[%c0_103, %c0_104] : memref<1x32xf32, #tpu.memory_space<vmem>>, vector<1x32xf32>
      %cst_105 = arith.constant dense<0.000000e+00> : vector<32xf32>
      %250 = vector.multi_reduction <add>, %247, %cst_105 [1] : vector<32x32xf32> to vector<32xf32>
      %251 = vector.shape_cast %250 : vector<32xf32> to vector<32x1xf32>
      %cst_106 = arith.constant 3.200000e+01 : f32
      %252 = vector.broadcast %cst_106 : f32 to vector<32x1xf32>
      %253 = arith.divf %251, %252 : vector<32x1xf32>
      %254 = vector.broadcast %253 : vector<32x1xf32> to vector<32x32xf32>
      %255 = arith.subf %247, %254 : vector<32x32xf32>
      %256 = arith.mulf %255, %255 : vector<32x32xf32>
      %cst_107 = arith.constant dense<0.000000e+00> : vector<32xf32>
      %257 = vector.multi_reduction <add>, %256, %cst_107 [1] : vector<32x32xf32> to vector<32xf32>
      %258 = vector.shape_cast %257 : vector<32xf32> to vector<32x1xf32>
      %cst_108 = arith.constant 3.200000e+01 : f32
      %259 = vector.broadcast %cst_108 : f32 to vector<32x1xf32>
      %260 = arith.divf %258, %259 : vector<32x1xf32>
      %261 = vector.broadcast %253 : vector<32x1xf32> to vector<32x32xf32>
      %262 = arith.subf %247, %261 : vector<32x32xf32>
      %cst_109 = arith.constant 1.000000e-07 : f32
      %263 = vector.broadcast %cst_109 : f32 to vector<32x1xf32>
      %264 = arith.addf %260, %263 : vector<32x1xf32>
      %265 = math.rsqrt %264 : vector<32x1xf32>
      %266 = vector.broadcast %265 : vector<32x1xf32> to vector<32x32xf32>
      %267 = arith.mulf %262, %266 : vector<32x32xf32>
      %268 = vector.broadcast %248 : vector<1x32xf32> to vector<32x32xf32>
      %269 = arith.mulf %267, %268 : vector<32x32xf32>
      %270 = vector.broadcast %249 : vector<1x32xf32> to vector<32x32xf32>
      %271 = arith.addf %269, %270 : vector<32x32xf32>
      %c0_110 = arith.constant 0 : index
      %c0_111 = arith.constant 0 : index
      %272 = vector.load %arg22[%c0_110, %c0_111] : memref<32x32xf32, #tpu.memory_space<vmem>>, vector<32x32xf32>
      tpu.vector_store %arg22[%c0_110, %c0_111], %271 {strides = array<i32>} : memref<32x32xf32, #tpu.memory_space<vmem>>, vector<32x32xf32>,
    } else {
    }
    %c0 = arith.constant 0 : index
    %c0_1 = arith.constant 0 : index
    %3 = vector.load %arg22[%c0, %c0_1] : memref<32x32xf32, #tpu.memory_space<vmem>>, vector<32x32xf32>
    %4 = arith.truncf %3 : vector<32x32xf32> to vector<32x32xbf16>
    %c0_2 = arith.constant 0 : index
    %c0_3 = arith.constant 0 : index
    %c0_4 = arith.constant 0 : index
    %5 = vector.load %arg7[%c0_2, %c0_3, %c0_4] : memref<1x32x96xbf16, #tpu.memory_space<vmem>>, vector<1x32x96xbf16>
    %6 = vector.shape_cast %5 : vector<1x32x96xbf16> to vector<32x96xbf16>
    %cst = arith.constant dense<0.000000e+00> : vector<32x96xf32>
    %7 = tpu.matmul %4, %6, %cst {dimension_numbers = #tpu.dot_dimension_numbers<[1], [0], [0], [1], [0, 0, 1, 1], [], []>} : vector<32x32xbf16>, vector<32x96xbf16>, vector<32x96xf32> -> vector<32x96xf32>
    %c0_5 = arith.constant 0 : index
    %c0_6 = arith.constant 0 : index
    %c0_7 = arith.constant 0 : index
    %8 = vector.load %arg8[%c0_5, %c0_6, %c0_7] : memref<1x1x96xf32, #tpu.memory_space<vmem>>, vector<1x1x96xf32>
    %9 = vector.shape_cast %8 : vector<1x1x96xf32> to vector<1x96xf32>
    %10 = vector.broadcast %9 : vector<1x96xf32> to vector<32x96xf32>
    %11 = arith.addf %7, %10 : vector<32x96xf32>
    %c0_8 = arith.constant 0 : index
    %c0_9 = arith.constant 0 : index
    %12 = vector.load %arg2[%c0_8, %c0_9] : memref<2x16xf32, #tpu.memory_space<vmem>>, vector<2x16xf32>
    %cst_10 = arith.constant 5.000000e-01 : f32
    %13 = vector.broadcast %cst_10 : f32 to vector<2x16xf32>
    %14 = arith.cmpf ogt, %12, %13 : vector<2x16xf32>
    %cst_11 = arith.constant 0.000000e+00 : f32
    %15 = vector.broadcast %cst_11 : f32 to vector<32x32xf32>
    %16 = vector.extract_strided_slice %11 {offsets = [0, 0], sizes = [32, 8], strides = [1, 1]} : vector<32x96xf32> to vector<32x8xf32>
    %17 = vector.shape_cast %16 : vector<32x8xf32> to vector<2x16x8xf32>
    %18 = arith.truncf %17 : vector<2x16x8xf32> to vector<2x16x8xbf16>
    %19 = vector.extract_strided_slice %11 {offsets = [0, 32], sizes = [32, 8], strides = [1, 1]} : vector<32x96xf32> to vector<32x8xf32>
    %20 = vector.shape_cast %19 : vector<32x8xf32> to vector<2x16x8xf32>
    %21 = arith.truncf %20 : vector<2x16x8xf32> to vector<2x16x8xbf16>
    %22 = vector.extract_strided_slice %11 {offsets = [0, 64], sizes = [32, 8], strides = [1, 1]} : vector<32x96xf32> to vector<32x8xf32>
    %23 = vector.shape_cast %22 : vector<32x8xf32> to vector<2x16x8xf32>
    %24 = arith.truncf %23 : vector<2x16x8xf32> to vector<2x16x8xbf16>
    "tpu.trace_start"() <{level = 10 : i32, message = "bqd,bkd->bqk"}> : () -> ()
    %cst_12 = arith.constant dense<0.000000e+00> : vector<2x16x16xf32>
    %25 = tpu.matmul %18, %21, %cst_12 {dimension_numbers = #tpu.dot_dimension_numbers<[2], [2], [1], [1], [0, 0, 0, 1, 1, 1], [0], [0]>} : vector<2x16x8xbf16>, vector<2x16x8xbf16>, vector<2x16x16xf32> -> vector<2x16x16xf32>
    "tpu.trace_stop"() : () -> ()
    %cst_13 = arith.constant 0.353553385 : f32
    %26 = vector.broadcast %cst_13 : f32 to vector<2x16x16xf32>
    %27 = arith.mulf %25, %26 : vector<2x16x16xf32>
    %28 = vector.shape_cast %14 : vector<2x16xi1> to vector<2x1x16xi1>
    %cst_14 = arith.constant -1.000000e+09 : f32
    %29 = vector.shape_cast %28 : vector<2x1x16xi1> to vector<2x1x16xi1>
    %30 = vector.broadcast %29 : vector<2x1x16xi1> to vector<2x16x16xi1>
    %31 = vector.broadcast %cst_14 : f32 to vector<2x16x16xf32>
    %32 = arith.select %30, %27, %31 : vector<2x16x16xi1>, vector<2x16x16xf32>
    %cst_15 = arith.constant dense<0xFF800000> : vector<2x16xf32>
    %33 = vector.multi_reduction <maximumf>, %32, %cst_15 [2] : vector<2x16x16xf32> to vector<2x16xf32>
    %34 = vector.shape_cast %33 : vector<2x16xf32> to vector<2x16x1xf32>
    %35 = vector.broadcast %34 : vector<2x16x1xf32> to vector<2x16x16xf32>
    %36 = arith.subf %32, %35 : vector<2x16x16xf32>
    %37 = math.exp %36 : vector<2x16x16xf32>
    %cst_16 = arith.constant dense<0.000000e+00> : vector<2x16xf32>
    %38 = vector.multi_reduction <add>, %37, %cst_16 [2] : vector<2x16x16xf32> to vector<2x16xf32>
    %39 = vector.shape_cast %38 : vector<2x16xf32> to vector<2x16x1xf32>
    %40 = tpu.reciprocal %39 {approx = true} : vector<2x16x1xf32> -> vector<2x16x1xf32>
    %41 = vector.broadcast %40 : vector<2x16x1xf32> to vector<2x16x16xf32>
    %42 = arith.mulf %37, %41 : vector<2x16x16xf32>
    %43 = arith.truncf %42 : vector<2x16x16xf32> to vector<2x16x16xbf16>
    "tpu.trace_start"() <{level = 10 : i32, message = "bqk,bkd->bqd"}> : () -> ()
    %cst_17 = arith.constant dense<0.000000e+00> : vector<2x16x8xf32>
    %44 = tpu.matmul %43, %24, %cst_17 {dimension_numbers = #tpu.dot_dimension_numbers<[2], [1], [1], [2], [0, 0, 0, 1, 1, 2], [0], [0]>} : vector<2x16x16xbf16>, vector<2x16x8xbf16>, vector<2x16x8xf32> -> vector<2x16x8xf32>
    "tpu.trace_stop"() : () -> ()
    %45 = vector.shape_cast %44 : vector<2x16x8xf32> to vector<32x8xf32>
    %46 = arith.truncf %45 : vector<32x8xf32> to vector<32x8xbf16>
    %c0_18 = arith.constant 0 : index
    %c0_19 = arith.constant 0 : index
    %c0_20 = arith.constant 0 : index
    %c0_21 = arith.constant 0 : index
    %47 = vector.load %arg9[%c0_18, %c0_19, %c0_20, %c0_21] : memref<1x4x8x32xbf16, #tpu.memory_space<vmem>>, vector<1x1x8x32xbf16>
    %48 = vector.shape_cast %47 : vector<1x1x8x32xbf16> to vector<8x32xbf16>
    %cst_22 = arith.constant dense<0.000000e+00> : vector<32x32xf32>
    %49 = tpu.matmul %46, %48, %cst_22 {dimension_numbers = #tpu.dot_dimension_numbers<[1], [0], [0], [1], [0, 0, 1, 1], [], []>} : vector<32x8xbf16>, vector<8x32xbf16>, vector<32x32xf32> -> vector<32x32xf32>
    %50 = arith.addf %15, %49 : vector<32x32xf32>
    %51 = vector.extract_strided_slice %11 {offsets = [0, 8], sizes = [32, 8], strides = [1, 1]} : vector<32x96xf32> to vector<32x8xf32>
    %52 = vector.shape_cast %51 : vector<32x8xf32> to vector<2x16x8xf32>
    %53 = arith.truncf %52 : vector<2x16x8xf32> to vector<2x16x8xbf16>
    %54 = vector.extract_strided_slice %11 {offsets = [0, 40], sizes = [32, 8], strides = [1, 1]} : vector<32x96xf32> to vector<32x8xf32>
    %55 = vector.shape_cast %54 : vector<32x8xf32> to vector<2x16x8xf32>
    %56 = arith.truncf %55 : vector<2x16x8xf32> to vector<2x16x8xbf16>
    %57 = vector.extract_strided_slice %11 {offsets = [0, 72], sizes = [32, 8], strides = [1, 1]} : vector<32x96xf32> to vector<32x8xf32>
    %58 = vector.shape_cast %57 : vector<32x8xf32> to vector<2x16x8xf32>
    %59 = arith.truncf %58 : vector<2x16x8xf32> to vector<2x16x8xbf16>
    "tpu.trace_start"() <{level = 10 : i32, message = "bqd,bkd->bqk"}> : () -> ()
    %cst_23 = arith.constant dense<0.000000e+00> : vector<2x16x16xf32>
    %60 = tpu.matmul %53, %56, %cst_23 {dimension_numbers = #tpu.dot_dimension_numbers<[2], [2], [1], [1], [0, 0, 0, 1, 1, 1], [0], [0]>} : vector<2x16x8xbf16>, vector<2x16x8xbf16>, vector<2x16x16xf32> -> vector<2x16x16xf32>
    "tpu.trace_stop"() : () -> ()
    %cst_24 = arith.constant 0.353553385 : f32
    %61 = vector.broadcast %cst_24 : f32 to vector<2x16x16xf32>
    %62 = arith.mulf %60, %61 : vector<2x16x16xf32>
    %63 = vector.shape_cast %14 : vector<2x16xi1> to vector<2x1x16xi1>
    %cst_25 = arith.constant -1.000000e+09 : f32
    %64 = vector.shape_cast %63 : vector<2x1x16xi1> to vector<2x1x16xi1>
    %65 = vector.broadcast %64 : vector<2x1x16xi1> to vector<2x16x16xi1>
    %66 = vector.broadcast %cst_25 : f32 to vector<2x16x16xf32>
    %67 = arith.select %65, %62, %66 : vector<2x16x16xi1>, vector<2x16x16xf32>
    %cst_26 = arith.constant dense<0xFF800000> : vector<2x16xf32>
    %68 = vector.multi_reduction <maximumf>, %67, %cst_26 [2] : vector<2x16x16xf32> to vector<2x16xf32>
    %69 = vector.shape_cast %68 : vector<2x16xf32> to vector<2x16x1xf32>
    %70 = vector.broadcast %69 : vector<2x16x1xf32> to vector<2x16x16xf32>
    %71 = arith.subf %67, %70 : vector<2x16x16xf32>
    %72 = math.exp %71 : vector<2x16x16xf32>
    %cst_27 = arith.constant dense<0.000000e+00> : vector<2x16xf32>
    %73 = vector.multi_reduction <add>, %72, %cst_27 [2] : vector<2x16x16xf32> to vector<2x16xf32>
    %74 = vector.shape_cast %73 : vector<2x16xf32> to vector<2x16x1xf32>
    %75 = tpu.reciprocal %74 {approx = true} : vector<2x16x1xf32> -> vector<2x16x1xf32>
    %76 = vector.broadcast %75 : vector<2x16x1xf32> to vector<2x16x16xf32>
    %77 = arith.mulf %72, %76 : vector<2x16x16xf32>
    %78 = arith.truncf %77 : vector<2x16x16xf32> to vector<2x16x16xbf16>
    "tpu.trace_start"() <{level = 10 : i32, message = "bqk,bkd->bqd"}> : () -> ()
    %cst_28 = arith.constant dense<0.000000e+00> : vector<2x16x8xf32>
    %79 = tpu.matmul %78, %59, %cst_28 {dimension_numbers = #tpu.dot_dimension_numbers<[2], [1], [1], [2], [0, 0, 0, 1, 1, 2], [0], [0]>} : vector<2x16x16xbf16>, vector<2x16x8xbf16>, vector<2x16x8xf32> -> vector<2x16x8xf32>
    "tpu.trace_stop"() : () -> ()
    %80 = vector.shape_cast %79 : vector<2x16x8xf32> to vector<32x8xf32>
    %81 = arith.truncf %80 : vector<32x8xf32> to vector<32x8xbf16>
    %c0_29 = arith.constant 0 : index
    %c1 = arith.constant 1 : index
    %c0_30 = arith.constant 0 : index
    %c0_31 = arith.constant 0 : index
    %82 = vector.load %arg9[%c0_29, %c1, %c0_30, %c0_31] : memref<1x4x8x32xbf16, #tpu.memory_space<vmem>>, vector<1x1x8x32xbf16>
    %83 = vector.shape_cast %82 : vector<1x1x8x32xbf16> to vector<8x32xbf16>
    %cst_32 = arith.constant dense<0.000000e+00> : vector<32x32xf32>
    %84 = tpu.matmul %81, %83, %cst_32 {dimension_numbers = #tpu.dot_dimension_numbers<[1], [0], [0], [1], [0, 0, 1, 1], [], []>} : vector<32x8xbf16>, vector<8x32xbf16>, vector<32x32xf32> -> vector<32x32xf32>
    %85 = arith.addf %50, %84 : vector<32x32xf32>
    %86 = vector.extract_strided_slice %11 {offsets = [0, 16], sizes = [32, 8], strides = [1, 1]} : vector<32x96xf32> to vector<32x8xf32>
    %87 = vector.shape_cast %86 : vector<32x8xf32> to vector<2x16x8xf32>
    %88 = arith.truncf %87 : vector<2x16x8xf32> to vector<2x16x8xbf16>
    %89 = vector.extract_strided_slice %11 {offsets = [0, 48], sizes = [32, 8], strides = [1, 1]} : vector<32x96xf32> to vector<32x8xf32>
    %90 = vector.shape_cast %89 : vector<32x8xf32> to vector<2x16x8xf32>
    %91 = arith.truncf %90 : vector<2x16x8xf32> to vector<2x16x8xbf16>
    %92 = vector.extract_strided_slice %11 {offsets = [0, 80], sizes = [32, 8], strides = [1, 1]} : vector<32x96xf32> to vector<32x8xf32>
    %93 = vector.shape_cast %92 : vector<32x8xf32> to vector<2x16x8xf32>
    %94 = arith.truncf %93 : vector<2x16x8xf32> to vector<2x16x8xbf16>
    "tpu.trace_start"() <{level = 10 : i32, message = "bqd,bkd->bqk"}> : () -> ()
    %cst_33 = arith.constant dense<0.000000e+00> : vector<2x16x16xf32>
    %95 = tpu.matmul %88, %91, %cst_33 {dimension_numbers = #tpu.dot_dimension_numbers<[2], [2], [1], [1], [0, 0, 0, 1, 1, 1], [0], [0]>} : vector<2x16x8xbf16>, vector<2x16x8xbf16>, vector<2x16x16xf32> -> vector<2x16x16xf32>
    "tpu.trace_stop"() : () -> ()
    %cst_34 = arith.constant 0.353553385 : f32
    %96 = vector.broadcast %cst_34 : f32 to vector<2x16x16xf32>
    %97 = arith.mulf %95, %96 : vector<2x16x16xf32>
    %98 = vector.shape_cast %14 : vector<2x16xi1> to vector<2x1x16xi1>
    %cst_35 = arith.constant -1.000000e+09 : f32
    %99 = vector.shape_cast %98 : vector<2x1x16xi1> to vector<2x1x16xi1>
    %100 = vector.broadcast %99 : vector<2x1x16xi1> to vector<2x16x16xi1>
    %101 = vector.broadcast %cst_35 : f32 to vector<2x16x16xf32>
    %102 = arith.select %100, %97, %101 : vector<2x16x16xi1>, vector<2x16x16xf32>
    %cst_36 = arith.constant dense<0xFF800000> : vector<2x16xf32>
    %103 = vector.multi_reduction <maximumf>, %102, %cst_36 [2] : vector<2x16x16xf32> to vector<2x16xf32>
    %104 = vector.shape_cast %103 : vector<2x16xf32> to vector<2x16x1xf32>
    %105 = vector.broadcast %104 : vector<2x16x1xf32> to vector<2x16x16xf32>
    %106 = arith.subf %102, %105 : vector<2x16x16xf32>
    %107 = math.exp %106 : vector<2x16x16xf32>
    %cst_37 = arith.constant dense<0.000000e+00> : vector<2x16xf32>
    %108 = vector.multi_reduction <add>, %107, %cst_37 [2] : vector<2x16x16xf32> to vector<2x16xf32>
    %109 = vector.shape_cast %108 : vector<2x16xf32> to vector<2x16x1xf32>
    %110 = tpu.reciprocal %109 {approx = true} : vector<2x16x1xf32> -> vector<2x16x1xf32>
    %111 = vector.broadcast %110 : vector<2x16x1xf32> to vector<2x16x16xf32>
    %112 = arith.mulf %107, %111 : vector<2x16x16xf32>
    %113 = arith.truncf %112 : vector<2x16x16xf32> to vector<2x16x16xbf16>
    "tpu.trace_start"() <{level = 10 : i32, message = "bqk,bkd->bqd"}> : () -> ()
    %cst_38 = arith.constant dense<0.000000e+00> : vector<2x16x8xf32>
    %114 = tpu.matmul %113, %94, %cst_38 {dimension_numbers = #tpu.dot_dimension_numbers<[2], [1], [1], [2], [0, 0, 0, 1, 1, 2], [0], [0]>} : vector<2x16x16xbf16>, vector<2x16x8xbf16>, vector<2x16x8xf32> -> vector<2x16x8xf32>
    "tpu.trace_stop"() : () -> ()
    %115 = vector.shape_cast %114 : vector<2x16x8xf32> to vector<32x8xf32>
    %116 = arith.truncf %115 : vector<32x8xf32> to vector<32x8xbf16>
    %c0_39 = arith.constant 0 : index
    %c2 = arith.constant 2 : index
    %c0_40 = arith.constant 0 : index
    %c0_41 = arith.constant 0 : index
    %117 = vector.load %arg9[%c0_39, %c2, %c0_40, %c0_41] : memref<1x4x8x32xbf16, #tpu.memory_space<vmem>>, vector<1x1x8x32xbf16>
    %118 = vector.shape_cast %117 : vector<1x1x8x32xbf16> to vector<8x32xbf16>
    %cst_42 = arith.constant dense<0.000000e+00> : vector<32x32xf32>
    %119 = tpu.matmul %116, %118, %cst_42 {dimension_numbers = #tpu.dot_dimension_numbers<[1], [0], [0], [1], [0, 0, 1, 1], [], []>} : vector<32x8xbf16>, vector<8x32xbf16>, vector<32x32xf32> -> vector<32x32xf32>
    %120 = arith.addf %85, %119 : vector<32x32xf32>
    %121 = vector.extract_strided_slice %11 {offsets = [0, 24], sizes = [32, 8], strides = [1, 1]} : vector<32x96xf32> to vector<32x8xf32>
    %122 = vector.shape_cast %121 : vector<32x8xf32> to vector<2x16x8xf32>
    %123 = arith.truncf %122 : vector<2x16x8xf32> to vector<2x16x8xbf16>
    %124 = vector.extract_strided_slice %11 {offsets = [0, 56], sizes = [32, 8], strides = [1, 1]} : vector<32x96xf32> to vector<32x8xf32>
    %125 = vector.shape_cast %124 : vector<32x8xf32> to vector<2x16x8xf32>
    %126 = arith.truncf %125 : vector<2x16x8xf32> to vector<2x16x8xbf16>
    %127 = vector.extract_strided_slice %11 {offsets = [0, 88], sizes = [32, 8], strides = [1, 1]} : vector<32x96xf32> to vector<32x8xf32>
    %128 = vector.shape_cast %127 : vector<32x8xf32> to vector<2x16x8xf32>
    %129 = arith.truncf %128 : vector<2x16x8xf32> to vector<2x16x8xbf16>
    "tpu.trace_start"() <{level = 10 : i32, message = "bqd,bkd->bqk"}> : () -> ()
    %cst_43 = arith.constant dense<0.000000e+00> : vector<2x16x16xf32>
    %130 = tpu.matmul %123, %126, %cst_43 {dimension_numbers = #tpu.dot_dimension_numbers<[2], [2], [1], [1], [0, 0, 0, 1, 1, 1], [0], [0]>} : vector<2x16x8xbf16>, vector<2x16x8xbf16>, vector<2x16x16xf32> -> vector<2x16x16xf32>
    "tpu.trace_stop"() : () -> ()
    %cst_44 = arith.constant 0.353553385 : f32
    %131 = vector.broadcast %cst_44 : f32 to vector<2x16x16xf32>
    %132 = arith.mulf %130, %131 : vector<2x16x16xf32>
    %133 = vector.shape_cast %14 : vector<2x16xi1> to vector<2x1x16xi1>
    %cst_45 = arith.constant -1.000000e+09 : f32
    %134 = vector.shape_cast %133 : vector<2x1x16xi1> to vector<2x1x16xi1>
    %135 = vector.broadcast %134 : vector<2x1x16xi1> to vector<2x16x16xi1>
    %136 = vector.broadcast %cst_45 : f32 to vector<2x16x16xf32>
    %137 = arith.select %135, %132, %136 : vector<2x16x16xi1>, vector<2x16x16xf32>
    %cst_46 = arith.constant dense<0xFF800000> : vector<2x16xf32>
    %138 = vector.multi_reduction <maximumf>, %137, %cst_46 [2] : vector<2x16x16xf32> to vector<2x16xf32>
    %139 = vector.shape_cast %138 : vector<2x16xf32> to vector<2x16x1xf32>
    %140 = vector.broadcast %139 : vector<2x16x1xf32> to vector<2x16x16xf32>
    %141 = arith.subf %137, %140 : vector<2x16x16xf32>
    %142 = math.exp %141 : vector<2x16x16xf32>
    %cst_47 = arith.constant dense<0.000000e+00> : vector<2x16xf32>
    %143 = vector.multi_reduction <add>, %142, %cst_47 [2] : vector<2x16x16xf32> to vector<2x16xf32>
    %144 = vector.shape_cast %143 : vector<2x16xf32> to vector<2x16x1xf32>
    %145 = tpu.reciprocal %144 {approx = true} : vector<2x16x1xf32> -> vector<2x16x1xf32>
    %146 = vector.broadcast %145 : vector<2x16x1xf32> to vector<2x16x16xf32>
    %147 = arith.mulf %142, %146 : vector<2x16x16xf32>
    %148 = arith.truncf %147 : vector<2x16x16xf32> to vector<2x16x16xbf16>
    "tpu.trace_start"() <{level = 10 : i32, message = "bqk,bkd->bqd"}> : () -> ()
    %cst_48 = arith.constant dense<0.000000e+00> : vector<2x16x8xf32>
    %149 = tpu.matmul %148, %129, %cst_48 {dimension_numbers = #tpu.dot_dimension_numbers<[2], [1], [1], [2], [0, 0, 0, 1, 1, 2], [0], [0]>} : vector<2x16x16xbf16>, vector<2x16x8xbf16>, vector<2x16x8xf32> -> vector<2x16x8xf32>
    "tpu.trace_stop"() : () -> ()
    %150 = vector.shape_cast %149 : vector<2x16x8xf32> to vector<32x8xf32>
    %151 = arith.truncf %150 : vector<32x8xf32> to vector<32x8xbf16>
    %c0_49 = arith.constant 0 : index
    %c3 = arith.constant 3 : index
    %c0_50 = arith.constant 0 : index
    %c0_51 = arith.constant 0 : index
    %152 = vector.load %arg9[%c0_49, %c3, %c0_50, %c0_51] : memref<1x4x8x32xbf16, #tpu.memory_space<vmem>>, vector<1x1x8x32xbf16>
    %153 = vector.shape_cast %152 : vector<1x1x8x32xbf16> to vector<8x32xbf16>
    %cst_52 = arith.constant dense<0.000000e+00> : vector<32x32xf32>
    %154 = tpu.matmul %151, %153, %cst_52 {dimension_numbers = #tpu.dot_dimension_numbers<[1], [0], [0], [1], [0, 0, 1, 1], [], []>} : vector<32x8xbf16>, vector<8x32xbf16>, vector<32x32xf32> -> vector<32x32xf32>
    %155 = arith.addf %120, %154 : vector<32x32xf32>
    %c0_53 = arith.constant 0 : index
    %c0_54 = arith.constant 0 : index
    %c0_55 = arith.constant 0 : index
    %156 = vector.load %arg10[%c0_53, %c0_54, %c0_55] : memref<1x1x32xf32, #tpu.memory_space<vmem>>, vector<1x1x32xf32>
    %157 = vector.shape_cast %156 : vector<1x1x32xf32> to vector<1x32xf32>
    %158 = vector.broadcast %157 : vector<1x32xf32> to vector<32x32xf32>
    %159 = arith.addf %155, %158 : vector<32x32xf32>
    %160 = arith.addf %159, %3 : vector<32x32xf32>
    %c0_56 = arith.constant 0 : index
    %c0_57 = arith.constant 0 : index
    %c0_58 = arith.constant 0 : index
    %161 = vector.load %arg11[%c0_56, %c0_57, %c0_58] : memref<1x1x32xf32, #tpu.memory_space<vmem>>, vector<1x1x32xf32>
    %162 = vector.shape_cast %161 : vector<1x1x32xf32> to vector<1x32xf32>
    %c0_59 = arith.constant 0 : index
    %c0_60 = arith.constant 0 : index
    %c0_61 = arith.constant 0 : index
    %163 = vector.load %arg12[%c0_59, %c0_60, %c0_61] : memref<1x1x32xf32, #tpu.memory_space<vmem>>, vector<1x1x32xf32>
    %164 = vector.shape_cast %163 : vector<1x1x32xf32> to vector<1x32xf32>
    %cst_62 = arith.constant dense<0.000000e+00> : vector<32xf32>
    %165 = vector.multi_reduction <add>, %160, %cst_62 [1] : vector<32x32xf32> to vector<32xf32>
    %166 = vector.shape_cast %165 : vector<32xf32> to vector<32x1xf32>
    %cst_63 = arith.constant 3.200000e+01 : f32
    %167 = vector.broadcast %cst_63 : f32 to vector<32x1xf32>
    %168 = arith.divf %166, %167 : vector<32x1xf32>
    %169 = vector.broadcast %168 : vector<32x1xf32> to vector<32x32xf32>
    %170 = arith.subf %160, %169 : vector<32x32xf32>
    %171 = arith.mulf %170, %170 : vector<32x32xf32>
    %cst_64 = arith.constant dense<0.000000e+00> : vector<32xf32>
    %172 = vector.multi_reduction <add>, %171, %cst_64 [1] : vector<32x32xf32> to vector<32xf32>
    %173 = vector.shape_cast %172 : vector<32xf32> to vector<32x1xf32>
    %cst_65 = arith.constant 3.200000e+01 : f32
    %174 = vector.broadcast %cst_65 : f32 to vector<32x1xf32>
    %175 = arith.divf %173, %174 : vector<32x1xf32>
    %176 = vector.broadcast %168 : vector<32x1xf32> to vector<32x32xf32>
    %177 = arith.subf %160, %176 : vector<32x32xf32>
    %cst_66 = arith.constant 1.000000e-07 : f32
    %178 = vector.broadcast %cst_66 : f32 to vector<32x1xf32>
    %179 = arith.addf %175, %178 : vector<32x1xf32>
    %180 = math.rsqrt %179 : vector<32x1xf32>
    %181 = vector.broadcast %180 : vector<32x1xf32> to vector<32x32xf32>
    %182 = arith.mulf %177, %181 : vector<32x32xf32>
    %183 = vector.broadcast %162 : vector<1x32xf32> to vector<32x32xf32>
    %184 = arith.mulf %182, %183 : vector<32x32xf32>
    %185 = vector.broadcast %164 : vector<1x32xf32> to vector<32x32xf32>
    %186 = arith.addf %184, %185 : vector<32x32xf32>
    %187 = arith.truncf %186 : vector<32x32xf32> to vector<32x32xbf16>
    %c0_67 = arith.constant 0 : index
    %c0_68 = arith.constant 0 : index
    %c0_69 = arith.constant 0 : index
    %188 = vector.load %arg13[%c0_67, %c0_68, %c0_69] : memref<1x32x64xbf16, #tpu.memory_space<vmem>>, vector<1x32x64xbf16>
    %189 = vector.shape_cast %188 : vector<1x32x64xbf16> to vector<32x64xbf16>
    %cst_70 = arith.constant dense<0.000000e+00> : vector<32x64xf32>
    %190 = tpu.matmul %187, %189, %cst_70 {dimension_numbers = #tpu.dot_dimension_numbers<[1], [0], [0], [1], [0, 0, 1, 1], [], []>} : vector<32x32xbf16>, vector<32x64xbf16>, vector<32x64xf32> -> vector<32x64xf32>
    %c0_71 = arith.constant 0 : index
    %c0_72 = arith.constant 0 : index
    %c0_73 = arith.constant 0 : index
    %191 = vector.load %arg14[%c0_71, %c0_72, %c0_73] : memref<1x1x64xf32, #tpu.memory_space<vmem>>, vector<1x1x64xf32>
    %192 = vector.shape_cast %191 : vector<1x1x64xf32> to vector<1x64xf32>
    %193 = vector.broadcast %192 : vector<1x64xf32> to vector<32x64xf32>
    %194 = arith.addf %190, %193 : vector<32x64xf32>
    %cst_74 = arith.constant 5.000000e-01 : f32
    %195 = vector.broadcast %cst_74 : f32 to vector<32x64xf32>
    %196 = arith.mulf %195, %194 : vector<32x64xf32>
    %cst_75 = arith.constant 4.471500e-02 : f32
    %197 = vector.broadcast %cst_75 : f32 to vector<32x64xf32>
    %198 = arith.mulf %197, %194 : vector<32x64xf32>
    %199 = arith.mulf %198, %194 : vector<32x64xf32>
    %200 = arith.mulf %199, %194 : vector<32x64xf32>
    %201 = arith.addf %194, %200 : vector<32x64xf32>
    %cst_76 = arith.constant 0.797884583 : f32
    %202 = vector.broadcast %cst_76 : f32 to vector<32x64xf32>
    %203 = arith.mulf %202, %201 : vector<32x64xf32>
    %204 = math.tanh %203 : vector<32x64xf32>
    %cst_77 = arith.constant 1.000000e+00 : f32
    %205 = vector.broadcast %cst_77 : f32 to vector<32x64xf32>
    %206 = arith.addf %205, %204 : vector<32x64xf32>
    %207 = arith.mulf %196, %206 : vector<32x64xf32>
    %208 = arith.truncf %207 : vector<32x64xf32> to vector<32x64xbf16>
    %c0_78 = arith.constant 0 : index
    %c0_79 = arith.constant 0 : index
    %c0_80 = arith.constant 0 : index
    %209 = vector.load %arg15[%c0_78, %c0_79, %c0_80] : memref<1x64x32xbf16, #tpu.memory_space<vmem>>, vector<1x64x32xbf16>
    %210 = vector.shape_cast %209 : vector<1x64x32xbf16> to vector<64x32xbf16>
    %cst_81 = arith.constant dense<0.000000e+00> : vector<32x32xf32>
    %211 = tpu.matmul %208, %210, %cst_81 {dimension_numbers = #tpu.dot_dimension_numbers<[1], [0], [0], [1], [0, 0, 1, 1], [], []>} : vector<32x64xbf16>, vector<64x32xbf16>, vector<32x32xf32> -> vector<32x32xf32>
    %c0_82 = arith.constant 0 : index
    %c0_83 = arith.constant 0 : index
    %c0_84 = arith.constant 0 : index
    %212 = vector.load %arg16[%c0_82, %c0_83, %c0_84] : memref<1x1x32xf32, #tpu.memory_space<vmem>>, vector<1x1x32xf32>
    %213 = vector.shape_cast %212 : vector<1x1x32xf32> to vector<1x32xf32>
    %214 = vector.broadcast %213 : vector<1x32xf32> to vector<32x32xf32>
    %215 = arith.addf %211, %214 : vector<32x32xf32>
    %216 = arith.addf %215, %186 : vector<32x32xf32>
    %c0_85 = arith.constant 0 : index
    %c0_86 = arith.constant 0 : index
    %c0_87 = arith.constant 0 : index
    %217 = vector.load %arg17[%c0_85, %c0_86, %c0_87] : memref<1x1x32xf32, #tpu.memory_space<vmem>>, vector<1x1x32xf32>
    %218 = vector.shape_cast %217 : vector<1x1x32xf32> to vector<1x32xf32>
    %c0_88 = arith.constant 0 : index
    %c0_89 = arith.constant 0 : index
    %c0_90 = arith.constant 0 : index
    %219 = vector.load %arg18[%c0_88, %c0_89, %c0_90] : memref<1x1x32xf32, #tpu.memory_space<vmem>>, vector<1x1x32xf32>
    %220 = vector.shape_cast %219 : vector<1x1x32xf32> to vector<1x32xf32>
    %cst_91 = arith.constant dense<0.000000e+00> : vector<32xf32>
    %221 = vector.multi_reduction <add>, %216, %cst_91 [1] : vector<32x32xf32> to vector<32xf32>
    %222 = vector.shape_cast %221 : vector<32xf32> to vector<32x1xf32>
    %cst_92 = arith.constant 3.200000e+01 : f32
    %223 = vector.broadcast %cst_92 : f32 to vector<32x1xf32>
    %224 = arith.divf %222, %223 : vector<32x1xf32>
    %225 = vector.broadcast %224 : vector<32x1xf32> to vector<32x32xf32>
    %226 = arith.subf %216, %225 : vector<32x32xf32>
    %227 = arith.mulf %226, %226 : vector<32x32xf32>
    %cst_93 = arith.constant dense<0.000000e+00> : vector<32xf32>
    %228 = vector.multi_reduction <add>, %227, %cst_93 [1] : vector<32x32xf32> to vector<32xf32>
    %229 = vector.shape_cast %228 : vector<32xf32> to vector<32x1xf32>
    %cst_94 = arith.constant 3.200000e+01 : f32
    %230 = vector.broadcast %cst_94 : f32 to vector<32x1xf32>
    %231 = arith.divf %229, %230 : vector<32x1xf32>
    %232 = vector.broadcast %224 : vector<32x1xf32> to vector<32x32xf32>
    %233 = arith.subf %216, %232 : vector<32x32xf32>
    %cst_95 = arith.constant 1.000000e-07 : f32
    %234 = vector.broadcast %cst_95 : f32 to vector<32x1xf32>
    %235 = arith.addf %231, %234 : vector<32x1xf32>
    %236 = math.rsqrt %235 : vector<32x1xf32>
    %237 = vector.broadcast %236 : vector<32x1xf32> to vector<32x32xf32>
    %238 = arith.mulf %233, %237 : vector<32x32xf32>
    %239 = vector.broadcast %218 : vector<1x32xf32> to vector<32x32xf32>
    %240 = arith.mulf %238, %239 : vector<32x32xf32>
    %241 = vector.broadcast %220 : vector<1x32xf32> to vector<32x32xf32>
    %242 = arith.addf %240, %241 : vector<32x32xf32>
    %c0_96 = arith.constant 0 : index
    %c0_97 = arith.constant 0 : index
    %243 = vector.load %arg22[%c0_96, %c0_97] : memref<32x32xf32, #tpu.memory_space<vmem>>, vector<32x32xf32>
    tpu.vector_store %arg22[%c0_96, %c0_97], %242 {strides = array<i32>} : memref<32x32xf32, #tpu.memory_space<vmem>>, vector<32x32xf32>,
    %c1_i32 = arith.constant 1 : i32
    %244 = arith.cmpi eq, %arg0, %c1_i32 : i32
    %245 = arith.extui %244 : i1 to i32
    %c0_i32_98 = arith.constant 0 : i32
    %246 = arith.cmpi ne, %245, %c0_i32_98 : i32
    scf.if %246 {
      %247 = vector.shape_cast %242 : vector<32x32xf32> to vector<2x16x32xf32>
      %c0_99 = arith.constant 0 : index
      %c0_100 = arith.constant 0 : index
      %248 = vector.load %arg19[%c0_99, %c0_100] : memref<1x32xf32, #tpu.memory_space<vmem>>, vector<1x32xf32>
      %249 = vector.shape_cast %248 : vector<1x32xf32> to vector<1x1x32xf32>
      %250 = vector.broadcast %249 : vector<1x1x32xf32> to vector<2x16x32xf32>
      %251 = arith.mulf %247, %250 : vector<2x16x32xf32>
      %cst_101 = arith.constant dense<0.000000e+00> : vector<2x16xf32>
      %252 = vector.multi_reduction <add>, %251, %cst_101 [2] : vector<2x16x32xf32> to vector<2x16xf32>
      %c0_102 = arith.constant 0 : index
      %c0_103 = arith.constant 0 : index
      %253 = vector.load %arg20[%c0_102, %c0_103] : memref<1x1xf32, #tpu.memory_space<vmem>>, vector<1x1xf32>
      %254 = vector.broadcast %253 : vector<1x1xf32> to vector<2x16xf32>
      %255 = arith.addf %252, %254 : vector<2x16xf32>
      %c0_104 = arith.constant 0 : index
      %c0_105 = arith.constant 0 : index
      %256 = vector.load %arg3[%c0_104, %c0_105] : memref<2x128xi32, #tpu.memory_space<vmem>>, vector<2x128xi32>
      %c0_106 = arith.constant 0 : index
      %c0_107 = arith.constant 0 : index
      %257 = vector.load %arg4[%c0_106, %c0_107] : memref<2x128xi32, #tpu.memory_space<vmem>>, vector<2x128xi32>
      %258 = tpu.iota {dimensions = array<i32: 2>} : vector<2x128x16xi32>
      %259 = vector.shape_cast %256 : vector<2x128xi32> to vector<2x128x1xi32>
      %260 = vector.broadcast %259 : vector<2x128x1xi32> to vector<2x128x16xi32>
      %261 = arith.cmpi sge, %258, %260 : vector<2x128x16xi32>
      %262 = vector.shape_cast %257 : vector<2x128xi32> to vector<2x128x1xi32>
      %263 = vector.broadcast %262 : vector<2x128x1xi32> to vector<2x128x16xi32>
      %264 = arith.cmpi slt, %258, %263 : vector<2x128x16xi32>
      %265 = arith.andi %261, %264 : vector<2x128x16xi1>
      %266 = vector.shape_cast %255 : vector<2x16xf32> to vector<2x1x16xf32>
      %cst_108 = arith.constant 0.000000e+00 : f32
      %267 = vector.shape_cast %266 : vector<2x1x16xf32> to vector<2x1x16xf32>
      %268 = vector.broadcast %267 : vector<2x1x16xf32> to vector<2x128x16xf32>
      %269 = vector.broadcast %cst_108 : f32 to vector<2x128x16xf32>
      %270 = arith.select %265, %268, %269 : vector<2x128x16xi1>, vector<2x128x16xf32>
      %cst_109 = arith.constant dense<0.000000e+00> : vector<2x128xf32>
      %271 = vector.multi_reduction <add>, %270, %cst_109 [2] : vector<2x128x16xf32> to vector<2x128xf32>
      %272 = arith.subi %257, %256 : vector<2x128xi32>
      %c1_i32_110 = arith.constant 1 : i32
      %273 = vector.broadcast %c1_i32_110 : i32 to vector<2x128xi32>
      %274 = arith.maxsi %272, %273 : vector<2x128xi32>
      %275 = arith.sitofp %274 : vector<2x128xi32> to vector<2x128xf32>
      %276 = arith.divf %271, %275 : vector<2x128xf32>
      %c0_111 = arith.constant 0 : index
      %c0_112 = arith.constant 0 : index
      %277 = vector.load %arg21[%c0_111, %c0_112] : memref<2x128xf32, #tpu.memory_space<vmem>>, vector<2x128xf32>
      tpu.vector_store %arg21[%c0_111, %c0_112], %276 {strides = array<i32>} : memref<2x128xf32, #tpu.memory_space<vmem>>, vector<2x128xf32>,
    } else {
    }
    return
  }
  func.func @transform_0(%arg0: i32) -> (i32, i32) {
    %c0_i32 = arith.constant 0 : i32
    %c0_i32_0 = arith.constant 0 : i32
    %c0_i32_1 = arith.constant 0 : i32
    return %c0_i32, %c0_i32_0 : i32, i32
  }
  func.func @transform_1(%arg0: i32) -> (i32, i32) {
    %c0_i32 = arith.constant 0 : i32
    %c0_i32_0 = arith.constant 0 : i32
    %c0_i32_1 = arith.constant 0 : i32
    return %c0_i32, %c0_i32_0 : i32, i32
  }
  func.func @transform_2(%arg0: i32) -> (i32, i32) {
    %c0_i32 = arith.constant 0 : i32
    %c0_i32_0 = arith.constant 0 : i32
    %c0_i32_1 = arith.constant 0 : i32
    return %c0_i32, %c0_i32_0 : i32, i32
  }
  func.func @transform_3(%arg0: i32) -> (i32, i32) {
    %c0_i32 = arith.constant 0 : i32
    %c0_i32_0 = arith.constant 0 : i32
    %c0_i32_1 = arith.constant 0 : i32
    return %c0_i32, %c0_i32_0 : i32, i32
  }
  func.func @transform_4(%arg0: i32) -> (i32, i32) {
    %c0_i32 = arith.constant 0 : i32
    %c0_i32_0 = arith.constant 0 : i32
    %c0_i32_1 = arith.constant 0 : i32
    return %c0_i32, %c0_i32_0 : i32, i32
  }
  func.func @transform_5(%arg0: i32) -> (i32, i32) {
    %c0_i32 = arith.constant 0 : i32
    %c0_i32_0 = arith.constant 0 : i32
    %c0_i32_1 = arith.constant 0 : i32
    return %c0_i32, %c0_i32_0 : i32, i32
  }
  func.func @transform_6(%arg0: i32) -> (i32, i32, i32) {
    %c0_i32 = arith.constant 0 : i32
    %c0_i32_0 = arith.constant 0 : i32
    %c0_i32_1 = arith.constant 0 : i32
    return %arg0, %c0_i32, %c0_i32_0 : i32, i32, i32
  }
  func.func @transform_7(%arg0: i32) -> (i32, i32, i32) {
    %c0_i32 = arith.constant 0 : i32
    %c0_i32_0 = arith.constant 0 : i32
    %c0_i32_1 = arith.constant 0 : i32
    return %arg0, %c0_i32, %c0_i32_0 : i32, i32, i32
  }
  func.func @transform_8(%arg0: i32) -> (i32, i32, i32, i32) {
    %c0_i32 = arith.constant 0 : i32
    %c0_i32_0 = arith.constant 0 : i32
    %c0_i32_1 = arith.constant 0 : i32
    %c0_i32_2 = arith.constant 0 : i32
    return %arg0, %c0_i32, %c0_i32_0, %c0_i32_1 : i32, i32, i32, i32
  }
  func.func @transform_9(%arg0: i32) -> (i32, i32, i32) {
    %c0_i32 = arith.constant 0 : i32
    %c0_i32_0 = arith.constant 0 : i32
    %c0_i32_1 = arith.constant 0 : i32
    return %arg0, %c0_i32, %c0_i32_0 : i32, i32, i32
  }
  func.func @transform_10(%arg0: i32) -> (i32, i32, i32) {
    %c0_i32 = arith.constant 0 : i32
    %c0_i32_0 = arith.constant 0 : i32
    %c0_i32_1 = arith.constant 0 : i32
    return %arg0, %c0_i32, %c0_i32_0 : i32, i32, i32
  }
  func.func @transform_11(%arg0: i32) -> (i32, i32, i32) {
    %c0_i32 = arith.constant 0 : i32
    %c0_i32_0 = arith.constant 0 : i32
    %c0_i32_1 = arith.constant 0 : i32
    return %arg0, %c0_i32, %c0_i32_0 : i32, i32, i32
  }
  func.func @transform_12(%arg0: i32) -> (i32, i32, i32) {
    %c0_i32 = arith.constant 0 : i32
    %c0_i32_0 = arith.constant 0 : i32
    %c0_i32_1 = arith.constant 0 : i32
    return %arg0, %c0_i32, %c0_i32_0 : i32, i32, i32
  }
  func.func @transform_13(%arg0: i32) -> (i32, i32, i32) {
    %c0_i32 = arith.constant 0 : i32
    %c0_i32_0 = arith.constant 0 : i32
    %c0_i32_1 = arith.constant 0 : i32
    return %arg0, %c0_i32, %c0_i32_0 : i32, i32, i32
  }
  func.func @transform_14(%arg0: i32) -> (i32, i32, i32) {
    %c0_i32 = arith.constant 0 : i32
    %c0_i32_0 = arith.constant 0 : i32
    %c0_i32_1 = arith.constant 0 : i32
    return %arg0, %c0_i32, %c0_i32_0 : i32, i32, i32
  }
  func.func @transform_15(%arg0: i32) -> (i32, i32, i32) {
    %c0_i32 = arith.constant 0 : i32
    %c0_i32_0 = arith.constant 0 : i32
    %c0_i32_1 = arith.constant 0 : i32
    return %arg0, %c0_i32, %c0_i32_0 : i32, i32, i32
  }
  func.func @transform_16(%arg0: i32) -> (i32, i32, i32) {
    %c0_i32 = arith.constant 0 : i32
    %c0_i32_0 = arith.constant 0 : i32
    %c0_i32_1 = arith.constant 0 : i32
    return %arg0, %c0_i32, %c0_i32_0 : i32, i32, i32
  }
  func.func @transform_17(%arg0: i32) -> (i32, i32, i32) {
    %c0_i32 = arith.constant 0 : i32
    %c0_i32_0 = arith.constant 0 : i32
    %c0_i32_1 = arith.constant 0 : i32
    return %arg0, %c0_i32, %c0_i32_0 : i32, i32, i32
  }
  func.func @transform_18(%arg0: i32) -> (i32, i32) {
    %c0_i32 = arith.constant 0 : i32
    %c0_i32_0 = arith.constant 0 : i32
    %c0_i32_1 = arith.constant 0 : i32
    return %c0_i32, %c0_i32_0 : i32, i32
  }
  func.func @transform_19(%arg0: i32) -> (i32, i32) {
    %c0_i32 = arith.constant 0 : i32
    %c0_i32_0 = arith.constant 0 : i32
    %c0_i32_1 = arith.constant 0 : i32
    return %c0_i32, %c0_i32_0 : i32, i32
  }
  func.func @transform_20(%arg0: i32) -> (i32, i32) {
    %c0_i32 = arith.constant 0 : i32
    %c0_i32_0 = arith.constant 0 : i32
    %c0_i32_1 = arith.constant 0 : i32
    return %c0_i32, %c0_i32_0 : i32, i32
  }
}

</mosaic_0001>

<bundles_post_ra>
// kernel: forward.1
= control target key start
LH: loop header
LB: loop body
LE: loop exit
PB: predicated region body
PF: predicated region fallthrough
CT: control target
= control target key end

     0   :  { %s5605_s0 = inlined_call_operand.vmem [shape: f32[32,32], index: 0, kind: input, shape index: {}]   ;;  %s5606_s1 = inlined_call_operand.vmem [shape: f32[2,16], index: 1, kind: input, shape index: {}]   ;;  %s5607_s2 = inlined_call_operand.vmem [shape: s32[2,128], index: 2, kind: input, shape index: {}]   ;;  %s5608_s3 = inlined_call_operand.vmem [shape: s32[2,128], index: 3, kind: input, shape index: {}]   ;;  %s5609_s4 = inlined_call_operand.vmem [shape: f32[1,32], index: 4, kind: input, shape index: {}]   ;;  %s5610_s5 = inlined_call_operand.vmem [shape: f32[1,32], index: 5, kind: input, shape index: {}]   ;;  %s5611_s6 = inlined_call_operand.vmem [shape: bf16[2,32,96], index: 6, kind: input, shape index: {}]   ;;  %s5612_s7 = inlined_call_operand.vmem [shape: f32[2,1,96], index: 7, kind: input, shape index: {}]   ;;  %s5613_s8 = inlined_call_operand.vmem [shape: bf16[2,4,8,32], index: 8, kind: input, shape index: {}]   ;;  %s5614_s9 = inlined_call_operand.vmem [shape: f32[2,1,32], index: 9, kind: input, shape index: {}]   ;;  %s5615_s10 = inlined_call_operand.vmem [shape: f32[2,1,32], index: 10, kind: input, shape index: {}]   ;;  %s5616_s11 = inlined_call_operand.vmem [shape: f32[2,1,32], index: 11, kind: input, shape index: {}]   ;;  %s5617_s12 = inlined_call_operand.vmem [shape: bf16[2,32,64], index: 12, kind: input, shape index: {}]   ;;  %s5618_s13 = inlined_call_operand.vmem [shape: f32[2,1,64], index: 13, kind: input, shape index: {}]   ;;  %s5619_s14 = inlined_call_operand.vmem [shape: bf16[2,64,32], index: 14, kind: input, shape index: {}]   ;;  %s5620_s15 = inlined_call_operand.vmem [shape: f32[2,1,32], index: 15, kind: input, shape index: {}]   ;;  %s5621_s16 = inlined_call_operand.vmem [shape: f32[2,1,32], index: 16, kind: input, shape index: {}]   ;;  %s5622_s17 = inlined_call_operand.vmem [shape: f32[2,1,32], index: 17, kind: input, shape index: {}]   ;;  %s5623_s18 = inlined_call_operand.vmem [shape: f32[1,32], index: 18, kind: input, shape index: {}]   ;;  %s5624_s19 = inlined_call_operand.<no memory space> [shape: f32[1,1], index: 19, kind: input, shape index: {}]   ;;  %s5625_s20 = inlined_call_operand.hbm [shape: f32[2,128], index: 20, kind: output, shape index: {}]  }
   0x1   :  { %5629 = sst [smem:[#allocation9_spill]] %s5605_s0  ;;  %v25_v0 = vstv %s5624_s19 }
   0x2   :  { %5630 = sst [smem:[#allocation10_spill]] %s5606_s1  ;;  %26 = vst [vmem:[#allocation3] sm:$0x1] %v25_v0 }
   0x3   :  { %5631 = sst [smem:[#allocation11_spill]] %s5607_s2 }
   0x4   :  { %5632 = sst [smem:[#allocation12_spill]] %s5608_s3 }
   0x5   :  { %5633 = sst [smem:[#allocation13_spill]] %s5609_s4 }
   0x6   :  { %5634 = sst [smem:[#allocation14_spill]] %s5611_s6 }
   0x7   :  { %5635 = sst [smem:[#allocation15_spill]] %s5613_s8 }
   0x8   :  { %5636 = sst [smem:[#allocation16_spill]] %s5623_s18 }
   0x9   :  { %5637 = sst [smem:[#allocation17_spill]] %s5625_s20 }
   0xa   :  { %27 = vsyncpa [#allocation5], 0  ;;  %s4585_s23 = smov 0  }
   0xb LB: > { %5638 = sst [smem:[#allocation7_spill]] %s4458_s23  ;;  %s4591_s24 = sadd.s32 4294967295, %s4458_s23   ;;  %s4458_s23 = sphi %s4585_s23, %s33_s23  }
   0xc   : > { %p3937_p0 = scmp.ge.s32.totalorder %s4458_s23, 1  ;;  %p654_p1 = scmp.lt.s32.totalorder %s4458_s23, 3 }
   0xe   : > { %p655_p2 = pnand %p3937_p0, %p654_p1 }
  0x10   : > { %658 = sbr.rel (%p655_p2) target bundleno = 5332 (0x14d4), region = 100 }
  0x15   : > { %p746_p3 = scmp.lt.s32.totalorder %s4591_s24, 1  ;;  %s5639_s6 = sld [smem:[#allocation14_spill]] }
  0x16   : > { %s5640_s8 = sld [smem:[#allocation15_spill]]  ;;  %p3946_p4 = scmp.ne.s32.totalorder %s4591_s24, 0 }
  0x17   : > { %s4597_s19 = scalar_select %p746_p3, %s4591_s24, 1 }
  0x18   : > { %s5642_s21 = sld [smem:[#allocation9_spill]] (!%p3946_p4) }
  0x19   : > { %s4005_s2 = sshll.u32 %s4597_s19, 4  ;;  %s783_s25 = scalar_lea.vmem %s5620_s15, %s4597_s19 }
  0x1a   : > { %s786_s27 = scalar_lea.vmem %s5621_s16, %s4597_s19  ;;  %s789_s18 = scalar_lea.vmem %s5622_s17, %s4597_s19 }
  0x1b   : > { %s4607_s4 = scalar_lea.vmem %s5639_s6, %s4005_s2  ;;  %s4629_s6 = scalar_lea.vmem %s5617_s12, %s4005_s2 }
  0x1c   : > { %s4612_s0 = scalar_lea.vmem %s5640_s8, %s4005_s2  ;;  %s775_s8 = scalar_lea.vmem %s5618_s13, %s4597_s19 }
  0x1d   : > { %5641 = sst [smem:[#allocation8_spill]] %s4612_s0  ;;  %s4008_s0 = sshll.u32 %s4597_s19, 5 }
  0x1e   : > { %s4639_s22 = scalar_lea.vmem %s5619_s14, %s4008_s0  ;;  %794 = sbr.rel (%p3946_p4) target bundleno = 353 (0x161), region = 104 }
  0x1f   : > { %s5643_s29 = sld [smem:[#allocation13_spill]] (!%p3946_p4) }
  0x23   : > { %v795_v1 = vld [vmem:[%s5642_s21] sm:$0xff]  ;;  %vm801_vm0 = vcmask 261120   ;;  %v797_v2 = vld [vmem:[%s5642_s21 + $0x10] sm:$0xff]  ;;  %v796_v3 = vld [vmem:[%s5642_s21 + $0x8] sm:$0xff] }
  0x24   : > { %v802_v4 = vsel %vm801_vm0, %v795_v1, 0.0  ;;  %v808_v5 = vsel %vm801_vm0, %v797_v2, 0.0  ;;  %v798_v6 = vld [vmem:[%s5642_s21 + $0x18] sm:$0xff]  ;;  %v805_v7 = vsel %vm801_vm0, %v796_v3, 0.0  ;;  %v3948_v44 = vld [vmem:[%s5610_s5] ss:$0 sm:$0xff] }
  0x25   : > { %803 = vadd.xlane.f32.xlu0 %v802_v4  ;;  %809 = vadd.xlane.f32.xlu1 %v808_v5  ;;  %v811_v8 = vsel %vm801_vm0, %v798_v6, 0.0  ;;  %v3947_v42 = vld [vmem:[%s5643_s29] ss:$0 sm:$0xff] }
  0x29   : > { %806 = vadd.xlane.f32.xlu0 %v805_v7  ;;  %812 = vadd.xlane.f32.xlu1 %v811_v8 }
  0xae   : > { %v804_v9 = vpop.xlane.xlu0 %803  ;;  %v810_v10 = vpop.xlane.xlu1 %809 }
  0xaf   : > { %v815_v11 = vmul.f32 0.03125, %v804_v9  ;;  %v817_v12 = vmul.f32 0.03125, %v810_v10 }
  0xb1   : > { %v819_v13 = vsub.f32 %v795_v1, %v815_v11  ;;  %v821_v14 = vsub.f32 %v797_v2, %v817_v12 }
  0xb2   : > { %v807_v15 = vpop.xlane.xlu0 %806  ;;  %v813_v16 = vpop.xlane.xlu1 %812 }
  0xb3   : > { %v816_v17 = vmul.f32 0.03125, %v807_v15  ;;  %v818_v18 = vmul.f32 0.03125, %v813_v16  ;;  %v823_v19 = vmul.f32 %v819_v13, %v819_v13  ;;  %v825_v20 = vmul.f32 %v821_v14, %v821_v14 }
  0xb5   : > { %v820_v21 = vsub.f32 %v796_v3, %v816_v17  ;;  %v822_v22 = vsub.f32 %v798_v6, %v818_v18  ;;  %v827_v23 = vsel %vm801_vm0, %v823_v19, 0.0  ;;  %v833_v24 = vsel %vm801_vm0, %v825_v20, 0.0 }
  0xb6   : > { %828 = vadd.xlane.f32.xlu0 %v827_v23 }
  0xb7   : > { %v824_v25 = vmul.f32 %v820_v21, %v820_v21  ;;  %v826_v26 = vmul.f32 %v822_v22, %v822_v22 }
  0xb9   : > { %v830_v27 = vsel %vm801_vm0, %v824_v25, 0.0  ;;  %v836_v28 = vsel %vm801_vm0, %v826_v26, 0.0 }
  0xba   : > { %834 = vadd.xlane.f32.xlu0 %v833_v24  ;;  %831 = vadd.xlane.f32.xlu1 %v830_v27 }
  0xbe   : > { %837 = vadd.xlane.f32.xlu1 %v836_v28 }
 0x13f   : > { %v829_v29 = vpop.xlane.xlu0 %828 }
 0x140   : > { %v839_v30 = vmul.f32 0.03125, %v829_v29 }
 0x142   : > { %v843_v31 = vadd.f32 1e-07, %v839_v30 }
 0x143   : > { %v832_v32 = vpop.xlane.xlu1 %831  ;;  %v835_v33 = vpop.xlane.xlu0 %834 }
 0x144   : > { %4250 = vrsqrt.f32 %v843_v31  ;;  %v840_v34 = vmul.f32 0.03125, %v832_v32  ;;  %v841_v35 = vmul.f32 0.03125, %v835_v33 }
 0x146   : > { %v844_v36 = vadd.f32 1e-07, %v840_v34  ;;  %v845_v37 = vadd.f32 1e-07, %v841_v35 }
 0x147   : > { %v838_v38 = vpop.xlane.xlu1 %837 }
 0x148   : > { %4252 = vrsqrt.f32 %v844_v36  ;;  %v842_v39 = vmul.f32 0.03125, %v838_v38 }
 0x149   : > { %4254 = vrsqrt.f32 %v845_v37 }
 0x14a   : > { %v846_v40 = vadd.f32 1e-07, %v842_v39 }
 0x14c   : > { %4256 = vrsqrt.f32 %v846_v40 }
 0x151   : > { %v4251_v41 = vpop.eup %4250 }
 0x152   : > { %v851_v43 = vmul.f32 %v4251_v41, %v819_v13 }
 0x154   : > { %v861_v45 = vmul.f32 %v3947_v42, %v851_v43 }
 0x155   : > { %v4253_v46 = vpop.eup %4252 }
 0x156   : > { %v4255_v47 = vpop.eup %4254  ;;  %v871_v48 = vadd.f32 %v3948_v44, %v861_v45  ;;  %v852_v49 = vmul.f32 %v4253_v46, %v820_v21 }
 0x157   : > { %v853_v50 = vmul.f32 %v4255_v47, %v821_v14 }
 0x158   : > { %875 = vst.msk [vmem:[#allocation2] sm:$0xff] %vm801_vm0, %v871_v48  ;;  %v862_v51 = vmul.f32 %v3947_v42, %v852_v49 }
 0x159   : > { %v4257_v52 = vpop.eup %4256  ;;  %v863_v53 = vmul.f32 %v3947_v42, %v853_v50 }
 0x15a   : > { %v872_v54 = vadd.f32 %v3948_v44, %v862_v51  ;;  %v854_v55 = vmul.f32 %v4257_v52, %v822_v22 }
 0x15b   : > { %v873_v56 = vadd.f32 %v3948_v44, %v863_v53 }
 0x15c   : > { %876 = vst.msk [vmem:[#allocation2 + $0x8] sm:$0xff] %vm801_vm0, %v872_v54  ;;  %v864_v57 = vmul.f32 %v3947_v42, %v854_v55 }
 0x15d   : > { %877 = vst.msk [vmem:[#allocation2 + $0x10] sm:$0xff] %vm801_vm0, %v873_v56 }
 0x15e   : > { %v874_v58 = vadd.f32 %v3948_v44, %v864_v57 }
 0x160   : > { %878 = vst.msk [vmem:[#allocation2 + $0x18] sm:$0xff] %vm801_vm0, %v874_v58 }
 0x161 PF: > { %v4258_v59 = vld [vmem:[%s4607_s4 + $0x8] sm:$0xff]   ;;  %v4259_v60 = vld [vmem:[%s4607_s4] sm:$0xff]   ;;  %vm908_vm1 = vcmask 261120   ;;  %v4460_v3 = vmov 0.0   ;;  %vm4461_vm2 = vmmov 0   ;;  %s5644_s20 = scalar_lea.vmem %s5612_s7, %s4597_s19  ;;  %s4462_s23 = smov 96   ;;  %v1077_v21 = vlaneseq }
 0x162   : > { %4067 = vmatprep.subr.bf16.mxu1 %v4258_v59  ;;  %v879_v61 = vld [vmem:[#allocation2] sm:$0xff]  ;;  %4081 = vmatprep.subr.bf16.mxu0 %v4460_v3  ;;  %vm971_vm3 = vcmask 64512   ;;  %v4463_v19 = vmov 1966171168   ;;  %s5645_s2 = sld [smem:[#allocation10_spill]]  ;;  %v4464_v26 = vmov 0  }
 0x163   : > { %v880_v62 = vld [vmem:[#allocation2 + $0x8] sm:$0xff]  ;;  %4068 = vmatpush3.bf16.msra.mxu1 %v4258_v59  ;;  %4083 = vmatprep.mubr.msk.bf16.mxu0 %vm4461_vm2, %v4460_v3  ;;  %v3949_v7 = vld [vmem:[%s5644_s20] ss:$0 sm:$0xff]  ;;  %v1075_v20 = vunpack.c.l.s4 %v4463_v19  ;;  %v4721_v24 = vshrl.u32 %v1077_v21, 7  ;;  %vm1114_vm8 = vcmask 130048   ;;  %s4465_s28 = smov 64  }
 0x164   : > { %v881_v63 = vld [vmem:[#allocation2 + $0x10] sm:$0xff]  ;;  %v883_v0 = vpack.c.bf16 %v880_v62, %v879_v61  ;;  %4069 = vmatprep.subr.bf16.mxu1 %v4259_v60  ;;  %s4466_s29 = smov 88   ;;  %s4467_s30 = smov 120   ;;  %vm1518_vm10 = vcmask 1043456   ;;  %vm2508_vm11 = vcmask 523264  }
 0x165   : > { %v1076_v23 = vunpack.c.0.s8 %v1075_v20  ;;  %v4725_v32 = vsub.s32 0, %v4721_v24  ;;  %s4468_s0 = smov 56   ;;  %s4469_s4 = smov 80  }
 0x166   : > { %4071 = vmatprep.mubr.msk.bf16.mxu1 %vm908_vm1, %v883_v0  ;;  %s5650_s1 = sld [smem:[#allocation8_spill]]  ;;  %s4470_s20 = smov 112  }
 0x167   : > { %v882_v1 = vld [vmem:[#allocation2 + $0x18] sm:$0xff]  ;;  %4070 = vmatpush3.bf16.msra.mxu1 %v4259_v60  ;;  %v1079_v25 = vsub.s32 %v1076_v23, %v4721_v24  ;;  %s4472_s26 = smov 72   ;;  %s4473_s3 = smov 104  }
 0x168   : > { %v884_v2 = vpack.c.bf16 %v882_v1, %v881_v63  ;;  %4075 = vmatprep.subr.bf16.mxu1 %v4460_v3  ;;  %v964_v22 = vld [vmem:[%s5645_s2] sm:$0x3]  ;;  %s4474_s2 = smov 40   ;;  %p3998_p5 = scmp.ne.s32.totalorder %s4591_s24, 1 }
 0x169   : > { %vm965_vm4 = vcmp.gt.f32.partialorder %v964_v22, 0.5 }
 0x16a   : > { %4072 = vmatmul.mubr.msk.bf16.vlgmr.msra.gmra.mxu1 %vm908_vm1, %v884_v2  ;;  %v1073_v27 = vsel %vm965_vm4, 1, %v4464_v26 }
 0x16b   : > { %4077 = vmatprep.mubr.msk.bf16.mxu1 %vm4461_vm2, %v4460_v3  ;;  %v1080_v28 = vrot.slane %v1073_v27, %v1079_v25 }
 0x16d   : > { %v1088_v29 = vrot.slane %v1080_v28, %v1079_v25  ;;  %v1081_v30 = vcombine.high %v1080_v28, %v1080_v28 }
 0x16f   : > { %vm1096_vm5 = vcmp.ne.s32.totalorder %v1088_v29, 0  ;;  %v1095_v31 = vrot.slane %v1081_v30, %v1079_v25 }
 0x170   : > { %v1098_v33 = vsel %vm1096_vm5, 1, %v4464_v26 }
 0x171   : > { %vm1097_vm6 = vcmp.ne.s32.totalorder %v1095_v31, 0  ;;  %v1103_v34 = vrot.slane %v1098_v33, %v4725_v32 }
 0x172   : > { %v1099_v35 = vsel %vm1097_vm6, 1, %v4464_v26 }
 0x173   : > { %vm4728_vm7 = vcmp.eq.s32.totalorder %v1103_v34, 1  ;;  %v1107_v38 = vrot.slane %v1099_v35, %v4725_v32 }
 0x175   : > { %vm4736_vm9 = vcmp.eq.s32.totalorder %v1107_v38, 1 }
 0x22a   : > { %v4073_v4 = vpop.f32.mrf.mxu1 }
 0x22b   : > { %v958_v13 = vadd.f32 %v4073_v4, %v3949_v7 }
 0x22c   : > { %v949_v5 = vpop.f32.mrf.mxu1 }
 0x22d   : > { %v950_v9 = vadd.f32 %v3949_v7, %v949_v5 }
 0x22e   : > { %v4074_v6 = vpop.f32.mrf.mxu1 }
 0x22f   : > { %v961_v11 = vadd.f32 %v4074_v6, %v3949_v7 }
 0x230   : > { %v952_v8 = vpop.f32.mrf.mxu1 }
 0x231   : > { %v953_v10 = vadd.f32 %v3949_v7, %v952_v8  ;;  %v4702_v14 = vpack.c.bf16 %v961_v11, %v958_v13 }
 0x233   : > { %v4699_v12 = vpack.c.bf16 %v953_v10, %v950_v9 }
 0x235   : > { %969 = vrot.lane.b32.xlu0 %v4699_v12, %s4462_s23 }
 0x239   : > { %1020 = vrot.lane.b32.xlu0 %v4702_v14, %s4462_s23  ;;  %s4471_s23 = smov 48  }
 0x2a7   : > { %v970_v15 = vpop.permute.xlu0 %969 }
 0x2a8   : > { %v976_v16 = vsel %vm971_vm3, %v970_v15, 0 }
 0x2a9   : > { %4076 = vmatpush3.bf16.xpose.msra.mxu1 %v976_v16 }
 0x2aa   : > { %4087 = vmatprep.subr.bf16.mxu1 %v4460_v3 }
 0x2ab   : > { %v1021_v17 = vpop.permute.xlu0 %1020 }
 0x2ac   : > { %v1026_v18 = vsel %vm971_vm3, %v1021_v17, 0 }
 0x2ad   : > { %4082 = vmatpush3.bf16.xpose.msra.mxu0 %v1026_v18 }
 0x2ae   : > { %4093 = vmatprep.subr.bf16.mxu0 %v4460_v3 }
 0x2b0   : > { %4078 = vmatmul.mubr.msk.bf16.vlgmr.msra.gmra.mxu1 %vm971_vm3, %v4699_v12 }
 0x2b1   : > { %4089 = vmatprep.mubr.msk.bf16.mxu1 %vm4461_vm2, %v4460_v3 }
 0x2b4   : > { %4084 = vmatmul.mubr.msk.bf16.vlgmr.msra.gmra.mxu0 %vm971_vm3, %v4702_v14 }
 0x2b5   : > { %4095 = vmatprep.mubr.msk.bf16.mxu0 %vm4461_vm2, %v4460_v3 }
 0x370   : > { %v1012_v36 = vpop.f32.mrf.mxu1 }
 0x371   : > { %v1069_v39 = vmul.f32 0.35355338, %v1012_v36 }
 0x372   : > { %v4079_v40 = vpop.f32.mrf.mxu1 }
 0x373   : > { %v1110_v41 = vsel %vm4728_vm7, %v1069_v39, -1e+09 }
 0x374   : > { %v1015_v42 = vpop.f32.mrf.mxu1  ;;  %v1062_v43 = vpop.f32.mrf.mxu0  ;;  %v1115_v44 = vsel %vm1114_vm8, %v1110_v41, -inf }
 0x375   : > { %v1070_v46 = vmul.f32 0.35355338, %v1015_v42  ;;  %v1071_v47 = vmul.f32 0.35355338, %v1062_v43  ;;  %1116 = vmax.xlane.f32.xlu1 %v1115_v44 }
 0x376   : > { %v4080_v48 = vpop.f32.mrf.mxu1  ;;  %v4085_v49 = vpop.f32.mrf.mxu0 }
 0x377   : > { %v1111_v50 = vsel %vm4728_vm7, %v1070_v46, -1e+09  ;;  %v1112_v51 = vsel %vm4736_vm9, %v1071_v47, -1e+09 }
 0x378   : > { %v1065_v52 = vpop.f32.mrf.mxu0  ;;  %v1118_v53 = vsel %vm1114_vm8, %v1111_v50, -inf  ;;  %v1121_v54 = vsel %vm1114_vm8, %v1112_v51, -inf }
 0x379   : > { %v1072_v55 = vmul.f32 0.35355338, %v1065_v52  ;;  %1119 = vmax.xlane.f32.xlu1 %v1118_v53  ;;  %1122 = vmax.xlane.f32.xlu0 %v1121_v54 }
 0x37a   : > { %v4086_v56 = vpop.f32.mrf.mxu0 }
 0x37b   : > { %v1113_v57 = vsel %vm4736_vm9, %v1072_v55, -1e+09 }
 0x37c   : > { %v1124_v58 = vsel %vm1114_vm8, %v1113_v57, -inf }
 0x37d   : > { %1125 = vmax.xlane.f32.xlu1 %v1124_v58 }
 0x38e   : > { %1161 = vrot.lane.b32.xlu1 %v4699_v12, %s4465_s28 }
 0x38f   : > { %1208 = vrot.lane.b32.xlu0 %v4702_v14, %s4465_s28 }
 0x392   : > { %1260 = vrot.lane.b32.xlu1 %v4699_v12, %s4466_s29 }
 0x396   : > { %1311 = vrot.lane.b32.xlu1 %v4702_v14, %s4466_s29 }
 0x3fe   : > { %v1117_v59 = vpop.xlane.xlu1 %1116 }
 0x3ff   : > { %v1127_v60 = vsub.f32 %v1110_v41, %v1117_v59 }
 0x401   : > { %v1131_v1 = vmul.f32 1.442695, %v1127_v60 }
 0x402   : > { %v1120_v61 = vpop.xlane.xlu1 %1119  ;;  %v1123_v62 = vpop.xlane.xlu0 %1122 }
 0x403   : > { %v1129_v63 = vsub.f32 %v1112_v51, %v1123_v62  ;;  %v1128_v6 = vsub.f32 %v1111_v50, %v1120_v61 }
 0x405   : > { %v1135_v0 = vmul.f32 1.442695, %v1129_v63  ;;  %v1133_v9 = vmul.f32 1.442695, %v1128_v6 }
 0x406   : > { %v1209_v2 = vpop.permute.xlu0 %1208  ;;  %v1126_v4 = vpop.xlane.xlu1 %1125 }
 0x407   : > { %v1130_v5 = vsub.f32 %v1113_v57, %v1126_v4  ;;  %4094 = vmatpush3.bf16.msra.mxu0 %v1209_v2  ;;  %4266 = vpow2.f32 %v1135_v0 }
 0x408   : > { %4105 = vmatprep.subr.bf16.mxu0 %v4460_v3  ;;  %4268 = vpow2.f32 %v1131_v1 }
 0x409   : > { %v1137_v7 = vmul.f32 1.442695, %v1130_v5 }
 0x40a   : > { %v1162_v8 = vpop.permute.xlu1 %1161 }
 0x40b   : > { %4088 = vmatpush3.bf16.msra.mxu1 %v1162_v8  ;;  %4270 = vpow2.f32 %v1137_v7 }
 0x40c   : > { %4099 = vmatprep.subr.bf16.mxu1 %v4460_v3  ;;  %4272 = vpow2.f32 %v1133_v9 }
 0x40e   : > { %v1261_v20 = vpop.permute.xlu1 %1260 }
 0x40f   : > { %v1266_v42 = vsel %vm971_vm3, %v1261_v20, 0 }
 0x412   : > { %v1312_v22 = vpop.permute.xlu1 %1311 }
 0x413   : > { %v1317_v36 = vsel %vm971_vm3, %v1312_v22, 0 }
 0x414   : > { %v4267_v10 = vpop.eup %4266 }
 0x415   : > { %v1145_v11 = vsel %vm1114_vm8, %v4267_v10, 0.0  ;;  %v4269_v13 = vpop.eup %4268 }
 0x416   : > { %1146 = vadd.xlane.f32.xlu1 %v1145_v11  ;;  %v1139_v15 = vsel %vm1114_vm8, %v4269_v13, 0.0 }
 0x418   : > { %v4271_v16 = vpop.eup %4270 }
 0x419   : > { %v1148_v17 = vsel %vm1114_vm8, %v4271_v16, 0.0  ;;  %v4273_v18 = vpop.eup %4272 }
 0x41a   : > { %1140 = vadd.xlane.f32.xlu1 %v1139_v15  ;;  %v1142_v19 = vsel %vm1114_vm8, %v4273_v18, 0.0 }
 0x41e   : > { %1149 = vadd.xlane.f32.xlu1 %v1148_v17 }
 0x422   : > { %1143 = vadd.xlane.f32.xlu1 %v1142_v19 }
 0x433   : > { %1258 = vrot.lane.b32.xlu1 %v4699_v12, %s4467_s30 }
 0x437   : > { %1309 = vrot.lane.b32.xlu1 %v4702_v14, %s4467_s30  ;;  %s5651_s30 = scalar_lea.vmem %s5614_s9, %s4597_s19 }
 0x49f   : > { %v1147_v23 = vpop.xlane.xlu1 %1146 }
 0x4a0   : > { %4274 = vrcp.f32 %v1147_v23 }
 0x4a3   : > { %v1141_v25 = vpop.xlane.xlu1 %1140 }
 0x4a7   : > { %v1150_v26 = vpop.xlane.xlu1 %1149 }
 0x4a8   : > { %4276 = vrcp.f32 %v1150_v26 }
 0x4a9   : > { %4278 = vrcp.f32 %v1141_v25 }
 0x4ab   : > { %v1144_v27 = vpop.xlane.xlu1 %1143 }
 0x4ac   : > { %4280 = vrcp.f32 %v1144_v27 }
 0x4ad   : > { %v4275_v28 = vpop.eup %4274 }
 0x4ae   : > { %v1157_v30 = vmul.f32 %v4275_v28, %v4267_v10 }
 0x4af   : > { %v1259_v40 = vpop.permute.xlu1 %1258 }
 0x4b3   : > { %v1310_v43 = vpop.permute.xlu1 %1309 }
 0x4b5   : > { %v4277_v29 = vpop.eup %4276 }
 0x4b6   : > { %v1158_v31 = vmul.f32 %v4277_v29, %v4271_v16  ;;  %v4279_v33 = vpop.eup %4278 }
 0x4b7   : > { %v1155_v38 = vmul.f32 %v4279_v33, %v4269_v13 }
 0x4b8   : > { %v1160_v34 = vpack.c.bf16 %v1158_v31, %v1157_v30 }
 0x4b9   : > { %v4281_v35 = vpop.eup %4280 }
 0x4ba   : > { %4096 = vmatmul.mubr.msk.bf16.vlgmr.msra.gmra.mxu0 %vm1114_vm8, %v1160_v34  ;;  %v1156_v39 = vmul.f32 %v4281_v35, %v4273_v18 }
 0x4bb   : > { %4106 = vmatpush3.bf16.xpose.msra.mxu0 %v1317_v36  ;;  %4107 = vmatprep.mubr.msk.bf16.mxu0 %vm4461_vm2, %v4460_v3 }
 0x4bc   : > { %v1159_v41 = vpack.c.bf16 %v1156_v39, %v1155_v38  ;;  %4117 = vmatprep.subr.bf16.mxu0 %v4460_v3 }
 0x4be   : > { %4090 = vmatmul.mubr.msk.bf16.vlgmr.msra.gmra.mxu1 %vm1114_vm8, %v1159_v41 }
 0x4bf   : > { %4100 = vmatpush3.bf16.xpose.msra.mxu1 %v1266_v42  ;;  %4101 = vmatprep.mubr.msk.bf16.mxu1 %vm4461_vm2, %v4460_v3 }
 0x4c0   : > { %4111 = vmatprep.subr.bf16.mxu1 %v4460_v3 }
 0x4c2   : > { %4108 = vmatmul.mubr.msk.bf16.vlgmr.msra.gmra.mxu0 %vm971_vm3, %v1310_v43  ;;  %v1257_v43 = vld [vmem:[%s5650_s1] sm:$0xf] }
 0x4c3   : > { %4119 = vmatprep.mubr.msk.bf16.mxu0 %vm4461_vm2, %v4460_v3 }
 0x4c6   : > { %4102 = vmatmul.mubr.msk.bf16.vlgmr.msra.gmra.mxu1 %vm971_vm3, %v1259_v40 }
 0x4c7   : > { %4113 = vmatprep.mubr.msk.bf16.mxu1 %vm4461_vm2, %v4460_v3 }
 0x57a   : > { %v4777_v44 = vpop.f32.mrf.mxu0 }
 0x57c   : > { %v4097_v46 = vpop.f32.mrf.mxu0 }
 0x57e   : > { %v4779_v47 = vpop.f32.mrf.mxu1  ;;  %v4781_v48 = vpop.f32.mrf.mxu0 }
 0x57f   : > { %v1256_v49 = vpack.c.bf16 %v4781_v48, %v4777_v44 }
 0x580   : > { %v4091_v50 = vpop.f32.mrf.mxu1  ;;  %v4098_v51 = vpop.f32.mrf.mxu0 }
 0x582   : > { %v4785_v52 = vpop.f32.mrf.mxu1  ;;  %v1353_v53 = vpop.f32.mrf.mxu0 }
 0x583   : > { %v1255_v54 = vpack.c.bf16 %v4785_v52, %v4779_v47  ;;  %v1362_v59 = vmul.f32 0.35355338, %v1353_v53  ;;  %v3962_v52 = vld [vmem:[%s5650_s1 + $0x4] sm:$0xf] }
 0x584   : > { %v4092_v55 = vpop.f32.mrf.mxu1  ;;  %v4109_v56 = vpop.f32.mrf.mxu0 }
 0x585   : > { %v1366_v5 = vsel %vm4736_vm9, %v1362_v59, -1e+09 }
 0x586   : > { %v1302_v57 = vpop.f32.mrf.mxu1  ;;  %v1356_v58 = vpop.f32.mrf.mxu0  ;;  %v1374_v9 = vsel %vm1114_vm8, %v1366_v5, -inf }
 0x587   : > { %v1360_v60 = vmul.f32 0.35355338, %v1302_v57  ;;  %v1363_v2 = vmul.f32 0.35355338, %v1356_v58  ;;  %v1578_v58 = vsel %vm1518_vm10, %v1257_v43, 0 }
 0x588   : > { %v4103_v61 = vpop.f32.mrf.mxu1  ;;  %v4110_v62 = vpop.f32.mrf.mxu0 }
 0x589   : > { %v1364_v63 = vsel %vm4728_vm7, %v1360_v60, -1e+09  ;;  %v1367_v10 = vsel %vm4736_vm9, %v1363_v2, -1e+09 }
 0x58a   : > { %v1305_v0 = vpop.f32.mrf.mxu1  ;;  %v1368_v1 = vsel %vm1114_vm8, %v1364_v63, -inf  ;;  %v1377_v11 = vsel %vm1114_vm8, %v1367_v10, -inf }
 0x58b   : > { %v1361_v4 = vmul.f32 0.35355338, %v1305_v0  ;;  %1369 = vmax.xlane.f32.xlu0 %v1368_v1 }
 0x58c   : > { %v4104_v6 = vpop.f32.mrf.mxu1 }
 0x58d   : > { %v1365_v7 = vsel %vm4728_vm7, %v1361_v4, -1e+09 }
 0x58e   : > { %v1371_v8 = vsel %vm1114_vm8, %v1365_v7, -inf }
 0x58f   : > { %1372 = vmax.xlane.f32.xlu1 %v1371_v8  ;;  %1375 = vmax.xlane.f32.xlu0 %v1374_v9 }
 0x593   : > { %1378 = vmax.xlane.f32.xlu0 %v1377_v11 }
 0x614   : > { %v1370_v13 = vpop.xlane.xlu0 %1369 }
 0x615   : > { %v1380_v15 = vsub.f32 %v1364_v63, %v1370_v13 }
 0x617   : > { %v1384_v22 = vmul.f32 1.442695, %v1380_v15 }
 0x618   : > { %v1373_v16 = vpop.xlane.xlu1 %1372  ;;  %v1376_v17 = vpop.xlane.xlu0 %1375 }
 0x619   : > { %v1382_v18 = vsub.f32 %v1366_v5, %v1376_v17  ;;  %v1381_v19 = vsub.f32 %v1365_v7, %v1373_v16 }
 0x61b   : > { %v1388_v20 = vmul.f32 1.442695, %v1382_v18  ;;  %v1386_v26 = vmul.f32 1.442695, %v1381_v19 }
 0x61c   : > { %v1379_v23 = vpop.xlane.xlu0 %1378 }
 0x61d   : > { %v1383_v25 = vsub.f32 %v1367_v10, %v1379_v23  ;;  %4282 = vpow2.f32 %v1388_v20 }
 0x61e   : > { %4284 = vpow2.f32 %v1384_v22 }
 0x61f   : > { %v1390_v27 = vmul.f32 1.442695, %v1383_v25 }
 0x621   : > { %4286 = vpow2.f32 %v1390_v27 }
 0x622   : > { %4288 = vpow2.f32 %v1386_v26 }
 0x62a   : > { %v4283_v28 = vpop.eup %4282 }
 0x62b   : > { %v1398_v29 = vsel %vm1114_vm8, %v4283_v28, 0.0  ;;  %v4285_v30 = vpop.eup %4284 }
 0x62c   : > { %1399 = vadd.xlane.f32.xlu1 %v1398_v29  ;;  %v1392_v35 = vsel %vm1114_vm8, %v4285_v30, 0.0 }
 0x62e   : > { %v4287_v31 = vpop.eup %4286 }
 0x62f   : > { %v1401_v33 = vsel %vm1114_vm8, %v4287_v31, 0.0  ;;  %v4289_v34 = vpop.eup %4288 }
 0x630   : > { %1402 = vadd.xlane.f32.xlu0 %v1401_v33  ;;  %1393 = vadd.xlane.f32.xlu1 %v1392_v35  ;;  %v1395_v36 = vsel %vm1114_vm8, %v4289_v34, 0.0 }
 0x634   : > { %1396 = vadd.xlane.f32.xlu0 %v1395_v36 }
 0x641   : > { %1414 = vrot.lane.b32.xlu1 %v4699_v12, %s4468_s0 }
 0x645   : > { %1631 = vrot.lane.b32.xlu1 %v4699_v12, %s4469_s4 }
 0x649   : > { %1682 = vrot.lane.b32.xlu1 %v4702_v14, %s4469_s4  ;;  %s5652_s4 = scalar_lea.vmem %s5615_s10, %s4597_s19 }
 0x64a   : > { %1461 = vrot.lane.b32.xlu0 %v4702_v14, %s4468_s0  ;;  %s5655_s0 = sld [smem:[#allocation11_spill]] (!%p3998_p5) }
 0x64d   : > { %1680 = vrot.lane.b32.xlu1 %v4702_v14, %s4470_s20 }
 0x64e   : > { %1629 = vrot.lane.b32.xlu0 %v4699_v12, %s4470_s20  ;;  %s5656_s20 = sld [smem:[#allocation12_spill]] (!%p3998_p5) }
 0x6b5   : > { %v1400_v38 = vpop.xlane.xlu1 %1399 }
 0x6b6   : > { %4290 = vrcp.f32 %v1400_v38 }
 0x6b9   : > { %v1403_v39 = vpop.xlane.xlu0 %1402  ;;  %v1394_v40 = vpop.xlane.xlu1 %1393 }
 0x6ba   : > { %4292 = vrcp.f32 %v1403_v39 }
 0x6bb   : > { %4294 = vrcp.f32 %v1394_v40 }
 0x6bd   : > { %v1397_v41 = vpop.xlane.xlu0 %1396  ;;  %v1415_v42 = vpop.permute.xlu1 %1414 }
 0x6be   : > { %4296 = vrcp.f32 %v1397_v41  ;;  %4112 = vmatpush3.bf16.msra.mxu1 %v1415_v42 }
 0x6bf   : > { %4215 = vmatprep.subr.msk.bf16.mxu1 %vm1518_vm10, %v3962_v52 }
 0x6c1   : > { %v1462_v46 = vpop.permute.xlu0 %1461  ;;  %v1632_v60 = vpop.permute.xlu1 %1631 }
 0x6c2   : > { %4118 = vmatpush3.bf16.msra.mxu0 %v1462_v46  ;;  %v1637_v13 = vsel %vm971_vm3, %v1632_v60, 0 }
 0x6c3   : > { %4216 = vmatprep.subr.msk.bf16.mxu0 %vm1518_vm10, %v1257_v43  ;;  %v4291_v50 = vpop.eup %4290 }
 0x6c4   : > { %v1410_v53 = vmul.f32 %v4291_v50, %v4283_v28 }
 0x6c5   : > { %v1683_v0 = vpop.permute.xlu1 %1682  ;;  %v1630_v19 = vpop.permute.xlu0 %1629 }
 0x6c6   : > { %v1688_v1 = vsel %vm971_vm3, %v1683_v0, 0 }
 0x6c7   : > { %v4293_v51 = vpop.eup %4292 }
 0x6c8   : > { %v1411_v55 = vmul.f32 %v4293_v51, %v4287_v31  ;;  %v4295_v56 = vpop.eup %4294 }
 0x6c9   : > { %v1408_v61 = vmul.f32 %v4295_v56, %v4285_v30  ;;  %v1681_v47 = vpop.permute.xlu1 %1680 }
 0x6ca   : > { %v1413_v57 = vpack.c.bf16 %v1411_v55, %v1410_v53 }
 0x6cb   : > { %v4297_v59 = vpop.eup %4296 }
 0x6cc   : > { %4120 = vmatmul.mubr.msk.bf16.vlgmr.msra.gmra.mxu0 %vm1114_vm8, %v1413_v57  ;;  %v1409_v62 = vmul.f32 %v4297_v59, %v4289_v34 }
 0x6cd   : > { %4131 = vmatprep.mubr.msk.bf16.mxu0 %vm971_vm3, %v1255_v54  ;;  %4130 = vmatpush3.bf16.msra.mxu0 %v1578_v58  ;;  %v1520_v54 = vsel %vm1518_vm10, %v3962_v52, 0 }
 0x6ce   : > { %v1412_v63 = vpack.c.bf16 %v1409_v62, %v1408_v61  ;;  %4141 = vmatprep.subr.bf16.mxu0 %v4460_v3 }
 0x6d0   : > { %4114 = vmatmul.mubr.msk.bf16.vlgmr.msra.gmra.mxu1 %vm1114_vm8, %v1412_v63 }
 0x6d1   : > { %4124 = vmatpush3.bf16.msra.mxu1 %v1520_v54 }
 0x6d2   : > { %4135 = vmatprep.subr.bf16.mxu1 %v4460_v3 }
 0x6d4   : > { %4132 = vmatmul.mubr.msk.bf16.vlgmr.msra.gmra.mxu0 %vm971_vm3, %v1256_v49 }
 0x6d5   : > { %4142 = vmatpush3.bf16.xpose.msra.mxu0 %v1688_v1  ;;  %4143 = vmatprep.mubr.msk.bf16.mxu0 %vm4461_vm2, %v4460_v3 }
 0x6d6   : > { %4153 = vmatprep.subr.bf16.mxu0 %v4460_v3 }
 0x6dc   : > { %4144 = vmatmul.mubr.msk.bf16.vlgmr.msra.gmra.mxu0 %vm971_vm3, %v1681_v47 }
 0x6dd   : > { %4155 = vmatprep.mubr.msk.bf16.mxu0 %vm4461_vm2, %v4460_v3 }
 0x78c   : > { %v1501_v44 = vpop.f32.mrf.mxu0 }
 0x78e   : > { %v4121_v48 = vpop.f32.mrf.mxu0 }
 0x790   : > { %v1454_v49 = vpop.f32.mrf.mxu1  ;;  %v1504_v2 = vpop.f32.mrf.mxu0 }
 0x791   : > { %v1509_v9 = vpack.c.bf16 %v1504_v2, %v1501_v44 }
 0x792   : > { %v4115_v4 = vpop.f32.mrf.mxu1  ;;  %v4122_v5 = vpop.f32.mrf.mxu0 }
 0x794   : > { %v1457_v6 = vpop.f32.mrf.mxu1  ;;  %v4836_v7 = vpop.f32.mrf.mxu0 }
 0x795   : > { %v1508_v8 = vpack.c.bf16 %v1457_v6, %v1454_v49 }
 0x796   : > { %v4116_v10 = vpop.f32.mrf.mxu1  ;;  %v4838_v11 = vpop.f32.mrf.mxu0 }
 0x797   : > { %4125 = vmatprep.mubr.msk.bf16.mxu1 %vm971_vm3, %v1508_v8 }
 0x798   : > { %4126 = vmatmul.mubr.msk.bf16.vlgmr.msra.gmra.mxu1 %vm971_vm3, %v1509_v9  ;;  %v4843_v15 = vpop.f32.mrf.mxu0 }
 0x799   : > { %4136 = vmatpush3.bf16.xpose.msra.mxu1 %v1637_v13  ;;  %4137 = vmatprep.mubr.msk.bf16.mxu1 %vm4461_vm2, %v4460_v3 }
 0x79a   : > { %v4847_v16 = vpop.f32.mrf.mxu0  ;;  %4147 = vmatprep.subr.bf16.mxu1 %v4460_v3 }
 0x79c   : > { %v1724_v17 = vpop.f32.mrf.mxu0 }
 0x79d   : > { %v1733_v29 = vmul.f32 0.35355338, %v1724_v17 }
 0x79e   : > { %v4145_v18 = vpop.f32.mrf.mxu0 }
 0x79f   : > { %v1737_v39 = vsel %vm4736_vm9, %v1733_v29, -1e+09 }
 0x7a0   : > { %4138 = vmatmul.mubr.msk.bf16.vlgmr.msra.gmra.mxu1 %vm971_vm3, %v1630_v19  ;;  %v1727_v20 = vpop.f32.mrf.mxu0  ;;  %v1745_v43 = vsel %vm1114_vm8, %v1737_v39, -inf }
 0x7a1   : > { %4149 = vmatprep.mubr.msk.bf16.mxu1 %vm4461_vm2, %v4460_v3  ;;  %v1734_v36 = vmul.f32 0.35355338, %v1727_v20 }
 0x7a2   : > { %v4146_v22 = vpop.f32.mrf.mxu0 }
 0x7a3   : > { %v1738_v46 = vsel %vm4736_vm9, %v1734_v36, -1e+09  ;;  %v3971_v36 = vld [vmem:[%s5650_s1 + $0x8] sm:$0xf] }
 0x7a4   : > { %v1748_v50 = vsel %vm1114_vm8, %v1738_v46, -inf }
 0x858   : > { %v4853_v23 = vpop.f32.mrf.mxu1 }
 0x85a   : > { %v4855_v25 = vpop.f32.mrf.mxu1 }
 0x85c   : > { %v4857_v26 = vpop.f32.mrf.mxu1 }
 0x85e   : > { %v4859_v27 = vpop.f32.mrf.mxu1 }
 0x860   : > { %v1673_v28 = vpop.f32.mrf.mxu1 }
 0x861   : > { %v1731_v30 = vmul.f32 0.35355338, %v1673_v28 }
 0x862   : > { %v4139_v31 = vpop.f32.mrf.mxu1 }
 0x863   : > { %v1735_v33 = vsel %vm4728_vm7, %v1731_v30, -1e+09 }
 0x864   : > { %v1676_v34 = vpop.f32.mrf.mxu1  ;;  %v1739_v35 = vsel %vm1114_vm8, %v1735_v33, -inf }
 0x865   : > { %v1732_v38 = vmul.f32 0.35355338, %v1676_v34  ;;  %1740 = vmax.xlane.f32.xlu0 %v1739_v35 }
 0x866   : > { %v4140_v40 = vpop.f32.mrf.mxu1 }
 0x867   : > { %v1736_v41 = vsel %vm4728_vm7, %v1732_v38, -1e+09  ;;  %v1890_v38 = vsel %vm1518_vm10, %v3971_v36, 0 }
 0x868   : > { %v1742_v42 = vsel %vm1114_vm8, %v1736_v41, -inf }
 0x869   : > { %1743 = vmax.xlane.f32.xlu1 %v1742_v42  ;;  %1746 = vmax.xlane.f32.xlu0 %v1745_v43 }
 0x86d   : > { %1749 = vmax.xlane.f32.xlu0 %v1748_v50 }
 0x8ee   : > { %v1741_v51 = vpop.xlane.xlu0 %1740 }
 0x8ef   : > { %v1751_v53 = vsub.f32 %v1735_v33, %v1741_v51 }
 0x8f1   : > { %v1755_v60 = vmul.f32 1.442695, %v1751_v53 }
 0x8f2   : > { %v1744_v55 = vpop.xlane.xlu1 %1743  ;;  %v1747_v56 = vpop.xlane.xlu0 %1746 }
 0x8f3   : > { %v1753_v57 = vsub.f32 %v1737_v39, %v1747_v56  ;;  %v1752_v58 = vsub.f32 %v1736_v41, %v1744_v55 }
 0x8f5   : > { %v1759_v59 = vmul.f32 1.442695, %v1753_v57  ;;  %v1757_v63 = vmul.f32 1.442695, %v1752_v58 }
 0x8f6   : > { %v1750_v61 = vpop.xlane.xlu0 %1749 }
 0x8f7   : > { %v1754_v62 = vsub.f32 %v1738_v46, %v1750_v61  ;;  %4298 = vpow2.f32 %v1759_v59 }
 0x8f8   : > { %4300 = vpow2.f32 %v1755_v60 }
 0x8f9   : > { %v1761_v0 = vmul.f32 1.442695, %v1754_v62 }
 0x8fb   : > { %4302 = vpow2.f32 %v1761_v0 }
 0x8fc   : > { %4304 = vpow2.f32 %v1757_v63 }
 0x904   : > { %v4299_v1 = vpop.eup %4298 }
 0x905   : > { %v1769_v47 = vsel %vm1114_vm8, %v4299_v1, 0.0  ;;  %v4301_v52 = vpop.eup %4300 }
 0x906   : > { %1770 = vadd.xlane.f32.xlu1 %v1769_v47  ;;  %v1763_v49 = vsel %vm1114_vm8, %v4301_v52, 0.0 }
 0x908   : > { %v4303_v54 = vpop.eup %4302 }
 0x909   : > { %v1772_v44 = vsel %vm1114_vm8, %v4303_v54, 0.0  ;;  %v4305_v48 = vpop.eup %4304 }
 0x90a   : > { %1773 = vadd.xlane.f32.xlu0 %v1772_v44  ;;  %1764 = vadd.xlane.f32.xlu1 %v1763_v49  ;;  %v1766_v2 = vsel %vm1114_vm8, %v4305_v48, 0.0 }
 0x90e   : > { %1767 = vadd.xlane.f32.xlu0 %v1766_v2 }
 0x91b   : > { %1785 = vrot.lane.b32.xlu1 %v4699_v12, %s4471_s23 }
 0x91f   : > { %1947 = vrot.lane.b32.xlu1 %v4699_v12, %s4472_s26 }
 0x923   : > { %1998 = vrot.lane.b32.xlu1 %v4702_v14, %s4472_s26 }
 0x924   : > { %1832 = vrot.lane.b32.xlu0 %v4702_v14, %s4471_s23  ;;  %s5653_s23 = scalar_lea.vmem %s5616_s11, %s4597_s19 }
 0x927   : > { %1996 = vrot.lane.b32.xlu1 %v4702_v14, %s4473_s3 }
 0x928   : > { %1945 = vrot.lane.b32.xlu0 %v4699_v12, %s4473_s3 }
 0x98f   : > { %v1771_v4 = vpop.xlane.xlu1 %1770 }
 0x990   : > { %4306 = vrcp.f32 %v1771_v4 }
 0x993   : > { %v1774_v5 = vpop.xlane.xlu0 %1773  ;;  %v1765_v6 = vpop.xlane.xlu1 %1764 }
 0x994   : > { %4308 = vrcp.f32 %v1774_v5 }
 0x995   : > { %4310 = vrcp.f32 %v1765_v6  ;;  %v1623_v6 = vadd.f32 %v4836_v7, %v4853_v23 }
 0x997   : > { %v1768_v8 = vpop.xlane.xlu0 %1767  ;;  %v1786_v9 = vpop.permute.xlu1 %1785 }
 0x998   : > { %4312 = vrcp.f32 %v1768_v8  ;;  %4148 = vmatpush3.bf16.msra.mxu1 %v1786_v9 }
 0x999   : > { %4217 = vmatprep.subr.msk.bf16.mxu1 %vm1518_vm10, %v3971_v36 }
 0x99b   : > { %v1833_v10 = vpop.permute.xlu0 %1832  ;;  %v1948_v22 = vpop.permute.xlu1 %1947 }
 0x99c   : > { %4154 = vmatpush3.bf16.msra.mxu0 %v1833_v10  ;;  %v1953_v30 = vsel %vm971_vm3, %v1948_v22, 0  ;;  %v1615_v10 = vadd.f32 %v4838_v11, %v4855_v25 }
 0x99d   : > { %4165 = vmatprep.subr.bf16.mxu0 %v4460_v3  ;;  %v4307_v13 = vpop.eup %4306 }
 0x99e   : > { %v1781_v18 = vmul.f32 %v4307_v13, %v4299_v1 }
 0x99f   : > { %v1946_v35 = vpop.permute.xlu0 %1945  ;;  %v1999_v53 = vpop.permute.xlu1 %1998 }
 0x9a0   : > { %v2004_v61 = vsel %vm971_vm3, %v1999_v53, 0 }
 0x9a1   : > { %v4309_v17 = vpop.eup %4308 }
 0x9a2   : > { %v1782_v19 = vmul.f32 %v4309_v17, %v4303_v54  ;;  %v4311_v20 = vpop.eup %4310  ;;  %v1626_v17 = vadd.f32 %v4843_v15, %v4857_v26 }
 0x9a3   : > { %v1779_v31 = vmul.f32 %v4311_v20, %v4301_v52  ;;  %v1997_v54 = vpop.permute.xlu1 %1996  ;;  %v1618_v20 = vadd.f32 %v4847_v16, %v4859_v27 }
 0x9a4   : > { %v1784_v28 = vpack.c.bf16 %v1782_v19, %v1781_v18 }
 0x9a5   : > { %v4313_v29 = vpop.eup %4312 }
 0x9a6   : > { %4156 = vmatmul.mubr.msk.bf16.vlgmr.msra.gmra.mxu0 %vm1114_vm8, %v1784_v28  ;;  %v1780_v33 = vmul.f32 %v4313_v29, %v4305_v48 }
 0x9a7   : > { %4166 = vmatpush3.bf16.xpose.msra.mxu0 %v1953_v30  ;;  %4167 = vmatprep.mubr.msk.bf16.mxu0 %vm4461_vm2, %v4460_v3 }
 0x9a8   : > { %v1783_v34 = vpack.c.bf16 %v1780_v33, %v1779_v31  ;;  %4177 = vmatprep.subr.bf16.mxu0 %v4460_v3 }
 0x9aa   : > { %4150 = vmatmul.mubr.msk.bf16.vlgmr.msra.gmra.mxu1 %vm1114_vm8, %v1783_v34 }
 0x9ab   : > { %4160 = vmatpush3.bf16.msra.mxu1 %v1890_v38 }
 0x9ac   : > { %4171 = vmatprep.subr.bf16.mxu1 %v4460_v3 }
 0x9ae   : > { %4168 = vmatmul.mubr.msk.bf16.vlgmr.msra.gmra.mxu0 %vm971_vm3, %v1946_v35 }
 0x9af   : > { %4179 = vmatprep.mubr.msk.bf16.mxu0 %vm4461_vm2, %v4460_v3 }
 0xa66   : > { %v1872_v39 = vpop.f32.mrf.mxu0 }
 0xa68   : > { %v4157_v40 = vpop.f32.mrf.mxu0 }
 0xa6a   : > { %v1825_v41 = vpop.f32.mrf.mxu1  ;;  %v1875_v42 = vpop.f32.mrf.mxu0 }
 0xa6b   : > { %v1880_v57 = vpack.c.bf16 %v1875_v42, %v1872_v39 }
 0xa6c   : > { %v4151_v43 = vpop.f32.mrf.mxu1  ;;  %v4158_v46 = vpop.f32.mrf.mxu0 }
 0xa6e   : > { %v1828_v50 = vpop.f32.mrf.mxu1  ;;  %v1989_v51 = vpop.f32.mrf.mxu0 }
 0xa6f   : > { %v1879_v55 = vpack.c.bf16 %v1828_v50, %v1825_v41  ;;  %v2047_v56 = vmul.f32 0.35355338, %v1989_v51 }
 0xa70   : > { %v4152_v58 = vpop.f32.mrf.mxu1  ;;  %v4169_v59 = vpop.f32.mrf.mxu0 }
 0xa71   : > { %4161 = vmatprep.mubr.msk.bf16.mxu1 %vm971_vm3, %v1879_v55  ;;  %v2051_v60 = vsel %vm4728_vm7, %v2047_v56, -1e+09 }
 0xa72   : > { %4162 = vmatmul.mubr.msk.bf16.vlgmr.msra.gmra.mxu1 %vm971_vm3, %v1880_v57  ;;  %v1992_v62 = vpop.f32.mrf.mxu0  ;;  %v2055_v63 = vsel %vm1114_vm8, %v2051_v60, -inf }
 0xa73   : > { %v2048_v0 = vmul.f32 0.35355338, %v1992_v62  ;;  %4172 = vmatpush3.bf16.xpose.msra.mxu1 %v2004_v61  ;;  %2056 = vmax.xlane.f32.xlu0 %v2055_v63 }
 0xa74   : > { %v4170_v1 = vpop.f32.mrf.mxu0  ;;  %4173 = vmatprep.mubr.msk.bf16.mxu1 %vm4461_vm2, %v4460_v3  ;;  %4183 = vmatprep.subr.bf16.mxu1 %v4460_v3 }
 0xa75   : > { %v2052_v47 = vsel %vm4728_vm7, %v2048_v0, -1e+09 }
 0xa76   : > { %v2058_v52 = vsel %vm1114_vm8, %v2052_v47, -inf }
 0xa77   : > { %2059 = vmax.xlane.f32.xlu1 %v2058_v52 }
 0xa7a   : > { %4174 = vmatmul.mubr.msk.bf16.vlgmr.msra.gmra.mxu1 %vm971_vm3, %v1997_v54 }
 0xa7b   : > { %4185 = vmatprep.mubr.msk.bf16.mxu1 %vm4461_vm2, %v4460_v3 }
 0xafc   : > { %v2057_v44 = vpop.xlane.xlu0 %2056 }
 0xafd   : > { %v2067_v48 = vsub.f32 %v2051_v60, %v2057_v44 }
 0xaff   : > { %v2071_v49 = vmul.f32 1.442695, %v2067_v48 }
 0xb00   : > { %v2060_v5 = vpop.xlane.xlu1 %2059 }
 0xb01   : > { %4314 = vpow2.f32 %v2071_v49  ;;  %v2068_v37 = vsub.f32 %v2052_v47, %v2060_v5  ;;  %v3978_v47 = vld [vmem:[%s5650_s1 + $0xc] sm:$0xf] }
 0xb02   : > { %v2206_v52 = vsel %vm1518_vm10, %v3978_v47, 0 }
 0xb03   : > { %v2073_v8 = vmul.f32 1.442695, %v2068_v37 }
 0xb05   : > { %4316 = vpow2.f32 %v2073_v8 }
 0xb0e   : > { %v4315_v2 = vpop.eup %4314 }
 0xb0f   : > { %v2079_v4 = vsel %vm1114_vm8, %v4315_v2, 0.0 }
 0xb10   : > { %2080 = vadd.xlane.f32.xlu1 %v2079_v4 }
 0xb12   : > { %v4317_v33 = vpop.eup %4316 }
 0xb13   : > { %v2082_v34 = vsel %vm1114_vm8, %v4317_v33, 0.0 }
 0xb32   : > { %v4163_v9 = vpop.f32.mrf.mxu1 }
 0xb33   : > { %v4917_v13 = vadd.f32 %v4163_v9, %v1623_v6 }
 0xb34   : > { %v1926_v3 = vpop.f32.mrf.mxu1 }
 0xb35   : > { %v4921_v18 = vadd.f32 %v1926_v3, %v1615_v10  ;;  %v3981_v3 = vld [vmem:[%s5651_s30] ss:$0 sm:$0xff] }
 0xb36   : > { %v4164_v19 = vpop.f32.mrf.mxu1 }
 0xb37   : > { %v4925_v22 = vadd.f32 %v4164_v19, %v1626_v17 }
 0xb38   : > { %v1929_v7 = vpop.f32.mrf.mxu1 }
 0xb39   : > { %v4927_v23 = vadd.f32 %v1929_v7, %v1618_v20 }
 0xb3a   : > { %v2040_v28 = vpop.f32.mrf.mxu1 }
 0xb3b   : > { %v2049_v11 = vmul.f32 0.35355338, %v2040_v28 }
 0xb3c   : > { %v4175_v25 = vpop.f32.mrf.mxu1 }
 0xb3d   : > { %v2053_v29 = vsel %vm4736_vm9, %v2049_v11, -1e+09 }
 0xb3e   : > { %v2043_v30 = vpop.f32.mrf.mxu1  ;;  %v2061_v15 = vsel %vm1114_vm8, %v2053_v29, -inf }
 0xb3f   : > { %v2050_v26 = vmul.f32 0.35355338, %v2043_v30  ;;  %2062 = vmax.xlane.f32.xlu0 %v2061_v15  ;;  %v4354_v30 = vld [vmem:[#allocation2] sm:$0xff] }
 0xb40   : > { %v4176_v31 = vpop.f32.mrf.mxu1 }
 0xb41   : > { %v2054_v16 = vsel %vm4736_vm9, %v2050_v26, -1e+09 }
 0xb42   : > { %v2064_v27 = vsel %vm1114_vm8, %v2054_v16, -inf }
 0xb43   : > { %2065 = vmax.xlane.f32.xlu0 %v2064_v27 }
 0xb47   : > { %2083 = vadd.xlane.f32.xlu0 %v2082_v34 }
 0xb99   : > { %v2081_v51 = vpop.xlane.xlu1 %2080 }
 0xbc8   : > { %v2063_v35 = vpop.xlane.xlu0 %2062 }
 0xbc9   : > { %v2069_v36 = vsub.f32 %v2053_v29, %v2063_v35 }
 0xbcb   : > { %v2075_v38 = vmul.f32 1.442695, %v2069_v36  ;;  %v4357_v36 = vld [vmem:[#allocation2 + $0x18] sm:$0xff] }
 0xbcc   : > { %v2066_v39 = vpop.xlane.xlu0 %2065 }
 0xbcd   : > { %4318 = vpow2.f32 %v2075_v38  ;;  %v2070_v40 = vsub.f32 %v2054_v16, %v2066_v39  ;;  %v4355_v16 = vld [vmem:[#allocation2 + $0x10] sm:$0xff] }
 0xbcf   : > { %v2077_v41 = vmul.f32 1.442695, %v2070_v40 }
 0xbd0   : > { %v2084_v50 = vpop.xlane.xlu0 %2083 }
 0xbd1   : > { %4320 = vpow2.f32 %v2077_v41 }
 0xbd2   : > { %4322 = vrcp.f32 %v2084_v50 }
 0xbd3   : > { %4324 = vrcp.f32 %v2081_v51 }
 0xbda   : > { %v4319_v42 = vpop.eup %4318 }
 0xbdb   : > { %v2085_v43 = vsel %vm1114_vm8, %v4319_v42, 0.0 }
 0xbdc   : > { %2086 = vadd.xlane.f32.xlu1 %v2085_v43 }
 0xbde   : > { %v4321_v45 = vpop.eup %4320 }
 0xbdf   : > { %v2088_v46 = vsel %vm1114_vm8, %v4321_v45, 0.0  ;;  %v4323_v53 = vpop.eup %4322 }
 0xbe0   : > { %2089 = vadd.xlane.f32.xlu0 %v2088_v46  ;;  %v4325_v56 = vpop.eup %4324  ;;  %v2096_v57 = vmul.f32 %v4323_v53, %v4317_v33  ;;  %v4356_v33 = vld [vmem:[#allocation2 + $0x8] sm:$0xff] }
 0xbe1   : > { %v2095_v60 = vmul.f32 %v4325_v56, %v4315_v2 }
 0xbe3   : > { %v2099_v61 = vpack.c.bf16 %v2096_v57, %v2095_v60 }
 0xbed   : > { %2101 = vrot.lane.b32.xlu1 %v4699_v12, %s4474_s2 }
 0xbf6   : > { %2148 = vrot.lane.b32.xlu0 %v4702_v14, %s4474_s2 }
 0xc65   : > { %v2087_v55 = vpop.xlane.xlu1 %2086 }
 0xc66   : > { %4326 = vrcp.f32 %v2087_v55 }
 0xc69   : > { %v2090_v58 = vpop.xlane.xlu0 %2089  ;;  %v2102_v59 = vpop.permute.xlu1 %2101 }
 0xc6a   : > { %4328 = vrcp.f32 %v2090_v58  ;;  %4178 = vmatpush3.bf16.msra.mxu0 %v2102_v59 }
 0xc6b   : > { %4218 = vmatprep.subr.msk.bf16.mxu0 %vm1518_vm10, %v3978_v47 }
 0xc6d   : > { %v2149_v62 = vpop.permute.xlu0 %2148  ;;  %4180 = vmatmul.mubr.msk.bf16.vlgmr.msra.gmra.mxu0 %vm1114_vm8, %v2099_v61 }
 0xc6e   : > { %4184 = vmatpush3.bf16.msra.mxu1 %v2149_v62  ;;  %4190 = vmatpush3.bf16.msra.mxu0 %v2206_v52 }
 0xc73   : > { %v4327_v12 = vpop.eup %4326 }
 0xc74   : > { %v2097_v63 = vmul.f32 %v4327_v12, %v4319_v42 }
 0xc77   : > { %v4329_v14 = vpop.eup %4328 }
 0xc78   : > { %v2098_v0 = vmul.f32 %v4329_v14, %v4321_v45  ;;  %v4260_v14 = vld [vmem:[%s4629_s6 + $0x8] sm:$0xff]  }
 0xc79   : > { %4195 = vmatprep.subr.bf16.mxu1 %v4260_v14 }
 0xc7a   : > { %v2100_v1 = vpack.c.bf16 %v2098_v0, %v2097_v63  ;;  %v4261_v63 = vld [vmem:[%s4629_s6] sm:$0xff]  }
 0xc7c   : > { %4186 = vmatmul.mubr.msk.bf16.vlgmr.msra.gmra.mxu1 %vm1114_vm8, %v2100_v1 }
 0xc7d   : > { %4196 = vmatpush3.bf16.msra.mxu1 %v4260_v14 }
 0xc7e   : > { %4197 = vmatprep.subr.bf16.mxu1 %v4261_v63 }
 0xc81   : > { %4198 = vmatpush3.bf16.msra.mxu1 %v4261_v63 }
 0xd2d   : > { %v2141_v54 = vpop.f32.mrf.mxu0 }
 0xd2f   : > { %v4181_v44 = vpop.f32.mrf.mxu0 }
 0xd31   : > { %v2144_v48 = vpop.f32.mrf.mxu0 }
 0xd32   : > { %v2195_v49 = vpack.c.bf16 %v2144_v48, %v2141_v54 }
 0xd33   : > { %v4182_v2 = vpop.f32.mrf.mxu0 }
 0xd34   : > { %4191 = vmatprep.mubr.msk.bf16.mxu0 %vm971_vm3, %v2195_v49 }
 0xd3c   : > { %v2188_v4 = vpop.f32.mrf.mxu1 }
 0xd3e   : > { %v4187_v5 = vpop.f32.mrf.mxu1 }
 0xd40   : > { %v2191_v37 = vpop.f32.mrf.mxu1 }
 0xd41   : > { %v2196_v6 = vpack.c.bf16 %v2191_v37, %v2188_v4 }
 0xd42   : > { %v4188_v8 = vpop.f32.mrf.mxu1 }
 0xd43   : > { %4192 = vmatmul.mubr.msk.bf16.vlgmr.msra.gmra.mxu0 %vm971_vm3, %v2196_v6 }
 0xe03   : > { %v4193_v9 = vpop.f32.mrf.mxu0 }
 0xe04   : > { %v2259_v10 = vadd.f32 %v4193_v9, %v4917_v13  ;;  %v3982_v9 = vld [vmem:[%s5652_s4] ss:$0 sm:$0xff] }
 0xe05   : > { %v2242_v17 = vpop.f32.mrf.mxu0 }
 0xe06   : > { %v2257_v19 = vadd.f32 %v2242_v17, %v4921_v18  ;;  %v2270_v7 = vadd.f32 %v3981_v3, %v2259_v10 }
 0xe07   : > { %v4194_v20 = vpop.f32.mrf.mxu0 }
 0xe08   : > { %v2268_v28 = vadd.f32 %v3981_v3, %v2257_v19  ;;  %v2260_v11 = vadd.f32 %v4194_v20, %v4925_v22  ;;  %v2274_v27 = vadd.f32 %v4355_v16, %v2270_v7  ;;  %v3983_v7 = vld [vmem:[%s5653_s23] ss:$0 sm:$0xff] }
 0xe09   : > { %v2245_v25 = vpop.f32.mrf.mxu0 }
 0xe0a   : > { %v2258_v29 = vadd.f32 %v2245_v25, %v4927_v23  ;;  %v2272_v15 = vadd.f32 %v4354_v30, %v2268_v28  ;;  %v2271_v26 = vadd.f32 %v3981_v3, %v2260_v11  ;;  %v2284_v35 = vsel %vm908_vm1, %v2274_v27, 0.0 }
 0xe0c   : > { %v2269_v13 = vadd.f32 %v3981_v3, %v2258_v29  ;;  %v2278_v31 = vsel %vm908_vm1, %v2272_v15, 0.0  ;;  %v2275_v22 = vadd.f32 %v4357_v36, %v2271_v26  ;;  %v3984_v36 = vld [vmem:[%s775_s8] ss:$0 sm:$0xff] }
 0xe0d   : > { %2279 = vadd.xlane.f32.xlu1 %v2278_v31 }
 0xe0e   : > { %v2273_v34 = vadd.f32 %v4356_v33, %v2269_v13  ;;  %v2287_v23 = vsel %vm908_vm1, %v2275_v22, 0.0  ;;  %v4262_v33 = vld [vmem:[%s4639_s22 + $0x18] sm:$0xff]  }
 0xe0f   : > { %4203 = vmatprep.subr.bf16.mxu0 %v4262_v33 }
 0xe10   : > { %v2281_v18 = vsel %vm908_vm1, %v2273_v34, 0.0  ;;  %4204 = vmatpush3.bf16.msra.mxu0 %v4262_v33 }
 0xe11   : > { %2282 = vadd.xlane.f32.xlu0 %v2281_v18  ;;  %2285 = vadd.xlane.f32.xlu1 %v2284_v35  ;;  %v4264_v18 = vld [vmem:[%s4639_s22 + $0x8] sm:$0xff]   ;;  %v4265_v35 = vld [vmem:[%s4639_s22] sm:$0xff]  }
 0xe15   : > { %2288 = vadd.xlane.f32.xlu0 %v2287_v23 }
 0xe96   : > { %v2280_v38 = vpop.xlane.xlu1 %2279 }
 0xe97   : > { %v2291_v39 = vmul.f32 0.03125, %v2280_v38 }
 0xe99   : > { %v2295_v40 = vsub.f32 %v2272_v15, %v2291_v39 }
 0xe9a   : > { %v2283_v41 = vpop.xlane.xlu0 %2282  ;;  %v2286_v42 = vpop.xlane.xlu1 %2285 }
 0xe9b   : > { %v2292_v43 = vmul.f32 0.03125, %v2283_v41  ;;  %v2293_v45 = vmul.f32 0.03125, %v2286_v42  ;;  %v2299_v46 = vmul.f32 %v2295_v40, %v2295_v40 }
 0xe9d   : > { %v2296_v50 = vsub.f32 %v2273_v34, %v2292_v43  ;;  %v2297_v51 = vsub.f32 %v2274_v27, %v2293_v45  ;;  %v2303_v53 = vsel %vm908_vm1, %v2299_v46, 0.0  ;;  %v4263_v34 = vld [vmem:[%s4639_s22 + $0x10] sm:$0xff]  }
 0xe9e   : > { %v2289_v55 = vpop.xlane.xlu0 %2288  ;;  %2304 = vadd.xlane.f32.xlu1 %v2303_v53  ;;  %4205 = vmatprep.subr.bf16.mxu0 %v4263_v34 }
 0xe9f   : > { %v2294_v56 = vmul.f32 0.03125, %v2289_v55  ;;  %v2300_v57 = vmul.f32 %v2296_v50, %v2296_v50  ;;  %v2301_v58 = vmul.f32 %v2297_v51, %v2297_v51  ;;  %4206 = vmatpush3.bf16.msra.mxu0 %v4263_v34 }
 0xea0   : > { %4207 = vmatprep.subr.bf16.mxu0 %v4264_v18 }
 0xea1   : > { %v2298_v59 = vsub.f32 %v2275_v22, %v2294_v56  ;;  %v2306_v60 = vsel %vm908_vm1, %v2300_v57, 0.0  ;;  %v2309_v61 = vsel %vm908_vm1, %v2301_v58, 0.0 }
 0xea2   : > { %2307 = vadd.xlane.f32.xlu0 %v2306_v60  ;;  %2310 = vadd.xlane.f32.xlu1 %v2309_v61 }
 0xea3   : > { %v2302_v62 = vmul.f32 %v2298_v59, %v2298_v59  ;;  %4208 = vmatpush3.bf16.msra.mxu0 %v4264_v18 }
 0xea4   : > { %4209 = vmatprep.subr.bf16.mxu0 %v4265_v35 }
 0xea5   : > { %v2312_v12 = vsel %vm908_vm1, %v2302_v62, 0.0 }
 0xea6   : > { %2313 = vadd.xlane.f32.xlu0 %v2312_v12 }
 0xea7   : > { %4210 = vmatpush3.bf16.msra.mxu0 %v4265_v35 }
 0xf27   : > { %v2305_v0 = vpop.xlane.xlu1 %2304 }
 0xf28   : > { %v2315_v1 = vmul.f32 0.03125, %v2305_v0 }
 0xf2a   : > { %v2319_v47 = vadd.f32 1e-07, %v2315_v1 }
 0xf2b   : > { %v2308_v52 = vpop.xlane.xlu0 %2307  ;;  %v2311_v54 = vpop.xlane.xlu1 %2310 }
 0xf2c   : > { %4330 = vrsqrt.f32 %v2319_v47  ;;  %v2316_v44 = vmul.f32 0.03125, %v2308_v52  ;;  %v2317_v48 = vmul.f32 0.03125, %v2311_v54 }
 0xf2e   : > { %v2320_v49 = vadd.f32 1e-07, %v2316_v44  ;;  %v2321_v2 = vadd.f32 1e-07, %v2317_v48 }
 0xf2f   : > { %v2314_v4 = vpop.xlane.xlu0 %2313 }
 0xf30   : > { %4332 = vrsqrt.f32 %v2320_v49  ;;  %v2318_v5 = vmul.f32 0.03125, %v2314_v4 }
 0xf31   : > { %4334 = vrsqrt.f32 %v2321_v2 }
 0xf32   : > { %v2322_v37 = vadd.f32 1e-07, %v2318_v5 }
 0xf34   : > { %4336 = vrsqrt.f32 %v2322_v37 }
 0xf39   : > { %v4331_v6 = vpop.eup %4330 }
 0xf3a   : > { %v2327_v8 = vmul.f32 %v4331_v6, %v2295_v40 }
 0xf3c   : > { %v2337_v19 = vmul.f32 %v3982_v9, %v2327_v8 }
 0xf3d   : > { %v4333_v10 = vpop.eup %4332 }
 0xf3e   : > { %v4335_v3 = vpop.eup %4334  ;;  %v2328_v17 = vmul.f32 %v4333_v10, %v2296_v50  ;;  %v4976_v29 = vadd.f32 %v3983_v7, %v2337_v19 }
 0xf3f   : > { %v2329_v20 = vmul.f32 %v4335_v3, %v2297_v51 }
 0xf40   : > { %v2338_v28 = vmul.f32 %v3982_v9, %v2328_v17 }
 0xf41   : > { %v4337_v11 = vpop.eup %4336  ;;  %v2339_v15 = vmul.f32 %v3982_v9, %v2329_v20 }
 0xf42   : > { %v2330_v25 = vmul.f32 %v4337_v11, %v2298_v59  ;;  %v4978_v30 = vadd.f32 %v3983_v7, %v2338_v28 }
 0xf43   : > { %v4983_v31 = vadd.f32 %v3983_v7, %v2339_v15 }
 0xf44   : > { %v2351_v26 = vpack.c.bf16 %v4978_v30, %v4976_v29  ;;  %v2340_v13 = vmul.f32 %v3982_v9, %v2330_v25  ;;  %v3989_v25 = vld [vmem:[%s783_s25] ss:$0 sm:$0xff] }
 0xf46   : > { %4199 = vmatprep.mubr.msk.bf16.mxu1 %vm908_vm1, %v2351_v26  ;;  %v4985_v16 = vadd.f32 %v3983_v7, %v2340_v13 }
 0xf48   : > { %v2352_v27 = vpack.c.bf16 %v4985_v16, %v4983_v31 }
 0xf4a   : > { %4200 = vmatmul.mubr.msk.bf16.vlgmr.msra.gmra.mxu1 %vm908_vm1, %v2352_v27 }
0x100a   : > { %v4201_v22 = vpop.f32.mrf.mxu1 }
0x100b   : > { %v2425_v23 = vadd.f32 %v4201_v22, %v3984_v36 }
0x100c   : > { %v2416_v38 = vpop.f32.mrf.mxu1 }
0x100d   : > { %v2437_v39 = vmul.f32 0.044715, %v2425_v23  ;;  %v2417_v40 = vadd.f32 %v3984_v36, %v2416_v38  ;;  %v2433_v10 = vmul.f32 0.5, %v2425_v23 }
0x100e   : > { %v4202_v41 = vpop.f32.mrf.mxu1 }
0x100f   : > { %v2441_v42 = vmul.f32 %v2437_v39, %v2425_v23  ;;  %v2435_v43 = vmul.f32 0.044715, %v2417_v40  ;;  %v2428_v45 = vadd.f32 %v4202_v41, %v3984_v36  ;;  %v2431_v6 = vmul.f32 0.5, %v2417_v40 }
0x1010   : > { %v2419_v46 = vpop.f32.mrf.mxu1 }
0x1011   : > { %v2445_v50 = vmul.f32 %v2441_v42, %v2425_v23  ;;  %v2439_v51 = vmul.f32 %v2435_v43, %v2417_v40  ;;  %v2438_v53 = vmul.f32 0.044715, %v2428_v45  ;;  %v2420_v55 = vadd.f32 %v3984_v36, %v2419_v46 }
0x1012   : > { %v2434_v5 = vmul.f32 0.5, %v2428_v45 }
0x1013   : > { %v2449_v56 = vadd.f32 %v2445_v50, %v2425_v23  ;;  %v2443_v57 = vmul.f32 %v2439_v51, %v2417_v40  ;;  %v2442_v58 = vmul.f32 %v2438_v53, %v2428_v45  ;;  %v2436_v59 = vmul.f32 0.044715, %v2420_v55 }
0x1014   : > { %v2432_v8 = vmul.f32 0.5, %v2420_v55 }
0x1015   : > { %v2453_v60 = vmul.f32 0.7978846, %v2449_v56  ;;  %v2447_v61 = vadd.f32 %v2443_v57, %v2417_v40  ;;  %v2446_v62 = vmul.f32 %v2442_v58, %v2428_v45  ;;  %v2440_v12 = vmul.f32 %v2436_v59, %v2420_v55 }
0x1017   : > { %v2451_v14 = vmul.f32 0.7978846, %v2447_v61  ;;  %v2450_v63 = vadd.f32 %v2446_v62, %v2428_v45  ;;  %v2444_v0 = vmul.f32 %v2440_v12, %v2420_v55  ;;  %4338 = vtanh.f32 %v2453_v60 }
0x1019   : > { %v2454_v1 = vmul.f32 0.7978846, %v2450_v63  ;;  %4340 = vtanh.f32 %v2451_v14  ;;  %v2448_v47 = vadd.f32 %v2444_v0, %v2420_v55 }
0x101b   : > { %4342 = vtanh.f32 %v2454_v1  ;;  %v2452_v52 = vmul.f32 0.7978846, %v2448_v47 }
0x101d   : > { %4344 = vtanh.f32 %v2452_v52 }
0x1024   : > { %v4339_v54 = vpop.eup %4338 }
0x1025   : > { %v2461_v37 = vadd.f32 1.0, %v4339_v54 }
0x1026   : > { %v4341_v44 = vpop.eup %4340 }
0x1027   : > { %v2459_v2 = vadd.f32 1.0, %v4341_v44  ;;  %v2465_v20 = vmul.f32 %v2461_v37, %v2433_v10  ;;  %v3996_v37 = vld [vmem:[%s786_s27] ss:$0 sm:$0xff]  ;;  %s5654_s27 = sld [smem:[#allocation16_spill]] (!%p3998_p5) }
0x1028   : > { %v4343_v48 = vpop.eup %4342 }
0x1029   : > { %v2462_v49 = vadd.f32 1.0, %v4343_v48  ;;  %v2463_v17 = vmul.f32 %v2459_v2, %v2431_v6 }
0x102a   : > { %v4345_v4 = vpop.eup %4344 }
0x102b   : > { %v2460_v9 = vadd.f32 1.0, %v4345_v4  ;;  %v2466_v3 = vmul.f32 %v2462_v49, %v2434_v5 }
0x102d   : > { %v2464_v19 = vmul.f32 %v2460_v9, %v2432_v8  ;;  %v2468_v28 = vpack.c.bf16 %v2466_v3, %v2465_v20  ;;  %v3997_v8 = vld [vmem:[%s789_s18] ss:$0 sm:$0xff] }
0x102f   : > { %v2467_v7 = vpack.c.bf16 %v2464_v19, %v2463_v17 }
0x1031   : > { %4211 = vmatprep.mubr.msk.bf16.mxu0 %vm2508_vm11, %v2467_v7 }
0x1032   : > { %4212 = vmatmul.mubr.msk.bf16.vlgmr.msra.gmra.mxu0 %vm2508_vm11, %v2468_v28 }
0x10f2   : > { %v4213_v11 = vpop.f32.mrf.mxu0 }
0x10f3   : > { %v2558_v26 = vadd.f32 %v4213_v11, %v3989_v25 }
0x10f4   : > { %v2549_v15 = vpop.f32.mrf.mxu0 }
0x10f5   : > { %v2550_v13 = vadd.f32 %v3989_v25, %v2549_v15  ;;  %v2566_v22 = vadd.f32 %v2558_v26, %v4983_v31 }
0x10f6   : > { %v4214_v27 = vpop.f32.mrf.mxu0 }
0x10f7   : > { %v2564_v33 = vadd.f32 %v2550_v13, %v4976_v29  ;;  %v2561_v18 = vadd.f32 %v4214_v27, %v3989_v25  ;;  %v2576_v39 = vsel %vm908_vm1, %v2566_v22, 0.0 }
0x10f8   : > { %v2552_v34 = vpop.f32.mrf.mxu0 }
0x10f9   : > { %v2553_v35 = vadd.f32 %v3989_v25, %v2552_v34  ;;  %v2570_v36 = vsel %vm908_vm1, %v2564_v33, 0.0  ;;  %v2567_v40 = vadd.f32 %v2561_v18, %v4985_v16 }
0x10fa   : > { %2571 = vadd.xlane.f32.xlu1 %v2570_v36 }
0x10fb   : > { %v2565_v23 = vadd.f32 %v2553_v35, %v4978_v30  ;;  %v2579_v29 = vsel %vm908_vm1, %v2567_v40, 0.0 }
0x10fd   : > { %v2573_v38 = vsel %vm908_vm1, %v2565_v23, 0.0 }
0x10fe   : > { %2574 = vadd.xlane.f32.xlu0 %v2573_v38  ;;  %2577 = vadd.xlane.f32.xlu1 %v2576_v39 }
0x1102   : > { %2580 = vadd.xlane.f32.xlu0 %v2579_v29 }
0x1183   : > { %v2572_v41 = vpop.xlane.xlu1 %2571 }
0x1184   : > { %v2582_v42 = vmul.f32 0.03125, %v2572_v41 }
0x1186   : > { %v2586_v43 = vsub.f32 %v2564_v33, %v2582_v42 }
0x1187   : > { %v2575_v45 = vpop.xlane.xlu0 %2574  ;;  %v2578_v46 = vpop.xlane.xlu1 %2577 }
0x1188   : > { %v2583_v31 = vmul.f32 0.03125, %v2575_v45  ;;  %v2584_v50 = vmul.f32 0.03125, %v2578_v46  ;;  %v2590_v51 = vmul.f32 %v2586_v43, %v2586_v43 }
0x118a   : > { %v2587_v30 = vsub.f32 %v2565_v23, %v2583_v31  ;;  %v2588_v53 = vsub.f32 %v2566_v22, %v2584_v50  ;;  %v2594_v55 = vsel %vm908_vm1, %v2590_v51, 0.0 }
0x118b   : > { %v2581_v56 = vpop.xlane.xlu0 %2580  ;;  %2595 = vadd.xlane.f32.xlu1 %v2594_v55 }
0x118c   : > { %v2585_v16 = vmul.f32 0.03125, %v2581_v56  ;;  %v2591_v57 = vmul.f32 %v2587_v30, %v2587_v30  ;;  %v2592_v58 = vmul.f32 %v2588_v53, %v2588_v53 }
0x118e   : > { %v2589_v59 = vsub.f32 %v2567_v40, %v2585_v16  ;;  %v2597_v60 = vsel %vm908_vm1, %v2591_v57, 0.0  ;;  %v2600_v61 = vsel %vm908_vm1, %v2592_v58, 0.0 }
0x118f   : > { %2598 = vadd.xlane.f32.xlu0 %v2597_v60  ;;  %2601 = vadd.xlane.f32.xlu1 %v2600_v61 }
0x1190   : > { %v2593_v62 = vmul.f32 %v2589_v59, %v2589_v59 }
0x1192   : > { %v2603_v12 = vsel %vm908_vm1, %v2593_v62, 0.0 }
0x1193   : > { %2604 = vadd.xlane.f32.xlu0 %v2603_v12 }
0x1214   : > { %v2596_v14 = vpop.xlane.xlu1 %2595 }
0x1215   : > { %v2606_v63 = vmul.f32 0.03125, %v2596_v14 }
0x1217   : > { %v2610_v0 = vadd.f32 1e-07, %v2606_v63 }
0x1218   : > { %v2599_v1 = vpop.xlane.xlu0 %2598  ;;  %v2602_v47 = vpop.xlane.xlu1 %2601 }
0x1219   : > { %4346 = vrsqrt.f32 %v2610_v0  ;;  %v2607_v52 = vmul.f32 0.03125, %v2599_v1  ;;  %v2608_v54 = vmul.f32 0.03125, %v2602_v47 }
0x121b   : > { %v2611_v44 = vadd.f32 1e-07, %v2607_v52  ;;  %v2612_v48 = vadd.f32 1e-07, %v2608_v54 }
0x121c   : > { %v2605_v49 = vpop.xlane.xlu0 %2604 }
0x121d   : > { %4348 = vrsqrt.f32 %v2611_v44  ;;  %v2609_v2 = vmul.f32 0.03125, %v2605_v49 }
0x121e   : > { %4350 = vrsqrt.f32 %v2612_v48 }
0x121f   : > { %v2613_v4 = vadd.f32 1e-07, %v2609_v2 }
0x1221   : > { %4352 = vrsqrt.f32 %v2613_v4 }
0x1226   : > { %v4347_v5 = vpop.eup %4346 }
0x1227   : > { %v2618_v6 = vmul.f32 %v4347_v5, %v2586_v43 }
0x1229   : > { %v2628_v9 = vmul.f32 %v3996_v37, %v2618_v6 }
0x122a   : > { %v4349_v10 = vpop.eup %4348 }
0x122b   : > { %v4351_v3 = vpop.eup %4350  ;;  %v2638_v17 = vadd.f32 %v3997_v8, %v2628_v9  ;;  %v2619_v19 = vmul.f32 %v4349_v10, %v2587_v30 }
0x122c   : > { %v2620_v20 = vmul.f32 %v4351_v3, %v2588_v53 }
0x122d   : > { %2642 = vst.msk [vmem:[#allocation2] sm:$0xff] %vm908_vm1, %v2638_v17  ;;  %v2629_v7 = vmul.f32 %v3996_v37, %v2619_v19 }
0x122e   : > { %v4353_v28 = vpop.eup %4352  ;;  %v2630_v11 = vmul.f32 %v3996_v37, %v2620_v20 }
0x122f   : > { %v2639_v25 = vadd.f32 %v3997_v8, %v2629_v7  ;;  %v2621_v15 = vmul.f32 %v4353_v28, %v2589_v59 }
0x1230   : > { %v2640_v26 = vadd.f32 %v3997_v8, %v2630_v11 }
0x1231   : > { %2643 = vst.msk [vmem:[#allocation2 + $0x8] sm:$0xff] %vm908_vm1, %v2639_v25  ;;  %v2631_v13 = vmul.f32 %v3996_v37, %v2621_v15  ;;  %2649 = sbr.rel (%p3998_p5) target bundleno = 5311 (0x14bf), region = 108 }
0x1232   : > { %2644 = vst.msk [vmem:[#allocation2 + $0x10] sm:$0xff] %vm908_vm1, %v2640_v26 }
0x1233   : > { %v2641_v27 = vadd.f32 %v3997_v8, %v2631_v13 }
0x1235   : > { %2645 = vst.msk [vmem:[#allocation2 + $0x18] sm:$0xff] %vm908_vm1, %v2641_v27 }
0x1236   : > { %v3999_v33 = vld [vmem:[%s5654_s27] ss:$0 sm:$0xff]  ;;  %v4475_v22 = vmov 0   ;;  %v5046_v43 = vsub.s32 1, %v4721_v24  ;;  %v5104_v6 = vand.u32 127, %v1077_v21  ;;  %vm3068_vm13 = vcmask 130112  }
0x1237   : > { %v2659_v34 = vmul.f32 %v3999_v33, %v2640_v26  ;;  %v2657_v18 = vmul.f32 %v3999_v33, %v2638_v17  ;;  %v2660_v35 = vmul.f32 %v3999_v33, %v2641_v27  ;;  %v2658_v36 = vmul.f32 %v3999_v33, %v2639_v25  ;;  %4358 = vset.pattern.permute.xlu0 %v4475_v22  ;;  %v5041_v29 = vld [vmem:[%s5655_s0] sm:$0x3] }
0x1238   : > { %4359 = vset.pattern.permute.xlu1 %v4475_v22  ;;  %v2694_v41 = vrot.slane %v5041_v29, %v4725_v32  ;;  %v4000_v42 = vld [vmem:[#allocation3] ss:$0 sm:$0xff]  ;;  %v2761_v45 = vrot.slane %v5041_v29, %v5046_v43  ;;  %v3063_v8 = vadd.s32 4294967288, %v5104_v6  ;;  %v5115_v19 = vsub.s32 %v5104_v6, %v4721_v24 }
0x1239   : > { %v2667_v23 = vsel %vm908_vm1, %v2659_v34, 0.0  ;;  %v2661_v38 = vsel %vm908_vm1, %v2657_v18, 0.0  ;;  %v2670_v39 = vsel %vm908_vm1, %v2660_v35, 0.0  ;;  %v2664_v40 = vsel %vm908_vm1, %v2658_v36, 0.0  ;;  %v5053_v46 = vld [vmem:[%s5656_s20] sm:$0x3] }
0x123a   : > { %2668 = vadd.xlane.f32.xlu1 %v2667_v23  ;;  %2662 = vadd.xlane.f32.xlu0 %v2661_v38  ;;  %v2860_v31 = vrot.slane %v5053_v46, %v4725_v32  ;;  %v2927_v50 = vrot.slane %v5053_v46, %v5046_v43  ;;  %v5118_v20 = vsub.s32 %v3063_v8, %v4721_v24 }
0x123e   : > { %2671 = vadd.xlane.f32.xlu1 %v2670_v39  ;;  %2665 = vadd.xlane.f32.xlu0 %v2664_v40 }
0x124f   : > { %2696 = vbcast.lane.b32.xlu1 %v2694_v41, 256 }
0x1253   : > { %2700 = vbcast.lane.b32.xlu1 %v2694_v41, 264 }
0x1254   : > { %2680 = vperm.xlu0 %4358, %v4000_v42  }
0x1257   : > { %2704 = vbcast.lane.b32.xlu1 %v2694_v41, 272 }
0x1258   : > { %2728 = vbcast.lane.b32.xlu0 %v2694_v41, 320 }
0x125b   : > { %2708 = vbcast.lane.b32.xlu1 %v2694_v41, 280 }
0x125c   : > { %2736 = vbcast.lane.b32.xlu0 %v2694_v41, 336 }
0x125f   : > { %2712 = vbcast.lane.b32.xlu1 %v2694_v41, 288 }
0x1260   : > { %2744 = vbcast.lane.b32.xlu0 %v2694_v41, 352 }
0x1263   : > { %2716 = vbcast.lane.b32.xlu1 %v2694_v41, 296 }
0x1264   : > { %2752 = vbcast.lane.b32.xlu0 %v2694_v41, 368 }
0x1267   : > { %2720 = vbcast.lane.b32.xlu1 %v2694_v41, 304 }
0x1268   : > { %2763 = vbcast.lane.b32.xlu0 %v2761_v45, 256 }
0x126b   : > { %2724 = vbcast.lane.b32.xlu1 %v2694_v41, 312 }
0x126c   : > { %2771 = vbcast.lane.b32.xlu0 %v2761_v45, 272 }
0x126f   : > { %2732 = vbcast.lane.b32.xlu1 %v2694_v41, 328 }
0x1270   : > { %2779 = vbcast.lane.b32.xlu0 %v2761_v45, 288 }
0x1273   : > { %2740 = vbcast.lane.b32.xlu1 %v2694_v41, 344 }
0x1274   : > { %2787 = vbcast.lane.b32.xlu0 %v2761_v45, 304 }
0x1277   : > { %2748 = vbcast.lane.b32.xlu1 %v2694_v41, 360 }
0x1278   : > { %2795 = vbcast.lane.b32.xlu0 %v2761_v45, 320 }
0x127b   : > { %2756 = vbcast.lane.b32.xlu1 %v2694_v41, 376 }
0x127c   : > { %2803 = vbcast.lane.b32.xlu0 %v2761_v45, 336 }
0x127f   : > { %2767 = vbcast.lane.b32.xlu1 %v2761_v45, 264 }
0x1280   : > { %2811 = vbcast.lane.b32.xlu0 %v2761_v45, 352 }
0x1283   : > { %2775 = vbcast.lane.b32.xlu1 %v2761_v45, 280 }
0x1284   : > { %2819 = vbcast.lane.b32.xlu0 %v2761_v45, 368 }
0x1287   : > { %2783 = vbcast.lane.b32.xlu1 %v2761_v45, 296 }
0x1288   : > { %2862 = vbcast.lane.b32.xlu0 %v2860_v31, 256 }
0x128b   : > { %2791 = vbcast.lane.b32.xlu1 %v2761_v45, 312 }
0x128c   : > { %2870 = vbcast.lane.b32.xlu0 %v2860_v31, 272 }
0x128f   : > { %2799 = vbcast.lane.b32.xlu1 %v2761_v45, 328 }
0x1290   : > { %2878 = vbcast.lane.b32.xlu0 %v2860_v31, 288 }
0x1293   : > { %2807 = vbcast.lane.b32.xlu1 %v2761_v45, 344 }
0x1294   : > { %2886 = vbcast.lane.b32.xlu0 %v2860_v31, 304 }
0x1297   : > { %2815 = vbcast.lane.b32.xlu1 %v2761_v45, 360 }
0x1298   : > { %2894 = vbcast.lane.b32.xlu0 %v2860_v31, 320 }
0x129b   : > { %2823 = vbcast.lane.b32.xlu1 %v2761_v45, 376 }
0x129c   : > { %2902 = vbcast.lane.b32.xlu0 %v2860_v31, 336 }
0x129f   : > { %2866 = vbcast.lane.b32.xlu1 %v2860_v31, 264 }
0x12a0   : > { %2910 = vbcast.lane.b32.xlu0 %v2860_v31, 352 }
0x12a3   : > { %2874 = vbcast.lane.b32.xlu1 %v2860_v31, 280 }
0x12a4   : > { %2918 = vbcast.lane.b32.xlu0 %v2860_v31, 368 }
0x12a7   : > { %2882 = vbcast.lane.b32.xlu1 %v2860_v31, 296 }
0x12a8   : > { %2929 = vbcast.lane.b32.xlu0 %v2927_v50, 256 }
0x12ab   : > { %2890 = vbcast.lane.b32.xlu1 %v2860_v31, 312 }
0x12ac   : > { %2937 = vbcast.lane.b32.xlu0 %v2927_v50, 272 }
0x12af   : > { %2898 = vbcast.lane.b32.xlu1 %v2860_v31, 328 }
0x12b0   : > { %2945 = vbcast.lane.b32.xlu0 %v2927_v50, 288 }
0x12b3   : > { %2906 = vbcast.lane.b32.xlu1 %v2860_v31, 344 }
0x12b4   : > { %2953 = vbcast.lane.b32.xlu0 %v2927_v50, 304 }
0x12b7   : > { %2914 = vbcast.lane.b32.xlu1 %v2860_v31, 360 }
0x12b8   : > { %2961 = vbcast.lane.b32.xlu0 %v2927_v50, 320 }
0x12bb   : > { %2922 = vbcast.lane.b32.xlu1 %v2860_v31, 376 }
0x12bc   : > { %2969 = vbcast.lane.b32.xlu0 %v2927_v50, 336 }
0x12bf   : > { %2933 = vbcast.lane.b32.xlu1 %v2927_v50, 264 }
0x12c0   : > { %2977 = vbcast.lane.b32.xlu0 %v2927_v50, 352 }
0x12c3   : > { %v5059_v51 = vpop.xlane.xlu1 %2668  ;;  %v2663_v30 = vpop.xlane.xlu0 %2662  ;;  %2941 = vbcast.lane.b32.xlu1 %v2927_v50, 280 }
0x12c4   : > { %2985 = vbcast.lane.b32.xlu0 %v2927_v50, 368 }
0x12c7   : > { %v5061_v53 = vpop.xlane.xlu1 %2671  ;;  %2949 = vbcast.lane.b32.xlu1 %v2927_v50, 296  ;;  %v2666_v55 = vpop.xlane.xlu0 %2665 }
0x12cb   : > { %v2697_v56 = vpop.permute.xlu1 %2696  ;;  %2957 = vbcast.lane.b32.xlu1 %v2927_v50, 312 }
0x12cc   : > { %vm2825_vm12 = vcmp.ge.s32.totalorder %v5104_v6, %v2697_v56 }
0x12cf   : > { %v5063_v16 = vpop.permute.xlu1 %2700  ;;  %v5065_v57 = vpop.permute.xlu0 %2680  ;;  %2965 = vbcast.lane.b32.xlu1 %v2927_v50, 328 }
0x12d0   : > { %v2683_v3 = vadd.f32 %v5065_v57, %v2663_v30  ;;  %v2684_v17 = vadd.f32 %v5065_v57, %v2666_v55  ;;  %vm2826_vm5 = vcmp.ge.s32.totalorder %v5104_v6, %v5063_v16 }
0x12d2   : > { %v3062_v28 = vrot.slane %v2683_v3, %v5115_v19  ;;  %v3067_v11 = vrot.slane %v2684_v17, %v5118_v20 }
0x12d3   : > { %v2705_v58 = vpop.permute.xlu1 %2704  ;;  %v5067_v59 = vpop.permute.xlu0 %2728  ;;  %2973 = vbcast.lane.b32.xlu1 %v2927_v50, 344 }
0x12d4   : > { %v5131_v26 = vsel %vm3068_vm13, %v3067_v11, %v3062_v28  ;;  %vm2827_vm0 = vcmp.ge.s32.totalorder %v5104_v6, %v2705_v58 }
0x12d7   : > { %v5069_v60 = vpop.permute.xlu1 %2708  ;;  %v5071_v61 = vpop.permute.xlu0 %2736  ;;  %2981 = vbcast.lane.b32.xlu1 %v2927_v50, 360 }
0x12db   : > { %v2713_v62 = vpop.permute.xlu1 %2712  ;;  %v5073_v12 = vpop.permute.xlu0 %2744  ;;  %2989 = vbcast.lane.b32.xlu1 %v2927_v50, 376 }
0x12dc   : > { %vm2829_vm4 = vcmp.ge.s32.totalorder %v5104_v6, %v2713_v62 }
0x12df   : > { %v5075_v14 = vpop.permute.xlu1 %2716  ;;  %v5077_v63 = vpop.permute.xlu0 %2752 }
0x12e3   : > { %v5079_v0 = vpop.permute.xlu1 %2720  ;;  %v5081_v1 = vpop.permute.xlu0 %2763 }
0x12e4   : > { %vm2831_vm11 = vcmp.ge.s32.totalorder %v5104_v6, %v5079_v0 }
0x12e7   : > { %v5083_v47 = vpop.permute.xlu1 %2724  ;;  %v5085_v52 = vpop.permute.xlu0 %2771 }
0x12eb   : > { %v5087_v54 = vpop.permute.xlu1 %2732  ;;  %v5089_v44 = vpop.permute.xlu0 %2779 }
0x12ef   : > { %v5091_v48 = vpop.permute.xlu1 %2740  ;;  %v5093_v49 = vpop.permute.xlu0 %2787 }
0x12f3   : > { %v5095_v2 = vpop.permute.xlu1 %2748  ;;  %v5097_v4 = vpop.permute.xlu0 %2795 }
0x12f7   : > { %v5099_v5 = vpop.permute.xlu1 %2756  ;;  %v5101_v37 = vpop.permute.xlu0 %2803 }
0x12fb   : > { %v5107_v9 = vpop.permute.xlu1 %2767  ;;  %v5109_v10 = vpop.permute.xlu0 %2811 }
0x12ff   : > { %v5120_v7 = vpop.permute.xlu1 %2775  ;;  %v5122_v21 = vpop.permute.xlu0 %2819 }
0x1303   : > { %v5126_v25 = vpop.permute.xlu1 %2783  ;;  %v2863_v15 = vpop.permute.xlu0 %2862 }
0x1304   : > { %vm2991_vm14 = vcmp.lt.s32.totalorder %v5104_v6, %v2863_v15 }
0x1305   : > { %vm3023_vm15 = vmand %vm2825_vm12, %vm2991_vm14  ;;  %vm2828_vm12 = vcmp.ge.s32.totalorder %v5104_v6, %v5069_v60 }
0x1306   : > { %v3100_v13 = vsel %vm3023_vm15, %v5131_v26, 0.0 }
0x1307   : > { %v5134_v27 = vpop.permute.xlu1 %2791  ;;  %v2871_v33 = vpop.permute.xlu0 %2870  ;;  %v3132_v34 = vsel %vm1114_vm8, %v3100_v13, 0.0 }
0x1308   : > { %vm2993_vm1 = vcmp.lt.s32.totalorder %v5104_v6, %v2871_v33  ;;  %3133 = vadd.xlane.f32.xlu0 %v3132_v34 }
0x1309   : > { %vm3025_vm2 = vmand %vm2827_vm0, %vm2993_vm1 }
0x130a   : > { %v3102_v18 = vsel %vm3025_vm2, %v5131_v26, 0.0  ;;  %vm2833_vm2 = vcmp.ge.s32.totalorder %v5104_v6, %v5067_v59 }
0x130b   : > { %v5140_v35 = vpop.permute.xlu1 %2799  ;;  %v2879_v36 = vpop.permute.xlu0 %2878  ;;  %v3138_v22 = vsel %vm1114_vm8, %v3102_v18, 0.0 }
0x130c   : > { %3139 = vadd.xlane.f32.xlu0 %v3138_v22  ;;  %vm2995_vm3 = vcmp.lt.s32.totalorder %v5104_v6, %v2879_v36 }
0x130d   : > { %vm5154_vm7 = vmand %vm2829_vm4, %vm2995_vm3  ;;  %vm2830_vm3 = vcmp.ge.s32.totalorder %v5104_v6, %v5075_v14 }
0x130e   : > { %v3104_v16 = vsel %vm5154_vm7, %v5131_v26, 0.0 }
0x130f   : > { %v5143_v23 = vpop.permute.xlu1 %2807  ;;  %v2887_v38 = vpop.permute.xlu0 %2886  ;;  %v3144_v17 = vsel %vm1114_vm8, %v3104_v16, 0.0 }
0x1310   : > { %vm2997_vm9 = vcmp.lt.s32.totalorder %v5104_v6, %v2887_v38 }
0x1311   : > { %vm5171_vm15 = vmand %vm2831_vm11, %vm2997_vm9  ;;  %vm2835_vm9 = vcmp.ge.s32.totalorder %v5104_v6, %v5071_v61 }
0x1312   : > { %v3106_v28 = vsel %vm5171_vm15, %v5131_v26, 0.0 }
0x1313   : > { %v5145_v39 = vpop.permute.xlu1 %2815  ;;  %v2895_v40 = vpop.permute.xlu0 %2894  ;;  %v3150_v33 = vsel %vm1114_vm8, %v3106_v28, 0.0 }
0x1314   : > { %vm2999_vm0 = vcmp.lt.s32.totalorder %v5104_v6, %v2895_v40 }
0x1317   : > { %v5147_v41 = vpop.permute.xlu1 %2823  ;;  %v2903_v42 = vpop.permute.xlu0 %2902 }
0x131b   : > { %v2867_v45 = vpop.permute.xlu1 %2866  ;;  %v2911_v31 = vpop.permute.xlu0 %2910 }
0x131c   : > { %vm2992_vm6 = vcmp.lt.s32.totalorder %v5104_v6, %v2867_v45  ;;  %v2686_v45 = vadd.f32 %v5065_v57, %v5061_v53 }
0x131d   : > { %vm3024_vm10 = vmand %vm2826_vm5, %vm2992_vm6  ;;  %vm3001_vm6 = vcmp.lt.s32.totalorder %v5104_v6, %v2903_v42 }
0x131e   : > { %v3101_v30 = vsel %vm3024_vm10, %v5131_v26, 0.0  ;;  %vm5189_vm5 = vmand %vm2833_vm2, %vm2999_vm0  ;;  %vm2832_vm10 = vcmp.ge.s32.totalorder %v5104_v6, %v5083_v47  ;;  %vm2837_vm0 = vcmp.ge.s32.totalorder %v5104_v6, %v5073_v12 }
0x131f   : > { %v2875_v55 = vpop.permute.xlu1 %2874  ;;  %v5162_v56 = vpop.permute.xlu0 %2918  ;;  %v3135_v58 = vsel %vm1114_vm8, %v3101_v30, 0.0  ;;  %v3108_v34 = vsel %vm5189_vm5, %v5131_v26, 0.0 }
0x1320   : > { %vm2994_vm14 = vcmp.lt.s32.totalorder %v5104_v6, %v2875_v55  ;;  %3136 = vadd.xlane.f32.xlu1 %v3135_v58  ;;  %v3156_v22 = vsel %vm1114_vm8, %v3108_v34, 0.0  ;;  %v3077_v55 = vrot.slane %v2686_v45, %v5118_v20 }
0x1321   : > { %vm3026_vm1 = vmand %vm2828_vm12, %vm2994_vm14  ;;  %vm3003_vm14 = vcmp.lt.s32.totalorder %v5104_v6, %v2911_v31 }
0x1322   : > { %v3103_v0 = vsel %vm3026_vm1, %v5131_v26, 0.0  ;;  %vm5207_vm12 = vmand %vm2835_vm9, %vm3001_vm6  ;;  %vm2834_vm1 = vcmp.ge.s32.totalorder %v5104_v6, %v5087_v54  ;;  %v2685_v54 = vadd.f32 %v5065_v57, %v5059_v51  ;;  %vm2839_vm6 = vcmp.ge.s32.totalorder %v5104_v6, %v5077_v63 }
0x1323   : > { %v2883_v60 = vpop.permute.xlu1 %2882  ;;  %v5179_v8 = vpop.permute.xlu0 %2929  ;;  %v3141_v3 = vsel %vm1114_vm8, %v3103_v0, 0.0  ;;  %v3110_v40 = vsel %vm5207_vm12, %v5131_v26, 0.0 }
0x1324   : > { %vm2996_vm4 = vcmp.lt.s32.totalorder %v5104_v6, %v2883_v60  ;;  %3142 = vadd.xlane.f32.xlu0 %v3141_v3  ;;  %3145 = vadd.xlane.f32.xlu1 %v3144_v17  ;;  %v3162_v30 = vsel %vm1114_vm8, %v3110_v40, 0.0  ;;  %vm3007_vm12 = vcmp.lt.s32.totalorder %v5104_v6, %v5179_v8 }
0x1325   : > { %vm3028_vm7 = vmand %vm2830_vm3, %vm2996_vm4  ;;  %vm3005_vm4 = vcmp.lt.s32.totalorder %v5104_v6, %v5162_v56 }
0x1326   : > { %v3105_v11 = vsel %vm3028_vm7, %v5131_v26, 0.0  ;;  %vm5225_vm3 = vmand %vm2837_vm0, %vm3003_vm14  ;;  %vm2836_vm7 = vcmp.ge.s32.totalorder %v5104_v6, %v5091_v48  ;;  %v3073_v48 = vrot.slane %v2685_v54, %v5115_v19  ;;  %vm2841_vm14 = vcmp.ge.s32.totalorder %v5104_v6, %v5081_v1 }
0x1327   : > { %v2891_v14 = vpop.permute.xlu1 %2890  ;;  %v5197_v15 = vpop.permute.xlu0 %2937  ;;  %v3147_v13 = vsel %vm1114_vm8, %v3105_v11, 0.0  ;;  %v3112_v51 = vsel %vm5225_vm3, %v5131_v26, 0.0  ;;  %vm2838_vm0 = vcmp.ge.s32.totalorder %v5104_v6, %v5095_v2 }
0x1328   : > { %vm2998_vm11 = vcmp.lt.s32.totalorder %v5104_v6, %v2891_v14  ;;  %3148 = vadd.xlane.f32.xlu0 %v3147_v13  ;;  %3151 = vadd.xlane.f32.xlu1 %v3150_v33  ;;  %v3168_v16 = vsel %vm1114_vm8, %v3112_v51, 0.0  ;;  %v5272_v1 = vsel %vm3068_vm13, %v3077_v55, %v3073_v48 }
0x1329   : > { %vm3030_vm15 = vmand %vm2832_vm10, %vm2998_vm11 }
0x132a   : > { %v3107_v18 = vsel %vm3030_vm15, %v5131_v26, 0.0  ;;  %vm5246_vm10 = vmand %vm2839_vm6, %vm3005_vm4  ;;  %vm2843_vm4 = vcmp.ge.s32.totalorder %v5104_v6, %v5085_v52  ;;  %vm2840_vm6 = vcmp.ge.s32.totalorder %v5104_v6, %v5099_v5 }
0x132b   : > { %v2899_v47 = vpop.permute.xlu1 %2898  ;;  %v3153_v36 = vsel %vm1114_vm8, %v3107_v18, 0.0  ;;  %v5220_v38 = vpop.permute.xlu0 %2945  ;;  %v3114_v62 = vsel %vm5246_vm10, %v5131_v26, 0.0 }
0x132c   : > { %vm3000_vm2 = vcmp.lt.s32.totalorder %v5104_v6, %v2899_v47  ;;  %3154 = vadd.xlane.f32.xlu0 %v3153_v36  ;;  %3157 = vadd.xlane.f32.xlu1 %v3156_v22  ;;  %v3174_v3 = vsel %vm1114_vm8, %v3114_v62, 0.0 }
0x132d   : > { %vm3032_vm5 = vmand %vm2834_vm1, %vm3000_vm2  ;;  %vm3009_vm2 = vcmp.lt.s32.totalorder %v5104_v6, %v5197_v15 }
0x132e   : > { %v3109_v42 = vsel %vm3032_vm5, %v5131_v26, 0.0  ;;  %vm5265_vm1 = vmand %vm2841_vm14, %vm3007_vm12  ;;  %vm2842_vm14 = vcmp.ge.s32.totalorder %v5104_v6, %v5107_v9 }
0x132f   : > { %v2907_v31 = vpop.permute.xlu1 %2906  ;;  %v3159_v50 = vsel %vm1114_vm8, %v3109_v42, 0.0  ;;  %v2954_v57 = vpop.permute.xlu0 %2953  ;;  %v3116_v28 = vsel %vm5265_vm1, %v5272_v1, 0.0 }
0x1330   : > { %vm3002_vm9 = vcmp.lt.s32.totalorder %v5104_v6, %v2907_v31  ;;  %3160 = vadd.xlane.f32.xlu0 %v3159_v50  ;;  %3163 = vadd.xlane.f32.xlu1 %v3162_v30  ;;  %v3180_v14 = vsel %vm1114_vm8, %v3116_v28, 0.0 }
0x1331   : > { %vm3034_vm11 = vmand %vm2836_vm7, %vm3002_vm9  ;;  %vm3011_vm9 = vcmp.lt.s32.totalorder %v5104_v6, %v5220_v38 }
0x1332   : > { %v3111_v63 = vsel %vm3034_vm11, %v5131_v26, 0.0  ;;  %vm5285_vm7 = vmand %vm2843_vm4, %vm3009_vm2  ;;  %vm2845_vm11 = vcmp.ge.s32.totalorder %v5104_v6, %v5089_v44  ;;  %vm2847_vm2 = vcmp.ge.s32.totalorder %v5104_v6, %v5093_v49  ;;  %vm2844_vm4 = vcmp.ge.s32.totalorder %v5104_v6, %v5120_v7 }
0x1333   : > { %v2915_v56 = vpop.permute.xlu1 %2914  ;;  %v3165_v58 = vsel %vm1114_vm8, %v3111_v63, 0.0  ;;  %v2962_v2 = vpop.permute.xlu0 %2961  ;;  %v3118_v15 = vsel %vm5285_vm7, %v5272_v1, 0.0 }
0x1334   : > { %vm3004_vm15 = vcmp.lt.s32.totalorder %v5104_v6, %v2915_v56  ;;  %3166 = vadd.xlane.f32.xlu0 %v3165_v58  ;;  %3169 = vadd.xlane.f32.xlu1 %v3168_v16  ;;  %v3186_v34 = vsel %vm1114_vm8, %v3118_v15, 0.0 }
0x1335   : > { %vm3036_vm3 = vmand %vm2838_vm0, %vm3004_vm15  ;;  %vm3013_vm0 = vcmp.lt.s32.totalorder %v5104_v6, %v2954_v57 }
0x1336   : > { %v3113_v8 = vsel %vm3036_vm3, %v5131_v26, 0.0  ;;  %vm5302_vm15 = vmand %vm2845_vm11, %vm3011_vm9  ;;  %vm2849_vm9 = vcmp.ge.s32.totalorder %v5104_v6, %v5097_v4 }
0x1337   : > { %v2923_v60 = vpop.permute.xlu1 %2922  ;;  %v3171_v17 = vsel %vm1114_vm8, %v3113_v8, 0.0  ;;  %v2970_v44 = vpop.permute.xlu0 %2969  ;;  %v3120_v61 = vsel %vm5302_vm15, %v5272_v1, 0.0 }
0x1338   : > { %vm3006_vm5 = vcmp.lt.s32.totalorder %v5104_v6, %v2923_v60  ;;  %3175 = vadd.xlane.f32.xlu1 %v3174_v3  ;;  %3172 = vadd.xlane.f32.xlu0 %v3171_v17  ;;  %v3192_v36 = vsel %vm1114_vm8, %v3120_v61, 0.0  ;;  %v3228_v3 = vsub.s32 %v5053_v46, %v5041_v29 }
0x1339   : > { %vm3038_vm10 = vmand %vm2840_vm6, %vm3006_vm5  ;;  %vm3015_vm5 = vcmp.lt.s32.totalorder %v5104_v6, %v2962_v2 }
0x133a   : > { %v3115_v11 = vsel %vm3038_vm10, %v5131_v26, 0.0  ;;  %vm5319_vm6 = vmand %vm2847_vm2, %vm3013_vm0  ;;  %vm2846_vm10 = vcmp.ge.s32.totalorder %v5104_v6, %v5126_v25  ;;  %vm2851_vm0 = vcmp.ge.s32.totalorder %v5104_v6, %v5101_v37 }
0x133b   : > { %v2934_v52 = vpop.permute.xlu1 %2933  ;;  %v3177_v5 = vsel %vm1114_vm8, %v3115_v11, 0.0  ;;  %vm5329_vm11 = vmand %vm2849_vm9, %vm3015_vm5  ;;  %v2978_v22 = vpop.permute.xlu0 %2977  ;;  %v3122_v4 = vsel %vm5319_vm6, %v5272_v1, 0.0  ;;  %vm2853_vm6 = vcmp.ge.s32.totalorder %v5104_v6, %v5109_v10 }
0x133c   : > { %vm3008_vm12 = vcmp.lt.s32.totalorder %v5104_v6, %v2934_v52  ;;  %3181 = vadd.xlane.f32.xlu1 %v3180_v14  ;;  %3178 = vadd.xlane.f32.xlu0 %v3177_v5  ;;  %v3198_v54 = vsel %vm1114_vm8, %v3122_v4, 0.0  ;;  %v3124_v45 = vsel %vm5329_vm11, %v5272_v1, 0.0 }
0x133d   : > { %vm3040_vm1 = vmand %vm2842_vm14, %vm3008_vm12  ;;  %vm3017_vm14 = vcmp.lt.s32.totalorder %v5104_v6, %v2970_v44  ;;  %v3204_v30 = vsel %vm1114_vm8, %v3124_v45, 0.0 }
0x133e   : > { %v3117_v33 = vsel %vm3040_vm1, %v5272_v1, 0.0  ;;  %vm2848_vm1 = vcmp.ge.s32.totalorder %v5104_v6, %v5134_v27  ;;  %vm5346_vm2 = vmand %vm2851_vm0, %vm3017_vm14  ;;  %vm2855_vm14 = vcmp.ge.s32.totalorder %v5104_v6, %v5122_v21 }
0x133f   : > { %v2942_v13 = vpop.permute.xlu1 %2941  ;;  %v3183_v9 = vsel %vm1114_vm8, %v3117_v33, 0.0  ;;  %v2986_v37 = vpop.permute.xlu0 %2985  ;;  %v3126_v53 = vsel %vm5346_vm2, %v5272_v1, 0.0 }
0x1340   : > { %vm3010_vm3 = vcmp.lt.s32.totalorder %v5104_v6, %v2942_v13  ;;  %3187 = vadd.xlane.f32.xlu1 %v3186_v34  ;;  %3184 = vadd.xlane.f32.xlu0 %v3183_v9  ;;  %vm3021_vm11 = vcmp.lt.s32.totalorder %v5104_v6, %v2986_v37  ;;  %v3210_v63 = vsel %vm1114_vm8, %v3126_v53, 0.0 }
0x1341   : > { %vm3042_vm7 = vmand %vm2844_vm4, %vm3010_vm3  ;;  %vm3019_vm4 = vcmp.lt.s32.totalorder %v5104_v6, %v2978_v22 }
0x1342   : > { %v3119_v47 = vsel %vm3042_vm7, %v5272_v1, 0.0  ;;  %vm2850_vm7 = vcmp.ge.s32.totalorder %v5104_v6, %v5140_v35  ;;  %vm5362_vm9 = vmand %vm2853_vm6, %vm3019_vm4  ;;  %vm2856_vm6 = vcmp.ge.s32.totalorder %v5104_v6, %v5147_v41 }
0x1343   : > { %v2950_v49 = vpop.permute.xlu1 %2949  ;;  %v3189_v38 = vsel %vm1114_vm8, %v3119_v47, 0.0  ;;  %vm5378_vm0 = vmand %vm2855_vm14, %vm3021_vm11  ;;  %v3128_v55 = vsel %vm5362_vm9, %v5272_v1, 0.0  ;;  %vm3612_vm11 = vcmask 261312   ;;  %vm3633_vm14 = vcmask 458112  }
0x1344   : > { %vm3012_vm12 = vcmp.lt.s32.totalorder %v5104_v6, %v2950_v49  ;;  %3193 = vadd.xlane.f32.xlu1 %v3192_v36  ;;  %3190 = vadd.xlane.f32.xlu0 %v3189_v38  ;;  %v3130_v16 = vsel %vm5378_vm0, %v5272_v1, 0.0  ;;  %vm3647_vm0 = vcmask 589312  }
0x1345   : > { %vm3044_vm15 = vmand %vm2846_vm10, %vm3012_vm12  ;;  %v3222_v8 = vsel %vm1114_vm8, %v3130_v16, 0.0 }
0x1346   : > { %v3121_v25 = vsel %vm3044_vm15, %v5272_v1, 0.0  ;;  %vm2852_vm15 = vcmp.ge.s32.totalorder %v5104_v6, %v5143_v23  ;;  %v3216_v23 = vsel %vm1114_vm8, %v3128_v55, 0.0 }
0x1347   : > { %v2958_v40 = vpop.permute.xlu1 %2957  ;;  %v3195_v12 = vsel %vm1114_vm8, %v3121_v25, 0.0 }
0x1348   : > { %vm3014_vm3 = vcmp.lt.s32.totalorder %v5104_v6, %v2958_v40  ;;  %3199 = vadd.xlane.f32.xlu1 %v3198_v54  ;;  %3196 = vadd.xlane.f32.xlu0 %v3195_v12 }
0x1349   : > { %vm3046_vm5 = vmand %vm2848_vm1, %vm3014_vm3  ;;  %vm2854_vm3 = vcmp.ge.s32.totalorder %v5104_v6, %v5145_v39 }
0x134a   : > { %v3123_v31 = vsel %vm3046_vm5, %v5272_v1, 0.0 }
0x134b   : > { %v2966_v27 = vpop.permute.xlu1 %2965  ;;  %v3201_v50 = vsel %vm1114_vm8, %v3123_v31, 0.0 }
0x134c   : > { %vm3016_vm10 = vcmp.lt.s32.totalorder %v5104_v6, %v2966_v27  ;;  %3205 = vadd.xlane.f32.xlu1 %v3204_v30  ;;  %3202 = vadd.xlane.f32.xlu0 %v3201_v50 }
0x134d   : > { %vm3048_vm12 = vmand %vm2850_vm7, %vm3016_vm10  ;;  %vm3229_vm10 = vcmp.gt.s32.totalorder %v3228_v3, 1 }
0x134e   : > { %v3125_v10 = vsel %vm3048_vm12, %v5272_v1, 0.0  ;;  %v3230_v17 = vsel %vm3229_vm10, %v3228_v3, 1  ;;  %vm3619_vm12 = vcmask 326912  }
0x134f   : > { %v2974_v35 = vpop.permute.xlu1 %2973  ;;  %v3207_v57 = vsel %vm1114_vm8, %v3125_v10, 0.0  ;;  %v3231_v28 = vcvt.s32.f32 %v3230_v17 }
0x1350   : > { %vm3018_vm1 = vcmp.lt.s32.totalorder %v5104_v6, %v2974_v35  ;;  %3211 = vadd.xlane.f32.xlu1 %v3210_v63  ;;  %3208 = vadd.xlane.f32.xlu0 %v3207_v57 }
0x1351   : > { %vm3050_vm2 = vmand %vm2852_vm15, %vm3018_vm1  ;;  %v3236_v59 = vrot.slane %v3231_v28, %v4725_v32  ;;  %v3303_v29 = vrot.slane %v3231_v28, %v5046_v43  ;;  %vm3640_vm15 = vcmask 523712   ;;  %vm3654_vm1 = vcmask 654912  }
0x1352   : > { %v3127_v21 = vsel %vm3050_vm2, %v5272_v1, 0.0  ;;  %vm3661_vm2 = vcmask 720512  }
0x1353   : > { %v2982_v56 = vpop.permute.xlu1 %2981  ;;  %v3213_v58 = vsel %vm1114_vm8, %v3127_v21, 0.0 }
0x1354   : > { %vm3020_vm4 = vcmp.lt.s32.totalorder %v5104_v6, %v2982_v56  ;;  %3217 = vadd.xlane.f32.xlu1 %v3216_v23  ;;  %3214 = vadd.xlane.f32.xlu0 %v3213_v58 }
0x1355   : > { %vm3052_vm5 = vmand %vm2854_vm3, %vm3020_vm4  ;;  %vm3668_vm3 = vcmask 786112   ;;  %vm3675_vm4 = vcmask 851712  }
0x1356   : > { %v3129_v62 = vsel %vm3052_vm5, %v5272_v1, 0.0  ;;  %vm3682_vm5 = vcmask 917312  }
0x1357   : > { %v2990_v0 = vpop.permute.xlu1 %2989  ;;  %v3219_v60 = vsel %vm1114_vm8, %v3129_v62, 0.0 }
0x1358   : > { %vm3022_vm7 = vcmp.lt.s32.totalorder %v5104_v6, %v2990_v0  ;;  %3223 = vadd.xlane.f32.xlu1 %v3222_v8  ;;  %3220 = vadd.xlane.f32.xlu0 %v3219_v60 }
0x1359   : > { %vm3054_vm9 = vmand %vm2856_vm6, %vm3022_vm7  ;;  %vm3689_vm6 = vcmask 982912   ;;  %vm3696_vm7 = vcmask 1048512  }
0x135a   : > { %v3131_v39 = vsel %vm3054_vm9, %v5272_v1, 0.0  ;;  %vm3079_vm9 = vcmask 1041409  }
0x135b   : > { %v3225_v2 = vsel %vm1114_vm8, %v3131_v39, 0.0  ;;  %vm3605_vm8 = vcmask 195712  }
0x135c   : > { %3226 = vadd.xlane.f32.xlu0 %v3225_v2 }
0x1369   : > { %3238 = vbcast.lane.b32.xlu1 %v3236_v59, 256 }
0x136d   : > { %3246 = vbcast.lane.b32.xlu1 %v3236_v59, 272 }
0x1371   : > { %3250 = vbcast.lane.b32.xlu1 %v3236_v59, 280 }
0x1372   : > { %3242 = vbcast.lane.b32.xlu0 %v3236_v59, 264 }
0x1375   : > { %3258 = vbcast.lane.b32.xlu1 %v3236_v59, 296 }
0x1376   : > { %3254 = vbcast.lane.b32.xlu0 %v3236_v59, 288 }
0x1379   : > { %3266 = vbcast.lane.b32.xlu1 %v3236_v59, 312 }
0x137a   : > { %3262 = vbcast.lane.b32.xlu0 %v3236_v59, 304 }
0x137d   : > { %3274 = vbcast.lane.b32.xlu1 %v3236_v59, 328 }
0x137e   : > { %3270 = vbcast.lane.b32.xlu0 %v3236_v59, 320 }
0x1381   : > { %3282 = vbcast.lane.b32.xlu1 %v3236_v59, 344 }
0x1382   : > { %3278 = vbcast.lane.b32.xlu0 %v3236_v59, 336 }
0x1385   : > { %3290 = vbcast.lane.b32.xlu1 %v3236_v59, 360 }
0x1386   : > { %3286 = vbcast.lane.b32.xlu0 %v3236_v59, 352 }
0x1389   : > { %3298 = vbcast.lane.b32.xlu1 %v3236_v59, 376 }
0x138a   : > { %3294 = vbcast.lane.b32.xlu0 %v3236_v59, 368 }
0x138d   : > { %3309 = vbcast.lane.b32.xlu1 %v3303_v29, 264 }
0x138e   : > { %3305 = vbcast.lane.b32.xlu0 %v3303_v29, 256 }
0x1391   : > { %3317 = vbcast.lane.b32.xlu1 %v3303_v29, 280  ;;  %v3134_v32 = vpop.xlane.xlu0 %3133 }
0x1392   : > { %3313 = vbcast.lane.b32.xlu0 %v3303_v29, 272 }
0x1395   : > { %3325 = vbcast.lane.b32.xlu1 %v3303_v29, 296  ;;  %v3140_v46 = vpop.xlane.xlu0 %3139 }
0x1396   : > { %3321 = vbcast.lane.b32.xlu0 %v3303_v29, 288 }
0x1399   : > { %3333 = vbcast.lane.b32.xlu1 %v3303_v29, 312 }
0x139a   : > { %3329 = vbcast.lane.b32.xlu0 %v3303_v29, 304 }
0x139d   : > { %3341 = vbcast.lane.b32.xlu1 %v3303_v29, 328 }
0x139e   : > { %3337 = vbcast.lane.b32.xlu0 %v3303_v29, 320 }
0x13a1   : > { %3349 = vbcast.lane.b32.xlu1 %v3303_v29, 344 }
0x13a2   : > { %3345 = vbcast.lane.b32.xlu0 %v3303_v29, 336 }
0x13a5   : > { %3357 = vbcast.lane.b32.xlu1 %v3303_v29, 360 }
0x13a6   : > { %3353 = vbcast.lane.b32.xlu0 %v3303_v29, 352 }
0x13a9   : > { %v3137_v41 = vpop.xlane.xlu1 %3136  ;;  %3365 = vbcast.lane.b32.xlu1 %v3303_v29, 376 }
0x13aa   : > { %3361 = vbcast.lane.b32.xlu0 %v3303_v29, 368 }
0x13ad   : > { %v5407_v43 = vpop.xlane.xlu1 %3145  ;;  %v3143_v1 = vpop.xlane.xlu0 %3142 }
0x13b1   : > { %v5409_v52 = vpop.xlane.xlu1 %3151  ;;  %v5411_v11 = vpop.xlane.xlu0 %3148 }
0x13b5   : > { %v5413_v14 = vpop.xlane.xlu1 %3157  ;;  %v5415_v5 = vpop.xlane.xlu0 %3154 }
0x13b9   : > { %v5417_v15 = vpop.xlane.xlu1 %3163  ;;  %v5419_v26 = vpop.xlane.xlu0 %3160 }
0x13bd   : > { %v5421_v44 = vpop.xlane.xlu1 %3169  ;;  %v5423_v13 = vpop.xlane.xlu0 %3166 }
0x13c1   : > { %v5425_v33 = vpop.xlane.xlu1 %3175  ;;  %v5427_v34 = vpop.xlane.xlu0 %3172 }
0x13c5   : > { %v5429_v9 = vpop.xlane.xlu1 %3181  ;;  %v5431_v61 = vpop.xlane.xlu0 %3178 }
0x13c9   : > { %v5433_v18 = vpop.xlane.xlu1 %3187  ;;  %v5435_v49 = vpop.xlane.xlu0 %3184 }
0x13cd   : > { %v5437_v47 = vpop.xlane.xlu1 %3193  ;;  %v5439_v36 = vpop.xlane.xlu0 %3190 }
0x13d1   : > { %v5441_v7 = vpop.xlane.xlu1 %3199  ;;  %v5443_v22 = vpop.xlane.xlu0 %3196 }
0x13d5   : > { %v5445_v38 = vpop.xlane.xlu1 %3205  ;;  %v5447_v4 = vpop.xlane.xlu0 %3202 }
0x13d9   : > { %v5449_v25 = vpop.xlane.xlu1 %3211  ;;  %v5451_v40 = vpop.xlane.xlu0 %3208 }
0x13dd   : > { %v5453_v12 = vpop.xlane.xlu1 %3217  ;;  %v5455_v54 = vpop.xlane.xlu0 %3214 }
0x13e1   : > { %v5457_v42 = vpop.xlane.xlu1 %3223  ;;  %v5459_v45 = vpop.xlane.xlu0 %3220 }
0x13e5   : > { %v3239_v37 = vpop.permute.xlu1 %3238  ;;  %v5461_v31 = vpop.xlane.xlu0 %3226 }
0x13e6   : > { %4360 = vrcp.f32 %v3239_v37 }
0x13e9   : > { %v3247_v27 = vpop.permute.xlu1 %3246  ;;  %v3243_v50 = vpop.permute.xlu0 %3242 }
0x13ea   : > { %4362 = vrcp.f32 %v3247_v27 }
0x13eb   : > { %4364 = vrcp.f32 %v3243_v50 }
0x13ed   : > { %v3251_v30 = vpop.permute.xlu1 %3250  ;;  %v3255_v51 = vpop.permute.xlu0 %3254 }
0x13ee   : > { %4366 = vrcp.f32 %v3251_v30 }
0x13ef   : > { %4368 = vrcp.f32 %v3255_v51 }
0x13f1   : > { %v3259_v53 = vpop.permute.xlu1 %3258  ;;  %v3263_v10 = vpop.permute.xlu0 %3262 }
0x13f2   : > { %4370 = vrcp.f32 %v3259_v53 }
0x13f3   : > { %v4361_v35 = vpop.eup %4360  ;;  %4372 = vrcp.f32 %v3263_v10 }
0x13f4   : > { %v3400_v57 = vmul.f32 %v4361_v35, %v3134_v32 }
0x13f5   : > { %v3267_v63 = vpop.permute.xlu1 %3266  ;;  %v3271_v48 = vpop.permute.xlu0 %3270 }
0x13f6   : > { %4374 = vrcp.f32 %v3267_v63  ;;  %3496 = vperm.xlu0 %4358, %v3400_v57  }
0x13f7   : > { %v4363_v55 = vpop.eup %4362  ;;  %4376 = vrcp.f32 %v3271_v48 }
0x13f8   : > { %v4365_v21 = vpop.eup %4364  ;;  %v3404_v56 = vmul.f32 %v4363_v55, %v3140_v46 }
0x13f9   : > { %v3275_v58 = vpop.permute.xlu1 %3274  ;;  %v3402_v23 = vmul.f32 %v4365_v21, %v3137_v41  ;;  %v3279_v16 = vpop.permute.xlu0 %3278 }
0x13fa   : > { %4378 = vrcp.f32 %v3275_v58  ;;  %3502 = vperm.xlu0 %4358, %v3404_v56  }
0x13fb   : > { %v4367_v62 = vpop.eup %4366  ;;  %4380 = vrcp.f32 %v3279_v16  ;;  %3499 = vperm.xlu1 %4359, %v3402_v23  }
0x13fc   : > { %v4369_v0 = vpop.eup %4368  ;;  %v3406_v60 = vmul.f32 %v4367_v62, %v3143_v1 }
0x13fd   : > { %v3283_v8 = vpop.permute.xlu1 %3282  ;;  %v3408_v3 = vmul.f32 %v4369_v0, %v5407_v43  ;;  %v3287_v39 = vpop.permute.xlu0 %3286 }
0x13fe   : > { %4382 = vrcp.f32 %v3283_v8 }
0x13ff   : > { %v4371_v2 = vpop.eup %4370  ;;  %3505 = vperm.xlu1 %4359, %v3406_v60   ;;  %3508 = vperm.xlu0 %4358, %v3408_v3  }
0x1400   : > { %v4373_v17 = vpop.eup %4372  ;;  %v3410_v28 = vmul.f32 %v4371_v2, %v5411_v11 }
0x1401   : > { %v5465_v59 = vpop.permute.xlu1 %3290  ;;  %v3412_v29 = vmul.f32 %v4373_v17, %v5409_v52  ;;  %v5468_v32 = vpop.permute.xlu0 %3294 }
0x1403   : > { %v4375_v46 = vpop.eup %4374  ;;  %3511 = vperm.xlu1 %4359, %v3410_v28   ;;  %3514 = vperm.xlu0 %4358, %v3412_v29  }
0x1404   : > { %v4377_v41 = vpop.eup %4376  ;;  %v3414_v43 = vmul.f32 %v4375_v46, %v5415_v5 }
0x1405   : > { %v5471_v1 = vpop.permute.xlu1 %3298  ;;  %v3416_v37 = vmul.f32 %v4377_v41, %v5413_v14  ;;  %v3306_v27 = vpop.permute.xlu0 %3305 }
0x1406   : > { %4384 = vrcp.f32 %v3306_v27 }
0x1407   : > { %v4379_v50 = vpop.eup %4378  ;;  %3517 = vperm.xlu1 %4359, %v3414_v43   ;;  %3520 = vperm.xlu0 %4358, %v3416_v37  }
0x1408   : > { %v4381_v11 = vpop.eup %4380  ;;  %v3418_v52 = vmul.f32 %v4379_v50, %v5419_v26 }
0x1409   : > { %v3310_v30 = vpop.permute.xlu1 %3309  ;;  %v3420_v51 = vmul.f32 %v4381_v11, %v5417_v15  ;;  %v3314_v53 = vpop.permute.xlu0 %3313 }
0x140a   : > { %4386 = vrcp.f32 %v3310_v30 }
0x140b   : > { %v4383_v10 = vpop.eup %4382  ;;  %4388 = vrcp.f32 %v3314_v53  ;;  %3523 = vperm.xlu1 %4359, %v3418_v52   ;;  %3526 = vperm.xlu0 %4358, %v3420_v51  }
0x140c   : > { %v3422_v5 = vmul.f32 %v4383_v10, %v5423_v13 }
0x140d   : > { %v3318_v14 = vpop.permute.xlu1 %3317  ;;  %v3322_v35 = vpop.permute.xlu0 %3321 }
0x140e   : > { %4390 = vrcp.f32 %v3318_v14 }
0x140f   : > { %4392 = vrcp.f32 %v3322_v35  ;;  %3529 = vperm.xlu1 %4359, %v3422_v5  }
0x1411   : > { %v3326_v57 = vpop.permute.xlu1 %3325  ;;  %v3330_v63 = vpop.permute.xlu0 %3329 }
0x1412   : > { %4394 = vrcp.f32 %v3326_v57 }
0x1413   : > { %4396 = vrcp.f32 %v3330_v63  ;;  %v4385_v26 = vpop.eup %4384 }
0x1414   : > { %v3432_v15 = vmul.f32 %v4385_v26, %v5429_v9 }
0x1415   : > { %v3334_v48 = vpop.permute.xlu1 %3333  ;;  %v3338_v55 = vpop.permute.xlu0 %3337 }
0x1416   : > { %4398 = vrcp.f32 %v3334_v48  ;;  %3544 = vperm.xlu0 %4358, %v3432_v15  }
0x1417   : > { %v4387_v21 = vpop.eup %4386  ;;  %4400 = vrcp.f32 %v3338_v55 }
0x1418   : > { %v4389_v56 = vpop.eup %4388  ;;  %v3434_v13 = vmul.f32 %v4387_v21, %v5435_v49 }
0x1419   : > { %v3342_v58 = vpop.permute.xlu1 %3341  ;;  %v3436_v23 = vmul.f32 %v4389_v56, %v5433_v18  ;;  %v3346_v16 = vpop.permute.xlu0 %3345 }
0x141a   : > { %4402 = vrcp.f32 %v3342_v58  ;;  %3547 = vperm.xlu1 %4359, %v3434_v13   ;;  %v3600_v13 = vadd.s32 4294967280, %v5104_v6  ;;  %v3607_v58 = vadd.s32 4294967272, %v5104_v6 }
0x141b   : > { %v4391_v62 = vpop.eup %4390  ;;  %4404 = vrcp.f32 %v3346_v16  ;;  %3550 = vperm.xlu0 %4358, %v3436_v23  }
0x141c   : > { %v4393_v0 = vpop.eup %4392  ;;  %v3438_v9 = vmul.f32 %v4391_v62, %v5439_v36  ;;  %4406 = vrcp.f32 %v3287_v39  ;;  %v3603_v62 = vsub.s32 %v3600_v13, %v4721_v24 }
0x141d   : > { %v3350_v60 = vpop.permute.xlu1 %3349  ;;  %v3440_v8 = vmul.f32 %v4393_v0, %v5437_v47  ;;  %v3354_v3 = vpop.permute.xlu0 %3353  ;;  %v3614_v0 = vadd.s32 4294967264, %v5104_v6 }
0x141e   : > { %4408 = vrcp.f32 %v3350_v60  ;;  %3553 = vperm.xlu1 %4359, %v3438_v9   ;;  %v3621_v9 = vadd.s32 4294967256, %v5104_v6 }
0x141f   : > { %v4395_v49 = vpop.eup %4394  ;;  %3556 = vperm.xlu0 %4358, %v3440_v8   ;;  %4410 = vrcp.f32 %v3354_v3  ;;  %v3610_v8 = vsub.s32 %v3607_v58, %v4721_v24  ;;  %v3684_v58 = vadd.s32 4294967184, %v5104_v6 }
0x1420   : > { %v4397_v2 = vpop.eup %4396  ;;  %v3442_v18 = vmul.f32 %v4395_v49, %v5443_v22  ;;  %4412 = vrcp.f32 %v5465_v59 }
0x1421   : > { %v3358_v17 = vpop.permute.xlu1 %3357  ;;  %v3444_v28 = vmul.f32 %v4397_v2, %v5441_v7  ;;  %v3362_v29 = vpop.permute.xlu0 %3361 }
0x1422   : > { %3559 = vperm.xlu1 %4359, %v3442_v18   ;;  %4414 = vrcp.f32 %v3358_v17  ;;  %v3628_v18 = vadd.s32 4294967248, %v5104_v6  ;;  %v3635_v17 = vadd.s32 4294967240, %v5104_v6 }
0x1423   : > { %v4399_v36 = vpop.eup %4398  ;;  %3562 = vperm.xlu0 %4358, %v3444_v28   ;;  %4416 = vrcp.f32 %v5468_v32 }
0x1424   : > { %v4401_v39 = vpop.eup %4400  ;;  %v3446_v47 = vmul.f32 %v4399_v36, %v5447_v4  ;;  %4418 = vrcp.f32 %v3362_v29  ;;  %v3624_v29 = vsub.s32 %v3621_v9, %v4721_v24 }
0x1425   : > { %v3448_v46 = vmul.f32 %v4401_v39, %v5445_v38  ;;  %4420 = vrcp.f32 %v5471_v1  ;;  %v3366_v7 = vpop.permute.xlu1 %3365 }
0x1426   : > { %3565 = vperm.xlu1 %4359, %v3446_v47   ;;  %4422 = vrcp.f32 %v3366_v7  ;;  %v3617_v47 = vsub.s32 %v3614_v0, %v4721_v24 }
0x1427   : > { %v4403_v41 = vpop.eup %4402  ;;  %3568 = vperm.xlu0 %4358, %v3448_v46  }
0x1428   : > { %v4405_v22 = vpop.eup %4404  ;;  %v3450_v59 = vmul.f32 %v4403_v41, %v5451_v40 }
0x1429   : > { %v3452_v43 = vmul.f32 %v4405_v22, %v5449_v25  ;;  %v4407_v37 = vpop.eup %4406 }
0x142a   : > { %3571 = vperm.xlu1 %4359, %v3450_v59   ;;  %v3424_v27 = vmul.f32 %v4407_v37, %v5421_v44  ;;  %v3642_v37 = vadd.s32 4294967232, %v5104_v6 }
0x142b   : > { %v4409_v4 = vpop.eup %4408  ;;  %3574 = vperm.xlu0 %4358, %v3452_v43   ;;  %v3638_v43 = vsub.s32 %v3635_v17, %v4721_v24 }
0x142c   : > { %v3454_v32 = vmul.f32 %v4409_v4, %v5455_v54  ;;  %v4411_v38 = vpop.eup %4410  ;;  %v3649_v4 = vadd.s32 4294967224, %v5104_v6 }
0x142d   : > { %v4413_v50 = vpop.eup %4412  ;;  %v3456_v40 = vmul.f32 %v4411_v38, %v5453_v12 }
0x142e   : > { %3577 = vperm.xlu1 %4359, %v3454_v32   ;;  %v3426_v1 = vmul.f32 %v4413_v50, %v5427_v34 }
0x142f   : > { %3532 = vperm.xlu0 %4358, %v3424_v27   ;;  %v4415_v11 = vpop.eup %4414 }
0x1430   : > { %v4417_v52 = vpop.eup %4416  ;;  %v3458_v25 = vmul.f32 %v4415_v11, %v5459_v45 }
0x1431   : > { %v4419_v30 = vpop.eup %4418  ;;  %v3428_v51 = vmul.f32 %v4417_v52, %v5425_v33 }
0x1432   : > { %3580 = vperm.xlu1 %4359, %v3456_v40   ;;  %v4421_v54 = vpop.eup %4420  ;;  %v3460_v44 = vmul.f32 %v4419_v30, %v5457_v42  ;;  %v3656_v30 = vadd.s32 4294967216, %v5104_v6 }
0x1433   : > { %3535 = vperm.xlu0 %4358, %v3426_v1   ;;  %v4423_v53 = vpop.eup %4422  ;;  %v3430_v10 = vmul.f32 %v4421_v54, %v5431_v61  ;;  %v3645_v54 = vsub.s32 %v3642_v37, %v4721_v24 }
0x1434   : > { %v3462_v34 = vmul.f32 %v4423_v53, %v5461_v31  ;;  %v3663_v53 = vadd.s32 4294967208, %v5104_v6 }
0x1436   : > { %3583 = vperm.xlu1 %4359, %v3458_v25  }
0x1437   : > { %3538 = vperm.xlu0 %4358, %v3428_v51  }
0x143a   : > { %3586 = vperm.xlu1 %4359, %v3460_v44   ;;  %v3652_v44 = vsub.s32 %v3649_v4, %v4721_v24 }
0x143b   : > { %3541 = vperm.xlu0 %4358, %v3430_v10  }
0x143e   : > { %3589 = vperm.xlu1 %4359, %v3462_v34  }
0x1471   : > { %v3497_v12 = vpop.permute.xlu0 %3496 }
0x1472   : > { %v3594_v2 = vrot.slane %v3497_v12, %v5115_v19 }
0x1475   : > { %v3503_v14 = vpop.permute.xlu0 %3502 }
0x1476   : > { %v3500_v5 = vpop.permute.xlu1 %3499  ;;  %v3604_v39 = vrot.slane %v3503_v14, %v3603_v62 }
0x1477   : > { %v3598_v60 = vrot.slane %v3500_v5, %v5118_v20 }
0x147a   : > { %v3506_v45 = vpop.permute.xlu1 %3505  ;;  %v5500_v35 = vpop.permute.xlu0 %3508 }
0x147b   : > { %v3611_v41 = vrot.slane %v3506_v45, %v3610_v8  ;;  %v3618_v27 = vrot.slane %v5500_v35, %v3617_v47 }
0x147e   : > { %v5502_v33 = vpop.permute.xlu1 %3511  ;;  %v5504_v57 = vpop.permute.xlu0 %3514 }
0x147f   : > { %v3625_v1 = vrot.slane %v5502_v33, %v3624_v29 }
0x1482   : > { %v5506_v63 = vpop.permute.xlu1 %3517  ;;  %v5508_v42 = vpop.permute.xlu0 %3520 }
0x1483   : > { %v3639_v35 = vrot.slane %v5506_v63, %v3638_v43 }
0x1486   : > { %v5510_v61 = vpop.permute.xlu1 %3523  ;;  %v5512_v26 = vpop.permute.xlu0 %3526 }
0x148a   : > { %v5514_v31 = vpop.permute.xlu1 %3529 }
0x1491   : > { %v3545_v48 = vpop.permute.xlu0 %3544 }
0x1492   : > { %v3701_v28 = vrot.slane %v3545_v48, %v5115_v19  ;;  %v3631_v19 = vsub.s32 %v3628_v18, %v4721_v24 }
0x1494   : > { %v3632_v12 = vrot.slane %v5504_v57, %v3631_v19  ;;  %v3677_v57 = vadd.s32 4294967192, %v5104_v6 }
0x1495   : > { %v3548_v15 = vpop.permute.xlu1 %3547 }
0x1496   : > { %v3551_v55 = vpop.permute.xlu0 %3550  ;;  %v3705_v3 = vrot.slane %v3548_v15, %v5118_v20  ;;  %v3599_v20 = vsel %vm3068_vm13, %v3598_v60, %v3594_v2  ;;  %v3659_v15 = vsub.s32 %v3656_v30, %v4721_v24  ;;  %v3653_v60 = vrot.slane %v5510_v61, %v3652_v44 }
0x1497   : > { %v3710_v46 = vrot.slane %v3551_v55, %v3603_v62  ;;  %v3606_v38 = vsel %vm3605_vm8, %v3604_v39, %v3599_v20  ;;  %v3670_v55 = vadd.s32 4294967200, %v5104_v6  ;;  %v3680_v2 = vsub.s32 %v3677_v57, %v4721_v24 }
0x1498   : > { %v3706_v22 = vsel %vm3068_vm13, %v3705_v3, %v3701_v28  ;;  %v3613_v11 = vsel %vm3612_vm11, %v3611_v41, %v3606_v38  ;;  %vm3626_vm13 = vcmask 392512   ;;  %v3660_v61 = vrot.slane %v5512_v26, %v3659_v15 }
0x1499   : > { %v3554_v21 = vpop.permute.xlu1 %3553  ;;  %v3711_v50 = vsel %vm3605_vm8, %v3710_v46, %v3706_v22  ;;  %v3620_v34 = vsel %vm3619_vm12, %v3618_v27, %v3613_v11 }
0x149a   : > { %v3557_v56 = vpop.permute.xlu0 %3556  ;;  %v3715_v59 = vrot.slane %v3554_v21, %v3610_v8  ;;  %v3627_v45 = vsel %vm3626_vm13, %v3625_v1, %v3620_v34 }
0x149b   : > { %v3720_v40 = vrot.slane %v3557_v56, %v3617_v47  ;;  %v3666_v56 = vsub.s32 %v3663_v53, %v4721_v24  ;;  %v3634_v63 = vsel %vm3633_vm14, %v3632_v12, %v3627_v45 }
0x149c   : > { %v3716_v52 = vsel %vm3612_vm11, %v3715_v59, %v3711_v50  ;;  %v3641_v9 = vsel %vm3640_vm15, %v3639_v35, %v3634_v63 }
0x149d   : > { %v3560_v23 = vpop.permute.xlu1 %3559  ;;  %v3721_v5 = vsel %vm3619_vm12, %v3720_v40, %v3716_v52 }
0x149e   : > { %v5518_v16 = vpop.permute.xlu0 %3562  ;;  %v3725_v25 = vrot.slane %v3560_v23, %v3624_v29  ;;  %v3691_v23 = vadd.s32 4294967176, %v5104_v6  ;;  %v3667_v29 = vrot.slane %v5514_v31, %v3666_v56 }
0x149f   : > { %v3730_v14 = vrot.slane %v5518_v16, %v3631_v19  ;;  %v3646_v16 = vrot.slane %v5508_v42, %v3645_v54  ;;  %v3687_v42 = vsub.s32 %v3684_v58, %v4721_v24 }
0x14a0   : > { %v3726_v33 = vsel %vm3626_vm13, %v3725_v25, %v3721_v5  ;;  %v3694_v17 = vsub.s32 %v3691_v23, %v4721_v24 }
0x14a1   : > { %v5526_v49 = vpop.permute.xlu1 %3565  ;;  %v3731_v62 = vsel %vm3633_vm14, %v3730_v14, %v3726_v33  ;;  %v3648_v28 = vsel %vm3647_vm0, %v3646_v16, %v3641_v9 }
0x14a2   : > { %v5532_v36 = vpop.permute.xlu0 %3568  ;;  %v3735_v48 = vrot.slane %v5526_v49, %v3638_v43  ;;  %v3673_v49 = vsub.s32 %v3670_v55, %v4721_v24  ;;  %v3655_v47 = vsel %vm3654_vm1, %v3653_v60, %v3648_v28 }
0x14a3   : > { %v3740_v0 = vrot.slane %v5532_v36, %v3645_v54  ;;  %v3662_v26 = vsel %vm3661_vm2, %v3660_v61, %v3655_v47 }
0x14a4   : > { %v3736_v8 = vsel %vm3640_vm15, %v3735_v48, %v3731_v62 }
0x14a5   : > { %v5538_v7 = vpop.permute.xlu1 %3571  ;;  %v3741_v36 = vsel %vm3647_vm0, %v3740_v0, %v3736_v8 }
0x14a6   : > { %v5544_v32 = vpop.permute.xlu0 %3574  ;;  %v3745_v3 = vrot.slane %v5538_v7, %v3652_v44 }
0x14a7   : > { %v3750_v39 = vrot.slane %v5544_v32, %v3659_v15  ;;  %v3669_v32 = vsel %vm3668_vm3, %v3667_v29, %v3662_v26 }
0x14a8   : > { %v3746_v46 = vsel %vm3654_vm1, %v3745_v3, %v3741_v36 }
0x14a9   : > { %v5551_v51 = vpop.permute.xlu1 %3577  ;;  %v3751_v43 = vsel %vm3661_vm2, %v3750_v39, %v3746_v46 }
0x14aa   : > { %v3533_v10 = vpop.permute.xlu0 %3532  ;;  %v3755_v20 = vrot.slane %v5551_v51, %v3666_v56 }
0x14ab   : > { %v3674_v41 = vrot.slane %v3533_v10, %v3673_v49 }
0x14ac   : > { %v3756_v31 = vsel %vm3668_vm3, %v3755_v20, %v3751_v43 }
0x14ad   : > { %v3581_v21 = vpop.permute.xlu1 %3580  ;;  %v3676_v27 = vsel %vm3675_vm4, %v3674_v41, %v3669_v32 }
0x14ae   : > { %v3536_v13 = vpop.permute.xlu0 %3535  ;;  %v3760_v22 = vrot.slane %v3581_v21, %v3673_v49 }
0x14af   : > { %v3681_v24 = vrot.slane %v3536_v13, %v3680_v2 }
0x14b0   : > { %v3761_v50 = vsel %vm3675_vm4, %v3760_v22, %v3756_v31 }
0x14b1   : > { %v3584_v6 = vpop.permute.xlu1 %3583  ;;  %v3683_v11 = vsel %vm3682_vm5, %v3681_v24, %v3676_v27 }
0x14b2   : > { %v3539_v18 = vpop.permute.xlu0 %3538  ;;  %v3765_v7 = vrot.slane %v3584_v6, %v3680_v2 }
0x14b3   : > { %v3688_v37 = vrot.slane %v3539_v18, %v3687_v42 }
0x14b4   : > { %v3766_v1 = vsel %vm3682_vm5, %v3765_v7, %v3761_v50 }
0x14b5   : > { %v3587_v59 = vpop.permute.xlu1 %3586  ;;  %v3690_v25 = vsel %vm3689_vm6, %v3688_v37, %v3683_v11 }
0x14b6   : > { %v3542_v19 = vpop.permute.xlu0 %3541  ;;  %v3770_v4 = vrot.slane %v3587_v59, %v3687_v42 }
0x14b7   : > { %v3695_v38 = vrot.slane %v3542_v19, %v3694_v17 }
0x14b8   : > { %v3771_v30 = vsel %vm3689_vm6, %v3770_v4, %v3766_v1 }
0x14b9   : > { %v3590_v40 = vpop.permute.xlu1 %3589  ;;  %v3697_v51 = vsel %vm3696_vm7, %v3695_v38, %v3690_v25 }
0x14ba   : > { %v3775_v52 = vrot.slane %v3590_v40, %v3694_v17 }
0x14bc   : > { %v3776_v54 = vsel %vm3696_vm7, %v3775_v52, %v3771_v30 }
0x14bd   : > { %v3777_v44 = vsel %vm3079_vm9, %v3776_v54, %v3697_v51 }
0x14be   : > { %3779 = vst [vmem:[#allocation4] sm:$0x3] %v3777_v44 }
0x14bf PF: > { %p4223_p6 = scmp.eq.s32.totalorder %s4591_s24, 1  ;;  %s4476_s23 = smov [#allocation4]  }
0x14c0   : > { %s3787_s26 = sshll.u32 %s4476_s23, 4  ;;  %s3788_s26 = int_to_ptr.vmem [resolvable:$true] %s3787_s26 }
0x14c1   : > { %s4424_s3 = scalar_lea.vmem %s3788_s26, 32  ;;  %p4431_p10 = scmp.lt.s32.totalorder %s3788_s26, %s3788_s26 }
0x14c2   : > { %p4425_p7 = scmp.ne.s32.totalorder %s3788_s26, %s4424_s3  ;;  %p4432_p11 = scmp.lt.s32.totalorder %s4424_s3, %s4424_s3 }
0x14c4   : > { %p4426_p8 = pnand %p4425_p7, %p4223_p6  ;;  %p4433_p12 = por %p4432_p11, %p4431_p10 }
0x14c6   : > { %p4427_p9 = pneg %p4426_p8 }
0x14c8   : > { %p4434_p13 = pnand %p4433_p12, %p4427_p9 }
0x14ca   : > { %4437 = shalt.err (!%p4434_p13)
}
0x14cb   : > { %s5685_s25 = sld [smem:[#allocation17_spill]] }
0x14d1   : > { %4220 = dma.vmem_to_hbm [thread:$0]  (%p4223_p6), %s3788_s26, 32, %s5685_s25, [#allocation5]  }
0x14d2   : > { %4453 = dma.done.wait (%p4223_p6), [#allocation5], 32  }
0x14d3   : > { %4455 = vsyncadd (%p4223_p6), [#allocation5], 4294967264 }
0x14d4 PF: > { %s5686_s2 = sld [smem:[#allocation7_spill]] }
0x14da   : > { %s33_s23 = sadd.s32 1, %s5686_s2  }
0x14db   : > { %p30_p0 = scmp.ge.s32.totalorder %s33_s23, 4  }
0x14dd   :  { %32 = sbr.rel (!%p30_p0) target bundleno = 11 (0xb), region = 171 }
0x14e2   :  { %3800 = vsyncpa [#allocation5], 1 }
0x14e3   :  { %3802 = vsyncpa [#allocation5 + $0x1], 1 }

</bundles_post_ra>
